<compile_context>
chip_gen: v7x
topology: tpu7x:2x2x1
jax: 0.10.0
libtpu: 0.0.40
codegen_flags: <defaults>
</compile_context>

<pallas_src>
import math
import jax
import jax.numpy as jnp
from jax.experimental import pallas as pl
from jax.experimental.pallas import tpu as pltpu

# ----- small, module-consistent config -----
HIDDEN = 32
NUM_HEADS = 4
HEAD_DIM = HIDDEN // NUM_HEADS
MLP_DIM = 64
NUM_LAYERS = 3
MSA_LAYER = 2          # 1-indexed, as in Encoder(config, vis, msa_layer)
SEQ = 8
BATCH = 2
LN_EPS = 1e-6

# Batch elements handled per grid step.  1 => grid=(BATCH,), "parallel" so v7x's
# two TensorCores each take a batch slice.  BATCH => grid=(1,), batch flattened
# into the matmul M dimension (preferred on single-TC v5e/v6e).
BATCH_BLOCK = 1

# Set to jnp.bfloat16 on v6e/v7x for MXU peak (f32 accumulation is kept, and all
# LayerNorm / softmax / gelu / residual math stays f32).  Default f32 keeps the
# forward pass bit-faithful to the torch reference.
MXU_DTYPE = jnp.float32


def _layernorm(x, w, b):
    mu = jnp.mean(x, axis=-1, keepdims=True)
    var = jnp.mean((x - mu) ** 2, axis=-1, keepdims=True)
    return (x - mu) * jax.lax.rsqrt(var + LN_EPS) * w + b


def _matmul(a, b, dims=(((1,), (0,)), ((), ()))):
    """2-D matmul on the MXU with f32 accumulation (operands optionally bf16)."""
    return jax.lax.dot_general(
        a.astype(MXU_DTYPE), b.astype(MXU_DTYPE), dims,
        preferred_element_type=jnp.float32)


def _gelu_exact(x):
    """Exact (erf) GELU, matching torch.nn.functional.gelu default.

    erf is evaluated with the Abramowitz–Stegun 7.1.26 polynomial
    (max abs error ~1.5e-7 => fp32-exact) using only exp / mul / where,
    all of which lower cleanly in Mosaic.
    """
    z = x * (1.0 / math.sqrt(2.0))
    a = jnp.abs(z)
    t = 1.0 / (1.0 + 0.3275911 * a)
    poly = t * (0.254829592
                + t * (-0.284496736
                       + t * (1.421413741
                              + t * (-1.453152027
                                     + t * 1.061405429))))
    erf_abs = 1.0 - poly * jnp.exp(-a * a)
    erf = jnp.where(z < 0.0, -erf_abs, erf_abs)
    return 0.5 * x * (1.0 + erf)


def encoder_kernel(x_ref,
                   ln1w_ref, ln1b_ref, wqkv_ref, bqkv_ref, wo_ref, bo_ref,
                   ln2w_ref, ln2b_ref, w1_ref, b1_ref, w2_ref, b2_ref,
                   encw_ref, encb_ref,
                   enc_ref, attn_ref):
    """Full encoder (all layers + final LN) for one batch block.

    x_ref: (BATCH_BLOCK, S, D).  Weight refs are (L, ...) stacked and resident
    in VMEM (constant index maps => DMA'd once for the whole grid).
    """
    BB = BATCH_BLOCK
    M = BB * SEQ
    x = x_ref[...].reshape(M, HIDDEN)                      # flatten batch block into M

    inv_sqrt_dh = 1.0 / math.sqrt(HEAD_DIM)
    cls_acc = [jnp.zeros((1, SEQ), jnp.float32) for _ in range(BB)]

    for l in range(NUM_LAYERS):                            # unrolled layer loop
        # ---------------- attention sub-block ----------------
        xn = _layernorm(x, ln1w_ref[l], ln1b_ref[l])
        qkv = _matmul(xn, wqkv_ref[l]) + bqkv_ref[l]       # (M, 3D), fused QKV

        ctx_blocks = []
        for bb in range(BB):                               # unrolled (tiny)
            r0 = bb * SEQ
            q_b = qkv[r0:r0 + SEQ, 0:HIDDEN] * inv_sqrt_dh     # scale folded into q
            k_b = qkv[r0:r0 + SEQ, HIDDEN:2 * HIDDEN]
            v_b = qkv[r0:r0 + SEQ, 2 * HIDDEN:3 * HIDDEN]

            head_ctx = []
            for h in range(NUM_HEADS):                     # unrolled per-head 2-D dots
                c0 = h * HEAD_DIM
                qh = q_b[:, c0:c0 + HEAD_DIM]
                kh = k_b[:, c0:c0 + HEAD_DIM]
                vh = v_b[:, c0:c0 + HEAD_DIM]

                s = _matmul(qh, kh, dims=(((1,), (1,)), ((), ())))   # q @ k.T, no transpose
                s = s - jnp.max(s, axis=-1, keepdims=True)
                e = jnp.exp(s)
                p = e * pl.reciprocal(jnp.sum(e, axis=-1, keepdims=True), approx=True)

                # accumulate the cls-token row (only thing consumed downstream)
                cls_acc[bb] = cls_acc[bb] + p[0:1, :]

                head_ctx.append(_matmul(p, vh))            # (S, dh)

            ctx_blocks.append(jnp.concatenate(head_ctx, axis=1))   # (S, D)

        ctx = ctx_blocks[0] if BB == 1 else jnp.concatenate(ctx_blocks, axis=0)  # (M, D)
        attn_out = _matmul(ctx, wo_ref[l]) + bo_ref[l]
        x = x + attn_out                                   # residual

        # ---------------- mlp sub-block ----------------
        xn2 = _layernorm(x, ln2w_ref[l], ln2b_ref[l])
        hmid = _matmul(xn2, w1_ref[l]) + b1_ref[l]
        hmid = _gelu_exact(hmid)                           # exact erf gelu (torch default)
        x = x + (_matmul(hmid, w2_ref[l]) + b2_ref[l])     # residual

    # final encoder LayerNorm
    enc_ref[...] = _layernorm(x, encw_ref[...], encb_ref[...]).reshape(BB, SEQ, HIDDEN)

    # mean over heads and layers of the cls-token attention row
    scale = 1.0 / (NUM_HEADS * NUM_LAYERS)
    for bb in range(BB):
        attn_ref[bb] = cls_acc[bb] * scale


def _full_spec(shape):
    n = len(shape)
    return pl.BlockSpec(shape, lambda b, _n=n: (0,) * _n)


def run_encoder(x, p):
    B, S, D = x.shape
    assert S == SEQ and D == HIDDEN and B % BATCH_BLOCK == 0
    nb = B // BATCH_BLOCK

    weights = [p['ln1_w'], p['ln1_b'], p['wqkv'], p['bqkv'], p['wo'], p['bo'],
               p['ln2_w'], p['ln2_b'], p['w1'], p['b1'], p['w2'], p['b2'],
               p['enc_ln_w'], p['enc_ln_b']]

    in_specs = [pl.BlockSpec((BATCH_BLOCK, S, D), lambda b: (b, 0, 0))]
    in_specs += [_full_spec(w.shape) for w in weights]

    out_shape = (jax.ShapeDtypeStruct((B, S, D), jnp.float32),
                 jax.ShapeDtypeStruct((B, 1, S), jnp.float32))
    out_specs = (pl.BlockSpec((BATCH_BLOCK, S, D), lambda b: (b, 0, 0)),
                 pl.BlockSpec((BATCH_BLOCK, 1, S), lambda b: (b, 0, 0)))

    return pl.pallas_call(
        encoder_kernel,
        grid=(nb,),
        in_specs=in_specs,
        out_specs=out_specs,
        out_shape=out_shape,
        compiler_params=pltpu.CompilerParams(
            dimension_semantics=("parallel",)),
    )(x, *weights)


def encoder_forward(params, hidden_states):
    """Mirrors Encoder.forward with vis=True.

    Returns (encoded, loss_ad, attn_weights, tran_weights)."""
    encoded, cls_attn = run_encoder(hidden_states, params)
    # vis=True path: weights[:, :, 0, 1:] averaged over heads and layers
    # (both means already accumulated inside the kernel); drop the cls column.
    attn_weights = cls_attn[:, 0, 1:]                      # (B, S-1)
    # TODO(synk): msa_layer adversarial branch (posi_emb/ad_net/ad_net2,
    # lossZoo.adv_local, merge/out, torch.distributed) is an external
    # dependency; plain attention path used, loss_ad=0.0, tran_weights=None.
    loss_ad = jnp.float32(0.0)
    tran_weights = None
    return encoded, loss_ad, attn_weights, tran_weights


def init_params(key):
    def dense(k, fan_in, fan_out):
        kw, kb = jax.random.split(k)
        w = jax.random.normal(kw, (fan_in, fan_out), jnp.float32) * 0.02
        b = jax.random.normal(kb, (1, fan_out), jnp.float32) * 1e-6
        return w, b

    wqkv, bqkv, wo, bo, w1, b1, w2, b2 = ([] for _ in range(8))
    for lk in jax.random.split(key, NUM_LAYERS):
        ks = jax.random.split(lk, 6)
        wq, bq_ = dense(ks[0], HIDDEN, HIDDEN)
        wk, bk_ = dense(ks[1], HIDDEN, HIDDEN)
        wv, bv_ = dense(ks[2], HIDDEN, HIDDEN)
        wqkv.append(jnp.concatenate([wq, wk, wv], axis=1))     # fused (D, 3D)
        bqkv.append(jnp.concatenate([bq_, bk_, bv_], axis=1))  # fused (1, 3D)
        w, b = dense(ks[3], HIDDEN, HIDDEN); wo.append(w); bo.append(b)
        w, b = dense(ks[4], HIDDEN, MLP_DIM); w1.append(w); b1.append(b)
        w, b = dense(ks[5], MLP_DIM, HIDDEN); w2.append(w); b2.append(b)

    stack = lambda xs: jnp.stack(xs, axis=0)
    return dict(
        ln1_w=jnp.ones((NUM_LAYERS, 1, HIDDEN), jnp.float32),
        ln1_b=jnp.zeros((NUM_LAYERS, 1, HIDDEN), jnp.float32),
        wqkv=stack(wqkv), bqkv=stack(bqkv), wo=stack(wo), bo=stack(bo),
        ln2_w=jnp.ones((NUM_LAYERS, 1, HIDDEN), jnp.float32),
        ln2_b=jnp.zeros((NUM_LAYERS, 1, HIDDEN), jnp.float32),
        w1=stack(w1), b1=stack(b1), w2=stack(w2), b2=stack(b2),
        enc_ln_w=jnp.ones((1, HIDDEN), jnp.float32),
        enc_ln_b=jnp.zeros((1, HIDDEN), jnp.float32),
    )


if __name__ == "__main__":
    key = jax.random.PRNGKey(0)
    pkey, xkey = jax.random.split(key)
    params = init_params(pkey)
    hidden_states = jax.random.normal(xkey, (BATCH, SEQ, HIDDEN), jnp.float32)

    encoded, loss_ad, attn_weights, tran_weights = encoder_forward(
        params, hidden_states)
    jax.block_until_ready((encoded, loss_ad, attn_weights))

    assert encoded.shape == (BATCH, SEQ, HIDDEN)
    assert attn_weights.shape == (BATCH, SEQ - 1)
    assert bool(jnp.all(jnp.isfinite(encoded)))
    print("KERNEL_OK")
</pallas_src>

<mosaic_0001>
module attributes {stable_mosaic.version = 11 : i64} {
  func.func @encoder_kernel(%arg0: i32, %arg1: memref<1x8x32xf32, #tpu.memory_space<vmem>>, %arg2: memref<3x1x32xf32, #tpu.memory_space<vmem>>, %arg3: memref<3x1x32xf32, #tpu.memory_space<vmem>>, %arg4: memref<3x32x96xf32, #tpu.memory_space<vmem>>, %arg5: memref<3x1x96xf32, #tpu.memory_space<vmem>>, %arg6: memref<3x32x32xf32, #tpu.memory_space<vmem>>, %arg7: memref<3x1x32xf32, #tpu.memory_space<vmem>>, %arg8: memref<3x1x32xf32, #tpu.memory_space<vmem>>, %arg9: memref<3x1x32xf32, #tpu.memory_space<vmem>>, %arg10: memref<3x32x64xf32, #tpu.memory_space<vmem>>, %arg11: memref<3x1x64xf32, #tpu.memory_space<vmem>>, %arg12: memref<3x64x32xf32, #tpu.memory_space<vmem>>, %arg13: memref<3x1x32xf32, #tpu.memory_space<vmem>>, %arg14: memref<1x32xf32, #tpu.memory_space<vmem>>, %arg15: memref<1x32xf32, #tpu.memory_space<vmem>>, %arg16: memref<1x8x32xf32, #tpu.memory_space<vmem>>, %arg17: memref<1x1x8xf32, #tpu.memory_space<vmem>>) attributes {dimension_semantics = [#tpu.dimension_semantics<parallel>], iteration_bounds = array<i64: 2>, scalar_prefetch = 0 : i64, scratch_operands = 0 : i64, tpu.core_type = #tpu.core_type<tc>, window_params = [{transform_indices = @transform_0, window_bounds = array<i64: 1, 8, 32>}, {pipeline_mode = #tpu.pipeline_mode<synchronous>, transform_indices = @transform_1, window_bounds = array<i64: 3, 1, 32>}, {pipeline_mode = #tpu.pipeline_mode<synchronous>, transform_indices = @transform_2, window_bounds = array<i64: 3, 1, 32>}, {pipeline_mode = #tpu.pipeline_mode<synchronous>, transform_indices = @transform_3, window_bounds = array<i64: 3, 32, 96>}, {pipeline_mode = #tpu.pipeline_mode<synchronous>, transform_indices = @transform_4, window_bounds = array<i64: 3, 1, 96>}, {pipeline_mode = #tpu.pipeline_mode<synchronous>, transform_indices = @transform_5, window_bounds = array<i64: 3, 32, 32>}, {pipeline_mode = #tpu.pipeline_mode<synchronous>, transform_indices = @transform_6, window_bounds = array<i64: 3, 1, 32>}, {pipeline_mode = #tpu.pipeline_mode<synchronous>, transform_indices = @transform_7, window_bounds = array<i64: 3, 1, 32>}, {pipeline_mode = #tpu.pipeline_mode<synchronous>, transform_indices = @transform_8, window_bounds = array<i64: 3, 1, 32>}, {pipeline_mode = #tpu.pipeline_mode<synchronous>, transform_indices = @transform_9, window_bounds = array<i64: 3, 32, 64>}, {pipeline_mode = #tpu.pipeline_mode<synchronous>, transform_indices = @transform_10, window_bounds = array<i64: 3, 1, 64>}, {pipeline_mode = #tpu.pipeline_mode<synchronous>, transform_indices = @transform_11, window_bounds = array<i64: 3, 64, 32>}, {pipeline_mode = #tpu.pipeline_mode<synchronous>, transform_indices = @transform_12, window_bounds = array<i64: 3, 1, 32>}, {pipeline_mode = #tpu.pipeline_mode<synchronous>, transform_indices = @transform_13, window_bounds = array<i64: 1, 32>}, {pipeline_mode = #tpu.pipeline_mode<synchronous>, transform_indices = @transform_14, window_bounds = array<i64: 1, 32>}, {transform_indices = @transform_15, window_bounds = array<i64: 1, 8, 32>}, {transform_indices = @transform_16, window_bounds = array<i64: 1, 1, 8>}]} {
    %c0 = arith.constant 0 : index
    %c0_0 = arith.constant 0 : index
    %c0_1 = arith.constant 0 : index
    %0 = vector.load %arg1[%c0, %c0_0, %c0_1] : memref<1x8x32xf32, #tpu.memory_space<vmem>>, vector<1x8x32xf32>
    %1 = vector.shape_cast %0 : vector<1x8x32xf32> to vector<8x32xf32>
    %cst = arith.constant 0.000000e+00 : f32
    %2 = vector.broadcast %cst : f32 to vector<1x8xf32>
    %c0_2 = arith.constant 0 : index
    %c0_3 = arith.constant 0 : index
    %c0_4 = arith.constant 0 : index
    %3 = vector.load %arg2[%c0_2, %c0_3, %c0_4] : memref<3x1x32xf32, #tpu.memory_space<vmem>>, vector<1x1x32xf32>
    %4 = vector.shape_cast %3 : vector<1x1x32xf32> to vector<1x32xf32>
    %c0_5 = arith.constant 0 : index
    %c0_6 = arith.constant 0 : index
    %c0_7 = arith.constant 0 : index
    %5 = vector.load %arg3[%c0_5, %c0_6, %c0_7] : memref<3x1x32xf32, #tpu.memory_space<vmem>>, vector<1x1x32xf32>
    %6 = vector.shape_cast %5 : vector<1x1x32xf32> to vector<1x32xf32>
    %cst_8 = arith.constant dense<0.000000e+00> : vector<8xf32>
    %7 = vector.multi_reduction <add>, %1, %cst_8 [1] : vector<8x32xf32> to vector<8xf32>
    %8 = vector.shape_cast %7 : vector<8xf32> to vector<8x1xf32>
    %cst_9 = arith.constant 3.200000e+01 : f32
    %9 = vector.broadcast %cst_9 : f32 to vector<8x1xf32>
    %10 = arith.divf %8, %9 : vector<8x1xf32>
    %11 = vector.broadcast %10 : vector<8x1xf32> to vector<8x32xf32>
    %12 = arith.subf %1, %11 : vector<8x32xf32>
    %13 = arith.mulf %12, %12 : vector<8x32xf32>
    %cst_10 = arith.constant dense<0.000000e+00> : vector<8xf32>
    %14 = vector.multi_reduction <add>, %13, %cst_10 [1] : vector<8x32xf32> to vector<8xf32>
    %15 = vector.shape_cast %14 : vector<8xf32> to vector<8x1xf32>
    %cst_11 = arith.constant 3.200000e+01 : f32
    %16 = vector.broadcast %cst_11 : f32 to vector<8x1xf32>
    %17 = arith.divf %15, %16 : vector<8x1xf32>
    %18 = vector.broadcast %10 : vector<8x1xf32> to vector<8x32xf32>
    %19 = arith.subf %1, %18 : vector<8x32xf32>
    %cst_12 = arith.constant 9.99999997E-7 : f32
    %20 = vector.broadcast %cst_12 : f32 to vector<8x1xf32>
    %21 = arith.addf %17, %20 : vector<8x1xf32>
    %22 = math.rsqrt %21 : vector<8x1xf32>
    %23 = vector.broadcast %22 : vector<8x1xf32> to vector<8x32xf32>
    %24 = arith.mulf %19, %23 : vector<8x32xf32>
    %25 = vector.broadcast %4 : vector<1x32xf32> to vector<8x32xf32>
    %26 = arith.mulf %24, %25 : vector<8x32xf32>
    %27 = vector.broadcast %6 : vector<1x32xf32> to vector<8x32xf32>
    %28 = arith.addf %26, %27 : vector<8x32xf32>
    %c0_13 = arith.constant 0 : index
    %c0_14 = arith.constant 0 : index
    %c0_15 = arith.constant 0 : index
    %29 = vector.load %arg4[%c0_13, %c0_14, %c0_15] : memref<3x32x96xf32, #tpu.memory_space<vmem>>, vector<1x32x96xf32>
    %30 = vector.shape_cast %29 : vector<1x32x96xf32> to vector<32x96xf32>
    %cst_16 = arith.constant dense<0.000000e+00> : vector<8x96xf32>
    %31 = tpu.matmul %28, %30, %cst_16 {dimension_numbers = #tpu.dot_dimension_numbers<[1], [0], [0], [1], [0, 0, 1, 1], [], []>} : vector<8x32xf32>, vector<32x96xf32>, vector<8x96xf32> -> vector<8x96xf32>
    %c0_17 = arith.constant 0 : index
    %c0_18 = arith.constant 0 : index
    %c0_19 = arith.constant 0 : index
    %32 = vector.load %arg5[%c0_17, %c0_18, %c0_19] : memref<3x1x96xf32, #tpu.memory_space<vmem>>, vector<1x1x96xf32>
    %33 = vector.shape_cast %32 : vector<1x1x96xf32> to vector<1x96xf32>
    %34 = vector.broadcast %33 : vector<1x96xf32> to vector<8x96xf32>
    %35 = arith.addf %31, %34 : vector<8x96xf32>
    %36 = vector.extract_strided_slice %35 {offsets = [0, 0], sizes = [8, 32], strides = [1, 1]} : vector<8x96xf32> to vector<8x32xf32>
    %cst_20 = arith.constant 0.353553385 : f32
    %37 = vector.broadcast %cst_20 : f32 to vector<8x32xf32>
    %38 = arith.mulf %36, %37 : vector<8x32xf32>
    %39 = vector.extract_strided_slice %35 {offsets = [0, 32], sizes = [8, 32], strides = [1, 1]} : vector<8x96xf32> to vector<8x32xf32>
    %40 = vector.extract_strided_slice %35 {offsets = [0, 64], sizes = [8, 32], strides = [1, 1]} : vector<8x96xf32> to vector<8x32xf32>
    %41 = vector.extract_strided_slice %38 {offsets = [0, 0], sizes = [8, 8], strides = [1, 1]} : vector<8x32xf32> to vector<8x8xf32>
    %42 = vector.extract_strided_slice %39 {offsets = [0, 0], sizes = [8, 8], strides = [1, 1]} : vector<8x32xf32> to vector<8x8xf32>
    %43 = vector.extract_strided_slice %40 {offsets = [0, 0], sizes = [8, 8], strides = [1, 1]} : vector<8x32xf32> to vector<8x8xf32>
    %cst_21 = arith.constant dense<0.000000e+00> : vector<8x8xf32>
    %44 = tpu.matmul %41, %42, %cst_21 {dimension_numbers = #tpu.dot_dimension_numbers<[1], [1], [0], [0], [0, 0, 1, 0], [], []>} : vector<8x8xf32>, vector<8x8xf32>, vector<8x8xf32> -> vector<8x8xf32>
    %cst_22 = arith.constant dense<0xFF800000> : vector<8xf32>
    %45 = vector.multi_reduction <maximumf>, %44, %cst_22 [1] : vector<8x8xf32> to vector<8xf32>
    %46 = vector.shape_cast %45 : vector<8xf32> to vector<8x1xf32>
    %47 = vector.broadcast %46 : vector<8x1xf32> to vector<8x8xf32>
    %48 = arith.subf %44, %47 : vector<8x8xf32>
    %49 = math.exp %48 : vector<8x8xf32>
    %cst_23 = arith.constant dense<0.000000e+00> : vector<8xf32>
    %50 = vector.multi_reduction <add>, %49, %cst_23 [1] : vector<8x8xf32> to vector<8xf32>
    %51 = vector.shape_cast %50 : vector<8xf32> to vector<8x1xf32>
    %52 = tpu.reciprocal %51 {approx = true} : vector<8x1xf32> -> vector<8x1xf32>
    %53 = vector.broadcast %52 : vector<8x1xf32> to vector<8x8xf32>
    %54 = arith.mulf %49, %53 : vector<8x8xf32>
    %55 = vector.extract_strided_slice %54 {offsets = [0, 0], sizes = [1, 8], strides = [1, 1]} : vector<8x8xf32> to vector<1x8xf32>
    %56 = arith.addf %2, %55 : vector<1x8xf32>
    %cst_24 = arith.constant dense<0.000000e+00> : vector<8x8xf32>
    %57 = tpu.matmul %54, %43, %cst_24 {dimension_numbers = #tpu.dot_dimension_numbers<[1], [0], [0], [1], [0, 0, 1, 1], [], []>} : vector<8x8xf32>, vector<8x8xf32>, vector<8x8xf32> -> vector<8x8xf32>
    %58 = vector.extract_strided_slice %38 {offsets = [0, 8], sizes = [8, 8], strides = [1, 1]} : vector<8x32xf32> to vector<8x8xf32>
    %59 = vector.extract_strided_slice %39 {offsets = [0, 8], sizes = [8, 8], strides = [1, 1]} : vector<8x32xf32> to vector<8x8xf32>
    %60 = vector.extract_strided_slice %40 {offsets = [0, 8], sizes = [8, 8], strides = [1, 1]} : vector<8x32xf32> to vector<8x8xf32>
    %cst_25 = arith.constant dense<0.000000e+00> : vector<8x8xf32>
    %61 = tpu.matmul %58, %59, %cst_25 {dimension_numbers = #tpu.dot_dimension_numbers<[1], [1], [0], [0], [0, 0, 1, 0], [], []>} : vector<8x8xf32>, vector<8x8xf32>, vector<8x8xf32> -> vector<8x8xf32>
    %cst_26 = arith.constant dense<0xFF800000> : vector<8xf32>
    %62 = vector.multi_reduction <maximumf>, %61, %cst_26 [1] : vector<8x8xf32> to vector<8xf32>
    %63 = vector.shape_cast %62 : vector<8xf32> to vector<8x1xf32>
    %64 = vector.broadcast %63 : vector<8x1xf32> to vector<8x8xf32>
    %65 = arith.subf %61, %64 : vector<8x8xf32>
    %66 = math.exp %65 : vector<8x8xf32>
    %cst_27 = arith.constant dense<0.000000e+00> : vector<8xf32>
    %67 = vector.multi_reduction <add>, %66, %cst_27 [1] : vector<8x8xf32> to vector<8xf32>
    %68 = vector.shape_cast %67 : vector<8xf32> to vector<8x1xf32>
    %69 = tpu.reciprocal %68 {approx = true} : vector<8x1xf32> -> vector<8x1xf32>
    %70 = vector.broadcast %69 : vector<8x1xf32> to vector<8x8xf32>
    %71 = arith.mulf %66, %70 : vector<8x8xf32>
    %72 = vector.extract_strided_slice %71 {offsets = [0, 0], sizes = [1, 8], strides = [1, 1]} : vector<8x8xf32> to vector<1x8xf32>
    %73 = arith.addf %56, %72 : vector<1x8xf32>
    %cst_28 = arith.constant dense<0.000000e+00> : vector<8x8xf32>
    %74 = tpu.matmul %71, %60, %cst_28 {dimension_numbers = #tpu.dot_dimension_numbers<[1], [0], [0], [1], [0, 0, 1, 1], [], []>} : vector<8x8xf32>, vector<8x8xf32>, vector<8x8xf32> -> vector<8x8xf32>
    %75 = vector.extract_strided_slice %38 {offsets = [0, 16], sizes = [8, 8], strides = [1, 1]} : vector<8x32xf32> to vector<8x8xf32>
    %76 = vector.extract_strided_slice %39 {offsets = [0, 16], sizes = [8, 8], strides = [1, 1]} : vector<8x32xf32> to vector<8x8xf32>
    %77 = vector.extract_strided_slice %40 {offsets = [0, 16], sizes = [8, 8], strides = [1, 1]} : vector<8x32xf32> to vector<8x8xf32>
    %cst_29 = arith.constant dense<0.000000e+00> : vector<8x8xf32>
    %78 = tpu.matmul %75, %76, %cst_29 {dimension_numbers = #tpu.dot_dimension_numbers<[1], [1], [0], [0], [0, 0, 1, 0], [], []>} : vector<8x8xf32>, vector<8x8xf32>, vector<8x8xf32> -> vector<8x8xf32>
    %cst_30 = arith.constant dense<0xFF800000> : vector<8xf32>
    %79 = vector.multi_reduction <maximumf>, %78, %cst_30 [1] : vector<8x8xf32> to vector<8xf32>
    %80 = vector.shape_cast %79 : vector<8xf32> to vector<8x1xf32>
    %81 = vector.broadcast %80 : vector<8x1xf32> to vector<8x8xf32>
    %82 = arith.subf %78, %81 : vector<8x8xf32>
    %83 = math.exp %82 : vector<8x8xf32>
    %cst_31 = arith.constant dense<0.000000e+00> : vector<8xf32>
    %84 = vector.multi_reduction <add>, %83, %cst_31 [1] : vector<8x8xf32> to vector<8xf32>
    %85 = vector.shape_cast %84 : vector<8xf32> to vector<8x1xf32>
    %86 = tpu.reciprocal %85 {approx = true} : vector<8x1xf32> -> vector<8x1xf32>
    %87 = vector.broadcast %86 : vector<8x1xf32> to vector<8x8xf32>
    %88 = arith.mulf %83, %87 : vector<8x8xf32>
    %89 = vector.extract_strided_slice %88 {offsets = [0, 0], sizes = [1, 8], strides = [1, 1]} : vector<8x8xf32> to vector<1x8xf32>
    %90 = arith.addf %73, %89 : vector<1x8xf32>
    %cst_32 = arith.constant dense<0.000000e+00> : vector<8x8xf32>
    %91 = tpu.matmul %88, %77, %cst_32 {dimension_numbers = #tpu.dot_dimension_numbers<[1], [0], [0], [1], [0, 0, 1, 1], [], []>} : vector<8x8xf32>, vector<8x8xf32>, vector<8x8xf32> -> vector<8x8xf32>
    %92 = vector.extract_strided_slice %38 {offsets = [0, 24], sizes = [8, 8], strides = [1, 1]} : vector<8x32xf32> to vector<8x8xf32>
    %93 = vector.extract_strided_slice %39 {offsets = [0, 24], sizes = [8, 8], strides = [1, 1]} : vector<8x32xf32> to vector<8x8xf32>
    %94 = vector.extract_strided_slice %40 {offsets = [0, 24], sizes = [8, 8], strides = [1, 1]} : vector<8x32xf32> to vector<8x8xf32>
    %cst_33 = arith.constant dense<0.000000e+00> : vector<8x8xf32>
    %95 = tpu.matmul %92, %93, %cst_33 {dimension_numbers = #tpu.dot_dimension_numbers<[1], [1], [0], [0], [0, 0, 1, 0], [], []>} : vector<8x8xf32>, vector<8x8xf32>, vector<8x8xf32> -> vector<8x8xf32>
    %cst_34 = arith.constant dense<0xFF800000> : vector<8xf32>
    %96 = vector.multi_reduction <maximumf>, %95, %cst_34 [1] : vector<8x8xf32> to vector<8xf32>
    %97 = vector.shape_cast %96 : vector<8xf32> to vector<8x1xf32>
    %98 = vector.broadcast %97 : vector<8x1xf32> to vector<8x8xf32>
    %99 = arith.subf %95, %98 : vector<8x8xf32>
    %100 = math.exp %99 : vector<8x8xf32>
    %cst_35 = arith.constant dense<0.000000e+00> : vector<8xf32>
    %101 = vector.multi_reduction <add>, %100, %cst_35 [1] : vector<8x8xf32> to vector<8xf32>
    %102 = vector.shape_cast %101 : vector<8xf32> to vector<8x1xf32>
    %103 = tpu.reciprocal %102 {approx = true} : vector<8x1xf32> -> vector<8x1xf32>
    %104 = vector.broadcast %103 : vector<8x1xf32> to vector<8x8xf32>
    %105 = arith.mulf %100, %104 : vector<8x8xf32>
    %106 = vector.extract_strided_slice %105 {offsets = [0, 0], sizes = [1, 8], strides = [1, 1]} : vector<8x8xf32> to vector<1x8xf32>
    %107 = arith.addf %90, %106 : vector<1x8xf32>
    %cst_36 = arith.constant dense<0.000000e+00> : vector<8x8xf32>
    %108 = tpu.matmul %105, %94, %cst_36 {dimension_numbers = #tpu.dot_dimension_numbers<[1], [0], [0], [1], [0, 0, 1, 1], [], []>} : vector<8x8xf32>, vector<8x8xf32>, vector<8x8xf32> -> vector<8x8xf32>
    %109 = tpu.concatenate %57, %74, %91, %108 in 1 : vector<8x8xf32>, vector<8x8xf32>, vector<8x8xf32>, vector<8x8xf32> -> vector<8x32xf32>
    %c0_37 = arith.constant 0 : index
    %c0_38 = arith.constant 0 : index
    %c0_39 = arith.constant 0 : index
    %110 = vector.load %arg6[%c0_37, %c0_38, %c0_39] : memref<3x32x32xf32, #tpu.memory_space<vmem>>, vector<1x32x32xf32>
    %111 = vector.shape_cast %110 : vector<1x32x32xf32> to vector<32x32xf32>
    %cst_40 = arith.constant dense<0.000000e+00> : vector<8x32xf32>
    %112 = tpu.matmul %109, %111, %cst_40 {dimension_numbers = #tpu.dot_dimension_numbers<[1], [0], [0], [1], [0, 0, 1, 1], [], []>} : vector<8x32xf32>, vector<32x32xf32>, vector<8x32xf32> -> vector<8x32xf32>
    %c0_41 = arith.constant 0 : index
    %c0_42 = arith.constant 0 : index
    %c0_43 = arith.constant 0 : index
    %113 = vector.load %arg7[%c0_41, %c0_42, %c0_43] : memref<3x1x32xf32, #tpu.memory_space<vmem>>, vector<1x1x32xf32>
    %114 = vector.shape_cast %113 : vector<1x1x32xf32> to vector<1x32xf32>
    %115 = vector.broadcast %114 : vector<1x32xf32> to vector<8x32xf32>
    %116 = arith.addf %112, %115 : vector<8x32xf32>
    %117 = arith.addf %1, %116 : vector<8x32xf32>
    %c0_44 = arith.constant 0 : index
    %c0_45 = arith.constant 0 : index
    %c0_46 = arith.constant 0 : index
    %118 = vector.load %arg8[%c0_44, %c0_45, %c0_46] : memref<3x1x32xf32, #tpu.memory_space<vmem>>, vector<1x1x32xf32>
    %119 = vector.shape_cast %118 : vector<1x1x32xf32> to vector<1x32xf32>
    %c0_47 = arith.constant 0 : index
    %c0_48 = arith.constant 0 : index
    %c0_49 = arith.constant 0 : index
    %120 = vector.load %arg9[%c0_47, %c0_48, %c0_49] : memref<3x1x32xf32, #tpu.memory_space<vmem>>, vector<1x1x32xf32>
    %121 = vector.shape_cast %120 : vector<1x1x32xf32> to vector<1x32xf32>
    %cst_50 = arith.constant dense<0.000000e+00> : vector<8xf32>
    %122 = vector.multi_reduction <add>, %117, %cst_50 [1] : vector<8x32xf32> to vector<8xf32>
    %123 = vector.shape_cast %122 : vector<8xf32> to vector<8x1xf32>
    %cst_51 = arith.constant 3.200000e+01 : f32
    %124 = vector.broadcast %cst_51 : f32 to vector<8x1xf32>
    %125 = arith.divf %123, %124 : vector<8x1xf32>
    %126 = vector.broadcast %125 : vector<8x1xf32> to vector<8x32xf32>
    %127 = arith.subf %117, %126 : vector<8x32xf32>
    %128 = arith.mulf %127, %127 : vector<8x32xf32>
    %cst_52 = arith.constant dense<0.000000e+00> : vector<8xf32>
    %129 = vector.multi_reduction <add>, %128, %cst_52 [1] : vector<8x32xf32> to vector<8xf32>
    %130 = vector.shape_cast %129 : vector<8xf32> to vector<8x1xf32>
    %cst_53 = arith.constant 3.200000e+01 : f32
    %131 = vector.broadcast %cst_53 : f32 to vector<8x1xf32>
    %132 = arith.divf %130, %131 : vector<8x1xf32>
    %133 = vector.broadcast %125 : vector<8x1xf32> to vector<8x32xf32>
    %134 = arith.subf %117, %133 : vector<8x32xf32>
    %cst_54 = arith.constant 9.99999997E-7 : f32
    %135 = vector.broadcast %cst_54 : f32 to vector<8x1xf32>
    %136 = arith.addf %132, %135 : vector<8x1xf32>
    %137 = math.rsqrt %136 : vector<8x1xf32>
    %138 = vector.broadcast %137 : vector<8x1xf32> to vector<8x32xf32>
    %139 = arith.mulf %134, %138 : vector<8x32xf32>
    %140 = vector.broadcast %119 : vector<1x32xf32> to vector<8x32xf32>
    %141 = arith.mulf %139, %140 : vector<8x32xf32>
    %142 = vector.broadcast %121 : vector<1x32xf32> to vector<8x32xf32>
    %143 = arith.addf %141, %142 : vector<8x32xf32>
    %c0_55 = arith.constant 0 : index
    %c0_56 = arith.constant 0 : index
    %c0_57 = arith.constant 0 : index
    %144 = vector.load %arg10[%c0_55, %c0_56, %c0_57] : memref<3x32x64xf32, #tpu.memory_space<vmem>>, vector<1x32x64xf32>
    %145 = vector.shape_cast %144 : vector<1x32x64xf32> to vector<32x64xf32>
    %cst_58 = arith.constant dense<0.000000e+00> : vector<8x64xf32>
    %146 = tpu.matmul %143, %145, %cst_58 {dimension_numbers = #tpu.dot_dimension_numbers<[1], [0], [0], [1], [0, 0, 1, 1], [], []>} : vector<8x32xf32>, vector<32x64xf32>, vector<8x64xf32> -> vector<8x64xf32>
    %c0_59 = arith.constant 0 : index
    %c0_60 = arith.constant 0 : index
    %c0_61 = arith.constant 0 : index
    %147 = vector.load %arg11[%c0_59, %c0_60, %c0_61] : memref<3x1x64xf32, #tpu.memory_space<vmem>>, vector<1x1x64xf32>
    %148 = vector.shape_cast %147 : vector<1x1x64xf32> to vector<1x64xf32>
    %149 = vector.broadcast %148 : vector<1x64xf32> to vector<8x64xf32>
    %150 = arith.addf %146, %149 : vector<8x64xf32>
    %cst_62 = arith.constant 0.707106769 : f32
    %151 = vector.broadcast %cst_62 : f32 to vector<8x64xf32>
    %152 = arith.mulf %150, %151 : vector<8x64xf32>
    %153 = math.absf %152 : vector<8x64xf32>
    %cst_63 = arith.constant 0.327591091 : f32
    %154 = vector.broadcast %cst_63 : f32 to vector<8x64xf32>
    %155 = arith.mulf %154, %153 : vector<8x64xf32>
    %cst_64 = arith.constant 1.000000e+00 : f32
    %156 = vector.broadcast %cst_64 : f32 to vector<8x64xf32>
    %157 = arith.addf %156, %155 : vector<8x64xf32>
    %cst_65 = arith.constant 1.000000e+00 : f32
    %158 = vector.broadcast %cst_65 : f32 to vector<8x64xf32>
    %159 = arith.divf %158, %157 : vector<8x64xf32>
    %cst_66 = arith.constant 1.06140542 : f32
    %160 = vector.broadcast %cst_66 : f32 to vector<8x64xf32>
    %161 = arith.mulf %159, %160 : vector<8x64xf32>
    %cst_67 = arith.constant -1.45315206 : f32
    %162 = vector.broadcast %cst_67 : f32 to vector<8x64xf32>
    %163 = arith.addf %162, %161 : vector<8x64xf32>
    %164 = arith.mulf %159, %163 : vector<8x64xf32>
    %cst_68 = arith.constant 1.42141378 : f32
    %165 = vector.broadcast %cst_68 : f32 to vector<8x64xf32>
    %166 = arith.addf %165, %164 : vector<8x64xf32>
    %167 = arith.mulf %159, %166 : vector<8x64xf32>
    %cst_69 = arith.constant -0.284496725 : f32
    %168 = vector.broadcast %cst_69 : f32 to vector<8x64xf32>
    %169 = arith.addf %168, %167 : vector<8x64xf32>
    %170 = arith.mulf %159, %169 : vector<8x64xf32>
    %cst_70 = arith.constant 0.254829586 : f32
    %171 = vector.broadcast %cst_70 : f32 to vector<8x64xf32>
    %172 = arith.addf %171, %170 : vector<8x64xf32>
    %173 = arith.mulf %159, %172 : vector<8x64xf32>
    %cst_71 = arith.constant 0.000000e+00 : f32
    %174 = vector.broadcast %cst_71 : f32 to vector<8x64xf32>
    %175 = arith.subf %174, %153 : vector<8x64xf32>
    %176 = arith.mulf %175, %153 : vector<8x64xf32>
    %177 = math.exp %176 : vector<8x64xf32>
    %178 = arith.mulf %173, %177 : vector<8x64xf32>
    %cst_72 = arith.constant 1.000000e+00 : f32
    %179 = vector.broadcast %cst_72 : f32 to vector<8x64xf32>
    %180 = arith.subf %179, %178 : vector<8x64xf32>
    %cst_73 = arith.constant 0.000000e+00 : f32
    %181 = vector.broadcast %cst_73 : f32 to vector<8x64xf32>
    %182 = arith.cmpf olt, %152, %181 : vector<8x64xf32>
    %cst_74 = arith.constant 0.000000e+00 : f32
    %183 = vector.broadcast %cst_74 : f32 to vector<8x64xf32>
    %184 = arith.subf %183, %180 : vector<8x64xf32>
    %185 = arith.select %182, %184, %180 : vector<8x64xi1>, vector<8x64xf32>
    %cst_75 = arith.constant 5.000000e-01 : f32
    %186 = vector.broadcast %cst_75 : f32 to vector<8x64xf32>
    %187 = arith.mulf %186, %150 : vector<8x64xf32>
    %cst_76 = arith.constant 1.000000e+00 : f32
    %188 = vector.broadcast %cst_76 : f32 to vector<8x64xf32>
    %189 = arith.addf %188, %185 : vector<8x64xf32>
    %190 = arith.mulf %187, %189 : vector<8x64xf32>
    %c0_77 = arith.constant 0 : index
    %c0_78 = arith.constant 0 : index
    %c0_79 = arith.constant 0 : index
    %191 = vector.load %arg12[%c0_77, %c0_78, %c0_79] : memref<3x64x32xf32, #tpu.memory_space<vmem>>, vector<1x64x32xf32>
    %192 = vector.shape_cast %191 : vector<1x64x32xf32> to vector<64x32xf32>
    %cst_80 = arith.constant dense<0.000000e+00> : vector<8x32xf32>
    %193 = tpu.matmul %190, %192, %cst_80 {dimension_numbers = #tpu.dot_dimension_numbers<[1], [0], [0], [1], [0, 0, 1, 1], [], []>} : vector<8x64xf32>, vector<64x32xf32>, vector<8x32xf32> -> vector<8x32xf32>
    %c0_81 = arith.constant 0 : index
    %c0_82 = arith.constant 0 : index
    %c0_83 = arith.constant 0 : index
    %194 = vector.load %arg13[%c0_81, %c0_82, %c0_83] : memref<3x1x32xf32, #tpu.memory_space<vmem>>, vector<1x1x32xf32>
    %195 = vector.shape_cast %194 : vector<1x1x32xf32> to vector<1x32xf32>
    %196 = vector.broadcast %195 : vector<1x32xf32> to vector<8x32xf32>
    %197 = arith.addf %193, %196 : vector<8x32xf32>
    %198 = arith.addf %117, %197 : vector<8x32xf32>
    %c1 = arith.constant 1 : index
    %c0_84 = arith.constant 0 : index
    %c0_85 = arith.constant 0 : index
    %199 = vector.load %arg2[%c1, %c0_84, %c0_85] : memref<3x1x32xf32, #tpu.memory_space<vmem>>, vector<1x1x32xf32>
    %200 = vector.shape_cast %199 : vector<1x1x32xf32> to vector<1x32xf32>
    %c1_86 = arith.constant 1 : index
    %c0_87 = arith.constant 0 : index
    %c0_88 = arith.constant 0 : index
    %201 = vector.load %arg3[%c1_86, %c0_87, %c0_88] : memref<3x1x32xf32, #tpu.memory_space<vmem>>, vector<1x1x32xf32>
    %202 = vector.shape_cast %201 : vector<1x1x32xf32> to vector<1x32xf32>
    %cst_89 = arith.constant dense<0.000000e+00> : vector<8xf32>
    %203 = vector.multi_reduction <add>, %198, %cst_89 [1] : vector<8x32xf32> to vector<8xf32>
    %204 = vector.shape_cast %203 : vector<8xf32> to vector<8x1xf32>
    %cst_90 = arith.constant 3.200000e+01 : f32
    %205 = vector.broadcast %cst_90 : f32 to vector<8x1xf32>
    %206 = arith.divf %204, %205 : vector<8x1xf32>
    %207 = vector.broadcast %206 : vector<8x1xf32> to vector<8x32xf32>
    %208 = arith.subf %198, %207 : vector<8x32xf32>
    %209 = arith.mulf %208, %208 : vector<8x32xf32>
    %cst_91 = arith.constant dense<0.000000e+00> : vector<8xf32>
    %210 = vector.multi_reduction <add>, %209, %cst_91 [1] : vector<8x32xf32> to vector<8xf32>
    %211 = vector.shape_cast %210 : vector<8xf32> to vector<8x1xf32>
    %cst_92 = arith.constant 3.200000e+01 : f32
    %212 = vector.broadcast %cst_92 : f32 to vector<8x1xf32>
    %213 = arith.divf %211, %212 : vector<8x1xf32>
    %214 = vector.broadcast %206 : vector<8x1xf32> to vector<8x32xf32>
    %215 = arith.subf %198, %214 : vector<8x32xf32>
    %cst_93 = arith.constant 9.99999997E-7 : f32
    %216 = vector.broadcast %cst_93 : f32 to vector<8x1xf32>
    %217 = arith.addf %213, %216 : vector<8x1xf32>
    %218 = math.rsqrt %217 : vector<8x1xf32>
    %219 = vector.broadcast %218 : vector<8x1xf32> to vector<8x32xf32>
    %220 = arith.mulf %215, %219 : vector<8x32xf32>
    %221 = vector.broadcast %200 : vector<1x32xf32> to vector<8x32xf32>
    %222 = arith.mulf %220, %221 : vector<8x32xf32>
    %223 = vector.broadcast %202 : vector<1x32xf32> to vector<8x32xf32>
    %224 = arith.addf %222, %223 : vector<8x32xf32>
    %c1_94 = arith.constant 1 : index
    %c0_95 = arith.constant 0 : index
    %c0_96 = arith.constant 0 : index
    %225 = vector.load %arg4[%c1_94, %c0_95, %c0_96] : memref<3x32x96xf32, #tpu.memory_space<vmem>>, vector<1x32x96xf32>
    %226 = vector.shape_cast %225 : vector<1x32x96xf32> to vector<32x96xf32>
    %cst_97 = arith.constant dense<0.000000e+00> : vector<8x96xf32>
    %227 = tpu.matmul %224, %226, %cst_97 {dimension_numbers = #tpu.dot_dimension_numbers<[1], [0], [0], [1], [0, 0, 1, 1], [], []>} : vector<8x32xf32>, vector<32x96xf32>, vector<8x96xf32> -> vector<8x96xf32>
    %c1_98 = arith.constant 1 : index
    %c0_99 = arith.constant 0 : index
    %c0_100 = arith.constant 0 : index
    %228 = vector.load %arg5[%c1_98, %c0_99, %c0_100] : memref<3x1x96xf32, #tpu.memory_space<vmem>>, vector<1x1x96xf32>
    %229 = vector.shape_cast %228 : vector<1x1x96xf32> to vector<1x96xf32>
    %230 = vector.broadcast %229 : vector<1x96xf32> to vector<8x96xf32>
    %231 = arith.addf %227, %230 : vector<8x96xf32>
    %232 = vector.extract_strided_slice %231 {offsets = [0, 0], sizes = [8, 32], strides = [1, 1]} : vector<8x96xf32> to vector<8x32xf32>
    %cst_101 = arith.constant 0.353553385 : f32
    %233 = vector.broadcast %cst_101 : f32 to vector<8x32xf32>
    %234 = arith.mulf %232, %233 : vector<8x32xf32>
    %235 = vector.extract_strided_slice %231 {offsets = [0, 32], sizes = [8, 32], strides = [1, 1]} : vector<8x96xf32> to vector<8x32xf32>
    %236 = vector.extract_strided_slice %231 {offsets = [0, 64], sizes = [8, 32], strides = [1, 1]} : vector<8x96xf32> to vector<8x32xf32>
    %237 = vector.extract_strided_slice %234 {offsets = [0, 0], sizes = [8, 8], strides = [1, 1]} : vector<8x32xf32> to vector<8x8xf32>
    %238 = vector.extract_strided_slice %235 {offsets = [0, 0], sizes = [8, 8], strides = [1, 1]} : vector<8x32xf32> to vector<8x8xf32>
    %239 = vector.extract_strided_slice %236 {offsets = [0, 0], sizes = [8, 8], strides = [1, 1]} : vector<8x32xf32> to vector<8x8xf32>
    %cst_102 = arith.constant dense<0.000000e+00> : vector<8x8xf32>
    %240 = tpu.matmul %237, %238, %cst_102 {dimension_numbers = #tpu.dot_dimension_numbers<[1], [1], [0], [0], [0, 0, 1, 0], [], []>} : vector<8x8xf32>, vector<8x8xf32>, vector<8x8xf32> -> vector<8x8xf32>
    %cst_103 = arith.constant dense<0xFF800000> : vector<8xf32>
    %241 = vector.multi_reduction <maximumf>, %240, %cst_103 [1] : vector<8x8xf32> to vector<8xf32>
    %242 = vector.shape_cast %241 : vector<8xf32> to vector<8x1xf32>
    %243 = vector.broadcast %242 : vector<8x1xf32> to vector<8x8xf32>
    %244 = arith.subf %240, %243 : vector<8x8xf32>
    %245 = math.exp %244 : vector<8x8xf32>
    %cst_104 = arith.constant dense<0.000000e+00> : vector<8xf32>
    %246 = vector.multi_reduction <add>, %245, %cst_104 [1] : vector<8x8xf32> to vector<8xf32>
    %247 = vector.shape_cast %246 : vector<8xf32> to vector<8x1xf32>
    %248 = tpu.reciprocal %247 {approx = true} : vector<8x1xf32> -> vector<8x1xf32>
    %249 = vector.broadcast %248 : vector<8x1xf32> to vector<8x8xf32>
    %250 = arith.mulf %245, %249 : vector<8x8xf32>
    %251 = vector.extract_strided_slice %250 {offsets = [0, 0], sizes = [1, 8], strides = [1, 1]} : vector<8x8xf32> to vector<1x8xf32>
    %252 = arith.addf %107, %251 : vector<1x8xf32>
    %cst_105 = arith.constant dense<0.000000e+00> : vector<8x8xf32>
    %253 = tpu.matmul %250, %239, %cst_105 {dimension_numbers = #tpu.dot_dimension_numbers<[1], [0], [0], [1], [0, 0, 1, 1], [], []>} : vector<8x8xf32>, vector<8x8xf32>, vector<8x8xf32> -> vector<8x8xf32>
    %254 = vector.extract_strided_slice %234 {offsets = [0, 8], sizes = [8, 8], strides = [1, 1]} : vector<8x32xf32> to vector<8x8xf32>
    %255 = vector.extract_strided_slice %235 {offsets = [0, 8], sizes = [8, 8], strides = [1, 1]} : vector<8x32xf32> to vector<8x8xf32>
    %256 = vector.extract_strided_slice %236 {offsets = [0, 8], sizes = [8, 8], strides = [1, 1]} : vector<8x32xf32> to vector<8x8xf32>
    %cst_106 = arith.constant dense<0.000000e+00> : vector<8x8xf32>
    %257 = tpu.matmul %254, %255, %cst_106 {dimension_numbers = #tpu.dot_dimension_numbers<[1], [1], [0], [0], [0, 0, 1, 0], [], []>} : vector<8x8xf32>, vector<8x8xf32>, vector<8x8xf32> -> vector<8x8xf32>
    %cst_107 = arith.constant dense<0xFF800000> : vector<8xf32>
    %258 = vector.multi_reduction <maximumf>, %257, %cst_107 [1] : vector<8x8xf32> to vector<8xf32>
    %259 = vector.shape_cast %258 : vector<8xf32> to vector<8x1xf32>
    %260 = vector.broadcast %259 : vector<8x1xf32> to vector<8x8xf32>
    %261 = arith.subf %257, %260 : vector<8x8xf32>
    %262 = math.exp %261 : vector<8x8xf32>
    %cst_108 = arith.constant dense<0.000000e+00> : vector<8xf32>
    %263 = vector.multi_reduction <add>, %262, %cst_108 [1] : vector<8x8xf32> to vector<8xf32>
    %264 = vector.shape_cast %263 : vector<8xf32> to vector<8x1xf32>
    %265 = tpu.reciprocal %264 {approx = true} : vector<8x1xf32> -> vector<8x1xf32>
    %266 = vector.broadcast %265 : vector<8x1xf32> to vector<8x8xf32>
    %267 = arith.mulf %262, %266 : vector<8x8xf32>
    %268 = vector.extract_strided_slice %267 {offsets = [0, 0], sizes = [1, 8], strides = [1, 1]} : vector<8x8xf32> to vector<1x8xf32>
    %269 = arith.addf %252, %268 : vector<1x8xf32>
    %cst_109 = arith.constant dense<0.000000e+00> : vector<8x8xf32>
    %270 = tpu.matmul %267, %256, %cst_109 {dimension_numbers = #tpu.dot_dimension_numbers<[1], [0], [0], [1], [0, 0, 1, 1], [], []>} : vector<8x8xf32>, vector<8x8xf32>, vector<8x8xf32> -> vector<8x8xf32>
    %271 = vector.extract_strided_slice %234 {offsets = [0, 16], sizes = [8, 8], strides = [1, 1]} : vector<8x32xf32> to vector<8x8xf32>
    %272 = vector.extract_strided_slice %235 {offsets = [0, 16], sizes = [8, 8], strides = [1, 1]} : vector<8x32xf32> to vector<8x8xf32>
    %273 = vector.extract_strided_slice %236 {offsets = [0, 16], sizes = [8, 8], strides = [1, 1]} : vector<8x32xf32> to vector<8x8xf32>
    %cst_110 = arith.constant dense<0.000000e+00> : vector<8x8xf32>
    %274 = tpu.matmul %271, %272, %cst_110 {dimension_numbers = #tpu.dot_dimension_numbers<[1], [1], [0], [0], [0, 0, 1, 0], [], []>} : vector<8x8xf32>, vector<8x8xf32>, vector<8x8xf32> -> vector<8x8xf32>
    %cst_111 = arith.constant dense<0xFF800000> : vector<8xf32>
    %275 = vector.multi_reduction <maximumf>, %274, %cst_111 [1] : vector<8x8xf32> to vector<8xf32>
    %276 = vector.shape_cast %275 : vector<8xf32> to vector<8x1xf32>
    %277 = vector.broadcast %276 : vector<8x1xf32> to vector<8x8xf32>
    %278 = arith.subf %274, %277 : vector<8x8xf32>
    %279 = math.exp %278 : vector<8x8xf32>
    %cst_112 = arith.constant dense<0.000000e+00> : vector<8xf32>
    %280 = vector.multi_reduction <add>, %279, %cst_112 [1] : vector<8x8xf32> to vector<8xf32>
    %281 = vector.shape_cast %280 : vector<8xf32> to vector<8x1xf32>
    %282 = tpu.reciprocal %281 {approx = true} : vector<8x1xf32> -> vector<8x1xf32>
    %283 = vector.broadcast %282 : vector<8x1xf32> to vector<8x8xf32>
    %284 = arith.mulf %279, %283 : vector<8x8xf32>
    %285 = vector.extract_strided_slice %284 {offsets = [0, 0], sizes = [1, 8], strides = [1, 1]} : vector<8x8xf32> to vector<1x8xf32>
    %286 = arith.addf %269, %285 : vector<1x8xf32>
    %cst_113 = arith.constant dense<0.000000e+00> : vector<8x8xf32>
    %287 = tpu.matmul %284, %273, %cst_113 {dimension_numbers = #tpu.dot_dimension_numbers<[1], [0], [0], [1], [0, 0, 1, 1], [], []>} : vector<8x8xf32>, vector<8x8xf32>, vector<8x8xf32> -> vector<8x8xf32>
    %288 = vector.extract_strided_slice %234 {offsets = [0, 24], sizes = [8, 8], strides = [1, 1]} : vector<8x32xf32> to vector<8x8xf32>
    %289 = vector.extract_strided_slice %235 {offsets = [0, 24], sizes = [8, 8], strides = [1, 1]} : vector<8x32xf32> to vector<8x8xf32>
    %290 = vector.extract_strided_slice %236 {offsets = [0, 24], sizes = [8, 8], strides = [1, 1]} : vector<8x32xf32> to vector<8x8xf32>
    %cst_114 = arith.constant dense<0.000000e+00> : vector<8x8xf32>
    %291 = tpu.matmul %288, %289, %cst_114 {dimension_numbers = #tpu.dot_dimension_numbers<[1], [1], [0], [0], [0, 0, 1, 0], [], []>} : vector<8x8xf32>, vector<8x8xf32>, vector<8x8xf32> -> vector<8x8xf32>
    %cst_115 = arith.constant dense<0xFF800000> : vector<8xf32>
    %292 = vector.multi_reduction <maximumf>, %291, %cst_115 [1] : vector<8x8xf32> to vector<8xf32>
    %293 = vector.shape_cast %292 : vector<8xf32> to vector<8x1xf32>
    %294 = vector.broadcast %293 : vector<8x1xf32> to vector<8x8xf32>
    %295 = arith.subf %291, %294 : vector<8x8xf32>
    %296 = math.exp %295 : vector<8x8xf32>
    %cst_116 = arith.constant dense<0.000000e+00> : vector<8xf32>
    %297 = vector.multi_reduction <add>, %296, %cst_116 [1] : vector<8x8xf32> to vector<8xf32>
    %298 = vector.shape_cast %297 : vector<8xf32> to vector<8x1xf32>
    %299 = tpu.reciprocal %298 {approx = true} : vector<8x1xf32> -> vector<8x1xf32>
    %300 = vector.broadcast %299 : vector<8x1xf32> to vector<8x8xf32>
    %301 = arith.mulf %296, %300 : vector<8x8xf32>
    %302 = vector.extract_strided_slice %301 {offsets = [0, 0], sizes = [1, 8], strides = [1, 1]} : vector<8x8xf32> to vector<1x8xf32>
    %303 = arith.addf %286, %302 : vector<1x8xf32>
    %cst_117 = arith.constant dense<0.000000e+00> : vector<8x8xf32>
    %304 = tpu.matmul %301, %290, %cst_117 {dimension_numbers = #tpu.dot_dimension_numbers<[1], [0], [0], [1], [0, 0, 1, 1], [], []>} : vector<8x8xf32>, vector<8x8xf32>, vector<8x8xf32> -> vector<8x8xf32>
    %305 = tpu.concatenate %253, %270, %287, %304 in 1 : vector<8x8xf32>, vector<8x8xf32>, vector<8x8xf32>, vector<8x8xf32> -> vector<8x32xf32>
    %c1_118 = arith.constant 1 : index
    %c0_119 = arith.constant 0 : index
    %c0_120 = arith.constant 0 : index
    %306 = vector.load %arg6[%c1_118, %c0_119, %c0_120] : memref<3x32x32xf32, #tpu.memory_space<vmem>>, vector<1x32x32xf32>
    %307 = vector.shape_cast %306 : vector<1x32x32xf32> to vector<32x32xf32>
    %cst_121 = arith.constant dense<0.000000e+00> : vector<8x32xf32>
    %308 = tpu.matmul %305, %307, %cst_121 {dimension_numbers = #tpu.dot_dimension_numbers<[1], [0], [0], [1], [0, 0, 1, 1], [], []>} : vector<8x32xf32>, vector<32x32xf32>, vector<8x32xf32> -> vector<8x32xf32>
    %c1_122 = arith.constant 1 : index
    %c0_123 = arith.constant 0 : index
    %c0_124 = arith.constant 0 : index
    %309 = vector.load %arg7[%c1_122, %c0_123, %c0_124] : memref<3x1x32xf32, #tpu.memory_space<vmem>>, vector<1x1x32xf32>
    %310 = vector.shape_cast %309 : vector<1x1x32xf32> to vector<1x32xf32>
    %311 = vector.broadcast %310 : vector<1x32xf32> to vector<8x32xf32>
    %312 = arith.addf %308, %311 : vector<8x32xf32>
    %313 = arith.addf %198, %312 : vector<8x32xf32>
    %c1_125 = arith.constant 1 : index
    %c0_126 = arith.constant 0 : index
    %c0_127 = arith.constant 0 : index
    %314 = vector.load %arg8[%c1_125, %c0_126, %c0_127] : memref<3x1x32xf32, #tpu.memory_space<vmem>>, vector<1x1x32xf32>
    %315 = vector.shape_cast %314 : vector<1x1x32xf32> to vector<1x32xf32>
    %c1_128 = arith.constant 1 : index
    %c0_129 = arith.constant 0 : index
    %c0_130 = arith.constant 0 : index
    %316 = vector.load %arg9[%c1_128, %c0_129, %c0_130] : memref<3x1x32xf32, #tpu.memory_space<vmem>>, vector<1x1x32xf32>
    %317 = vector.shape_cast %316 : vector<1x1x32xf32> to vector<1x32xf32>
    %cst_131 = arith.constant dense<0.000000e+00> : vector<8xf32>
    %318 = vector.multi_reduction <add>, %313, %cst_131 [1] : vector<8x32xf32> to vector<8xf32>
    %319 = vector.shape_cast %318 : vector<8xf32> to vector<8x1xf32>
    %cst_132 = arith.constant 3.200000e+01 : f32
    %320 = vector.broadcast %cst_132 : f32 to vector<8x1xf32>
    %321 = arith.divf %319, %320 : vector<8x1xf32>
    %322 = vector.broadcast %321 : vector<8x1xf32> to vector<8x32xf32>
    %323 = arith.subf %313, %322 : vector<8x32xf32>
    %324 = arith.mulf %323, %323 : vector<8x32xf32>
    %cst_133 = arith.constant dense<0.000000e+00> : vector<8xf32>
    %325 = vector.multi_reduction <add>, %324, %cst_133 [1] : vector<8x32xf32> to vector<8xf32>
    %326 = vector.shape_cast %325 : vector<8xf32> to vector<8x1xf32>
    %cst_134 = arith.constant 3.200000e+01 : f32
    %327 = vector.broadcast %cst_134 : f32 to vector<8x1xf32>
    %328 = arith.divf %326, %327 : vector<8x1xf32>
    %329 = vector.broadcast %321 : vector<8x1xf32> to vector<8x32xf32>
    %330 = arith.subf %313, %329 : vector<8x32xf32>
    %cst_135 = arith.constant 9.99999997E-7 : f32
    %331 = vector.broadcast %cst_135 : f32 to vector<8x1xf32>
    %332 = arith.addf %328, %331 : vector<8x1xf32>
    %333 = math.rsqrt %332 : vector<8x1xf32>
    %334 = vector.broadcast %333 : vector<8x1xf32> to vector<8x32xf32>
    %335 = arith.mulf %330, %334 : vector<8x32xf32>
    %336 = vector.broadcast %315 : vector<1x32xf32> to vector<8x32xf32>
    %337 = arith.mulf %335, %336 : vector<8x32xf32>
    %338 = vector.broadcast %317 : vector<1x32xf32> to vector<8x32xf32>
    %339 = arith.addf %337, %338 : vector<8x32xf32>
    %c1_136 = arith.constant 1 : index
    %c0_137 = arith.constant 0 : index
    %c0_138 = arith.constant 0 : index
    %340 = vector.load %arg10[%c1_136, %c0_137, %c0_138] : memref<3x32x64xf32, #tpu.memory_space<vmem>>, vector<1x32x64xf32>
    %341 = vector.shape_cast %340 : vector<1x32x64xf32> to vector<32x64xf32>
    %cst_139 = arith.constant dense<0.000000e+00> : vector<8x64xf32>
    %342 = tpu.matmul %339, %341, %cst_139 {dimension_numbers = #tpu.dot_dimension_numbers<[1], [0], [0], [1], [0, 0, 1, 1], [], []>} : vector<8x32xf32>, vector<32x64xf32>, vector<8x64xf32> -> vector<8x64xf32>
    %c1_140 = arith.constant 1 : index
    %c0_141 = arith.constant 0 : index
    %c0_142 = arith.constant 0 : index
    %343 = vector.load %arg11[%c1_140, %c0_141, %c0_142] : memref<3x1x64xf32, #tpu.memory_space<vmem>>, vector<1x1x64xf32>
    %344 = vector.shape_cast %343 : vector<1x1x64xf32> to vector<1x64xf32>
    %345 = vector.broadcast %344 : vector<1x64xf32> to vector<8x64xf32>
    %346 = arith.addf %342, %345 : vector<8x64xf32>
    %cst_143 = arith.constant 0.707106769 : f32
    %347 = vector.broadcast %cst_143 : f32 to vector<8x64xf32>
    %348 = arith.mulf %346, %347 : vector<8x64xf32>
    %349 = math.absf %348 : vector<8x64xf32>
    %cst_144 = arith.constant 0.327591091 : f32
    %350 = vector.broadcast %cst_144 : f32 to vector<8x64xf32>
    %351 = arith.mulf %350, %349 : vector<8x64xf32>
    %cst_145 = arith.constant 1.000000e+00 : f32
    %352 = vector.broadcast %cst_145 : f32 to vector<8x64xf32>
    %353 = arith.addf %352, %351 : vector<8x64xf32>
    %cst_146 = arith.constant 1.000000e+00 : f32
    %354 = vector.broadcast %cst_146 : f32 to vector<8x64xf32>
    %355 = arith.divf %354, %353 : vector<8x64xf32>
    %cst_147 = arith.constant 1.06140542 : f32
    %356 = vector.broadcast %cst_147 : f32 to vector<8x64xf32>
    %357 = arith.mulf %355, %356 : vector<8x64xf32>
    %cst_148 = arith.constant -1.45315206 : f32
    %358 = vector.broadcast %cst_148 : f32 to vector<8x64xf32>
    %359 = arith.addf %358, %357 : vector<8x64xf32>
    %360 = arith.mulf %355, %359 : vector<8x64xf32>
    %cst_149 = arith.constant 1.42141378 : f32
    %361 = vector.broadcast %cst_149 : f32 to vector<8x64xf32>
    %362 = arith.addf %361, %360 : vector<8x64xf32>
    %363 = arith.mulf %355, %362 : vector<8x64xf32>
    %cst_150 = arith.constant -0.284496725 : f32
    %364 = vector.broadcast %cst_150 : f32 to vector<8x64xf32>
    %365 = arith.addf %364, %363 : vector<8x64xf32>
    %366 = arith.mulf %355, %365 : vector<8x64xf32>
    %cst_151 = arith.constant 0.254829586 : f32
    %367 = vector.broadcast %cst_151 : f32 to vector<8x64xf32>
    %368 = arith.addf %367, %366 : vector<8x64xf32>
    %369 = arith.mulf %355, %368 : vector<8x64xf32>
    %cst_152 = arith.constant 0.000000e+00 : f32
    %370 = vector.broadcast %cst_152 : f32 to vector<8x64xf32>
    %371 = arith.subf %370, %349 : vector<8x64xf32>
    %372 = arith.mulf %371, %349 : vector<8x64xf32>
    %373 = math.exp %372 : vector<8x64xf32>
    %374 = arith.mulf %369, %373 : vector<8x64xf32>
    %cst_153 = arith.constant 1.000000e+00 : f32
    %375 = vector.broadcast %cst_153 : f32 to vector<8x64xf32>
    %376 = arith.subf %375, %374 : vector<8x64xf32>
    %cst_154 = arith.constant 0.000000e+00 : f32
    %377 = vector.broadcast %cst_154 : f32 to vector<8x64xf32>
    %378 = arith.cmpf olt, %348, %377 : vector<8x64xf32>
    %cst_155 = arith.constant 0.000000e+00 : f32
    %379 = vector.broadcast %cst_155 : f32 to vector<8x64xf32>
    %380 = arith.subf %379, %376 : vector<8x64xf32>
    %381 = arith.select %378, %380, %376 : vector<8x64xi1>, vector<8x64xf32>
    %cst_156 = arith.constant 5.000000e-01 : f32
    %382 = vector.broadcast %cst_156 : f32 to vector<8x64xf32>
    %383 = arith.mulf %382, %346 : vector<8x64xf32>
    %cst_157 = arith.constant 1.000000e+00 : f32
    %384 = vector.broadcast %cst_157 : f32 to vector<8x64xf32>
    %385 = arith.addf %384, %381 : vector<8x64xf32>
    %386 = arith.mulf %383, %385 : vector<8x64xf32>
    %c1_158 = arith.constant 1 : index
    %c0_159 = arith.constant 0 : index
    %c0_160 = arith.constant 0 : index
    %387 = vector.load %arg12[%c1_158, %c0_159, %c0_160] : memref<3x64x32xf32, #tpu.memory_space<vmem>>, vector<1x64x32xf32>
    %388 = vector.shape_cast %387 : vector<1x64x32xf32> to vector<64x32xf32>
    %cst_161 = arith.constant dense<0.000000e+00> : vector<8x32xf32>
    %389 = tpu.matmul %386, %388, %cst_161 {dimension_numbers = #tpu.dot_dimension_numbers<[1], [0], [0], [1], [0, 0, 1, 1], [], []>} : vector<8x64xf32>, vector<64x32xf32>, vector<8x32xf32> -> vector<8x32xf32>
    %c1_162 = arith.constant 1 : index
    %c0_163 = arith.constant 0 : index
    %c0_164 = arith.constant 0 : index
    %390 = vector.load %arg13[%c1_162, %c0_163, %c0_164] : memref<3x1x32xf32, #tpu.memory_space<vmem>>, vector<1x1x32xf32>
    %391 = vector.shape_cast %390 : vector<1x1x32xf32> to vector<1x32xf32>
    %392 = vector.broadcast %391 : vector<1x32xf32> to vector<8x32xf32>
    %393 = arith.addf %389, %392 : vector<8x32xf32>
    %394 = arith.addf %313, %393 : vector<8x32xf32>
    %c2 = arith.constant 2 : index
    %c0_165 = arith.constant 0 : index
    %c0_166 = arith.constant 0 : index
    %395 = vector.load %arg2[%c2, %c0_165, %c0_166] : memref<3x1x32xf32, #tpu.memory_space<vmem>>, vector<1x1x32xf32>
    %396 = vector.shape_cast %395 : vector<1x1x32xf32> to vector<1x32xf32>
    %c2_167 = arith.constant 2 : index
    %c0_168 = arith.constant 0 : index
    %c0_169 = arith.constant 0 : index
    %397 = vector.load %arg3[%c2_167, %c0_168, %c0_169] : memref<3x1x32xf32, #tpu.memory_space<vmem>>, vector<1x1x32xf32>
    %398 = vector.shape_cast %397 : vector<1x1x32xf32> to vector<1x32xf32>
    %cst_170 = arith.constant dense<0.000000e+00> : vector<8xf32>
    %399 = vector.multi_reduction <add>, %394, %cst_170 [1] : vector<8x32xf32> to vector<8xf32>
    %400 = vector.shape_cast %399 : vector<8xf32> to vector<8x1xf32>
    %cst_171 = arith.constant 3.200000e+01 : f32
    %401 = vector.broadcast %cst_171 : f32 to vector<8x1xf32>
    %402 = arith.divf %400, %401 : vector<8x1xf32>
    %403 = vector.broadcast %402 : vector<8x1xf32> to vector<8x32xf32>
    %404 = arith.subf %394, %403 : vector<8x32xf32>
    %405 = arith.mulf %404, %404 : vector<8x32xf32>
    %cst_172 = arith.constant dense<0.000000e+00> : vector<8xf32>
    %406 = vector.multi_reduction <add>, %405, %cst_172 [1] : vector<8x32xf32> to vector<8xf32>
    %407 = vector.shape_cast %406 : vector<8xf32> to vector<8x1xf32>
    %cst_173 = arith.constant 3.200000e+01 : f32
    %408 = vector.broadcast %cst_173 : f32 to vector<8x1xf32>
    %409 = arith.divf %407, %408 : vector<8x1xf32>
    %410 = vector.broadcast %402 : vector<8x1xf32> to vector<8x32xf32>
    %411 = arith.subf %394, %410 : vector<8x32xf32>
    %cst_174 = arith.constant 9.99999997E-7 : f32
    %412 = vector.broadcast %cst_174 : f32 to vector<8x1xf32>
    %413 = arith.addf %409, %412 : vector<8x1xf32>
    %414 = math.rsqrt %413 : vector<8x1xf32>
    %415 = vector.broadcast %414 : vector<8x1xf32> to vector<8x32xf32>
    %416 = arith.mulf %411, %415 : vector<8x32xf32>
    %417 = vector.broadcast %396 : vector<1x32xf32> to vector<8x32xf32>
    %418 = arith.mulf %416, %417 : vector<8x32xf32>
    %419 = vector.broadcast %398 : vector<1x32xf32> to vector<8x32xf32>
    %420 = arith.addf %418, %419 : vector<8x32xf32>
    %c2_175 = arith.constant 2 : index
    %c0_176 = arith.constant 0 : index
    %c0_177 = arith.constant 0 : index
    %421 = vector.load %arg4[%c2_175, %c0_176, %c0_177] : memref<3x32x96xf32, #tpu.memory_space<vmem>>, vector<1x32x96xf32>
    %422 = vector.shape_cast %421 : vector<1x32x96xf32> to vector<32x96xf32>
    %cst_178 = arith.constant dense<0.000000e+00> : vector<8x96xf32>
    %423 = tpu.matmul %420, %422, %cst_178 {dimension_numbers = #tpu.dot_dimension_numbers<[1], [0], [0], [1], [0, 0, 1, 1], [], []>} : vector<8x32xf32>, vector<32x96xf32>, vector<8x96xf32> -> vector<8x96xf32>
    %c2_179 = arith.constant 2 : index
    %c0_180 = arith.constant 0 : index
    %c0_181 = arith.constant 0 : index
    %424 = vector.load %arg5[%c2_179, %c0_180, %c0_181] : memref<3x1x96xf32, #tpu.memory_space<vmem>>, vector<1x1x96xf32>
    %425 = vector.shape_cast %424 : vector<1x1x96xf32> to vector<1x96xf32>
    %426 = vector.broadcast %425 : vector<1x96xf32> to vector<8x96xf32>
    %427 = arith.addf %423, %426 : vector<8x96xf32>
    %428 = vector.extract_strided_slice %427 {offsets = [0, 0], sizes = [8, 32], strides = [1, 1]} : vector<8x96xf32> to vector<8x32xf32>
    %cst_182 = arith.constant 0.353553385 : f32
    %429 = vector.broadcast %cst_182 : f32 to vector<8x32xf32>
    %430 = arith.mulf %428, %429 : vector<8x32xf32>
    %431 = vector.extract_strided_slice %427 {offsets = [0, 32], sizes = [8, 32], strides = [1, 1]} : vector<8x96xf32> to vector<8x32xf32>
    %432 = vector.extract_strided_slice %427 {offsets = [0, 64], sizes = [8, 32], strides = [1, 1]} : vector<8x96xf32> to vector<8x32xf32>
    %433 = vector.extract_strided_slice %430 {offsets = [0, 0], sizes = [8, 8], strides = [1, 1]} : vector<8x32xf32> to vector<8x8xf32>
    %434 = vector.extract_strided_slice %431 {offsets = [0, 0], sizes = [8, 8], strides = [1, 1]} : vector<8x32xf32> to vector<8x8xf32>
    %435 = vector.extract_strided_slice %432 {offsets = [0, 0], sizes = [8, 8], strides = [1, 1]} : vector<8x32xf32> to vector<8x8xf32>
    %cst_183 = arith.constant dense<0.000000e+00> : vector<8x8xf32>
    %436 = tpu.matmul %433, %434, %cst_183 {dimension_numbers = #tpu.dot_dimension_numbers<[1], [1], [0], [0], [0, 0, 1, 0], [], []>} : vector<8x8xf32>, vector<8x8xf32>, vector<8x8xf32> -> vector<8x8xf32>
    %cst_184 = arith.constant dense<0xFF800000> : vector<8xf32>
    %437 = vector.multi_reduction <maximumf>, %436, %cst_184 [1] : vector<8x8xf32> to vector<8xf32>
    %438 = vector.shape_cast %437 : vector<8xf32> to vector<8x1xf32>
    %439 = vector.broadcast %438 : vector<8x1xf32> to vector<8x8xf32>
    %440 = arith.subf %436, %439 : vector<8x8xf32>
    %441 = math.exp %440 : vector<8x8xf32>
    %cst_185 = arith.constant dense<0.000000e+00> : vector<8xf32>
    %442 = vector.multi_reduction <add>, %441, %cst_185 [1] : vector<8x8xf32> to vector<8xf32>
    %443 = vector.shape_cast %442 : vector<8xf32> to vector<8x1xf32>
    %444 = tpu.reciprocal %443 {approx = true} : vector<8x1xf32> -> vector<8x1xf32>
    %445 = vector.broadcast %444 : vector<8x1xf32> to vector<8x8xf32>
    %446 = arith.mulf %441, %445 : vector<8x8xf32>
    %447 = vector.extract_strided_slice %446 {offsets = [0, 0], sizes = [1, 8], strides = [1, 1]} : vector<8x8xf32> to vector<1x8xf32>
    %448 = arith.addf %303, %447 : vector<1x8xf32>
    %cst_186 = arith.constant dense<0.000000e+00> : vector<8x8xf32>
    %449 = tpu.matmul %446, %435, %cst_186 {dimension_numbers = #tpu.dot_dimension_numbers<[1], [0], [0], [1], [0, 0, 1, 1], [], []>} : vector<8x8xf32>, vector<8x8xf32>, vector<8x8xf32> -> vector<8x8xf32>
    %450 = vector.extract_strided_slice %430 {offsets = [0, 8], sizes = [8, 8], strides = [1, 1]} : vector<8x32xf32> to vector<8x8xf32>
    %451 = vector.extract_strided_slice %431 {offsets = [0, 8], sizes = [8, 8], strides = [1, 1]} : vector<8x32xf32> to vector<8x8xf32>
    %452 = vector.extract_strided_slice %432 {offsets = [0, 8], sizes = [8, 8], strides = [1, 1]} : vector<8x32xf32> to vector<8x8xf32>
    %cst_187 = arith.constant dense<0.000000e+00> : vector<8x8xf32>
    %453 = tpu.matmul %450, %451, %cst_187 {dimension_numbers = #tpu.dot_dimension_numbers<[1], [1], [0], [0], [0, 0, 1, 0], [], []>} : vector<8x8xf32>, vector<8x8xf32>, vector<8x8xf32> -> vector<8x8xf32>
    %cst_188 = arith.constant dense<0xFF800000> : vector<8xf32>
    %454 = vector.multi_reduction <maximumf>, %453, %cst_188 [1] : vector<8x8xf32> to vector<8xf32>
    %455 = vector.shape_cast %454 : vector<8xf32> to vector<8x1xf32>
    %456 = vector.broadcast %455 : vector<8x1xf32> to vector<8x8xf32>
    %457 = arith.subf %453, %456 : vector<8x8xf32>
    %458 = math.exp %457 : vector<8x8xf32>
    %cst_189 = arith.constant dense<0.000000e+00> : vector<8xf32>
    %459 = vector.multi_reduction <add>, %458, %cst_189 [1] : vector<8x8xf32> to vector<8xf32>
    %460 = vector.shape_cast %459 : vector<8xf32> to vector<8x1xf32>
    %461 = tpu.reciprocal %460 {approx = true} : vector<8x1xf32> -> vector<8x1xf32>
    %462 = vector.broadcast %461 : vector<8x1xf32> to vector<8x8xf32>
    %463 = arith.mulf %458, %462 : vector<8x8xf32>
    %464 = vector.extract_strided_slice %463 {offsets = [0, 0], sizes = [1, 8], strides = [1, 1]} : vector<8x8xf32> to vector<1x8xf32>
    %465 = arith.addf %448, %464 : vector<1x8xf32>
    %cst_190 = arith.constant dense<0.000000e+00> : vector<8x8xf32>
    %466 = tpu.matmul %463, %452, %cst_190 {dimension_numbers = #tpu.dot_dimension_numbers<[1], [0], [0], [1], [0, 0, 1, 1], [], []>} : vector<8x8xf32>, vector<8x8xf32>, vector<8x8xf32> -> vector<8x8xf32>
    %467 = vector.extract_strided_slice %430 {offsets = [0, 16], sizes = [8, 8], strides = [1, 1]} : vector<8x32xf32> to vector<8x8xf32>
    %468 = vector.extract_strided_slice %431 {offsets = [0, 16], sizes = [8, 8], strides = [1, 1]} : vector<8x32xf32> to vector<8x8xf32>
    %469 = vector.extract_strided_slice %432 {offsets = [0, 16], sizes = [8, 8], strides = [1, 1]} : vector<8x32xf32> to vector<8x8xf32>
    %cst_191 = arith.constant dense<0.000000e+00> : vector<8x8xf32>
    %470 = tpu.matmul %467, %468, %cst_191 {dimension_numbers = #tpu.dot_dimension_numbers<[1], [1], [0], [0], [0, 0, 1, 0], [], []>} : vector<8x8xf32>, vector<8x8xf32>, vector<8x8xf32> -> vector<8x8xf32>
    %cst_192 = arith.constant dense<0xFF800000> : vector<8xf32>
    %471 = vector.multi_reduction <maximumf>, %470, %cst_192 [1] : vector<8x8xf32> to vector<8xf32>
    %472 = vector.shape_cast %471 : vector<8xf32> to vector<8x1xf32>
    %473 = vector.broadcast %472 : vector<8x1xf32> to vector<8x8xf32>
    %474 = arith.subf %470, %473 : vector<8x8xf32>
    %475 = math.exp %474 : vector<8x8xf32>
    %cst_193 = arith.constant dense<0.000000e+00> : vector<8xf32>
    %476 = vector.multi_reduction <add>, %475, %cst_193 [1] : vector<8x8xf32> to vector<8xf32>
    %477 = vector.shape_cast %476 : vector<8xf32> to vector<8x1xf32>
    %478 = tpu.reciprocal %477 {approx = true} : vector<8x1xf32> -> vector<8x1xf32>
    %479 = vector.broadcast %478 : vector<8x1xf32> to vector<8x8xf32>
    %480 = arith.mulf %475, %479 : vector<8x8xf32>
    %481 = vector.extract_strided_slice %480 {offsets = [0, 0], sizes = [1, 8], strides = [1, 1]} : vector<8x8xf32> to vector<1x8xf32>
    %482 = arith.addf %465, %481 : vector<1x8xf32>
    %cst_194 = arith.constant dense<0.000000e+00> : vector<8x8xf32>
    %483 = tpu.matmul %480, %469, %cst_194 {dimension_numbers = #tpu.dot_dimension_numbers<[1], [0], [0], [1], [0, 0, 1, 1], [], []>} : vector<8x8xf32>, vector<8x8xf32>, vector<8x8xf32> -> vector<8x8xf32>
    %484 = vector.extract_strided_slice %430 {offsets = [0, 24], sizes = [8, 8], strides = [1, 1]} : vector<8x32xf32> to vector<8x8xf32>
    %485 = vector.extract_strided_slice %431 {offsets = [0, 24], sizes = [8, 8], strides = [1, 1]} : vector<8x32xf32> to vector<8x8xf32>
    %486 = vector.extract_strided_slice %432 {offsets = [0, 24], sizes = [8, 8], strides = [1, 1]} : vector<8x32xf32> to vector<8x8xf32>
    %cst_195 = arith.constant dense<0.000000e+00> : vector<8x8xf32>
    %487 = tpu.matmul %484, %485, %cst_195 {dimension_numbers = #tpu.dot_dimension_numbers<[1], [1], [0], [0], [0, 0, 1, 0], [], []>} : vector<8x8xf32>, vector<8x8xf32>, vector<8x8xf32> -> vector<8x8xf32>
    %cst_196 = arith.constant dense<0xFF800000> : vector<8xf32>
    %488 = vector.multi_reduction <maximumf>, %487, %cst_196 [1] : vector<8x8xf32> to vector<8xf32>
    %489 = vector.shape_cast %488 : vector<8xf32> to vector<8x1xf32>
    %490 = vector.broadcast %489 : vector<8x1xf32> to vector<8x8xf32>
    %491 = arith.subf %487, %490 : vector<8x8xf32>
    %492 = math.exp %491 : vector<8x8xf32>
    %cst_197 = arith.constant dense<0.000000e+00> : vector<8xf32>
    %493 = vector.multi_reduction <add>, %492, %cst_197 [1] : vector<8x8xf32> to vector<8xf32>
    %494 = vector.shape_cast %493 : vector<8xf32> to vector<8x1xf32>
    %495 = tpu.reciprocal %494 {approx = true} : vector<8x1xf32> -> vector<8x1xf32>
    %496 = vector.broadcast %495 : vector<8x1xf32> to vector<8x8xf32>
    %497 = arith.mulf %492, %496 : vector<8x8xf32>
    %498 = vector.extract_strided_slice %497 {offsets = [0, 0], sizes = [1, 8], strides = [1, 1]} : vector<8x8xf32> to vector<1x8xf32>
    %499 = arith.addf %482, %498 : vector<1x8xf32>
    %cst_198 = arith.constant dense<0.000000e+00> : vector<8x8xf32>
    %500 = tpu.matmul %497, %486, %cst_198 {dimension_numbers = #tpu.dot_dimension_numbers<[1], [0], [0], [1], [0, 0, 1, 1], [], []>} : vector<8x8xf32>, vector<8x8xf32>, vector<8x8xf32> -> vector<8x8xf32>
    %501 = tpu.concatenate %449, %466, %483, %500 in 1 : vector<8x8xf32>, vector<8x8xf32>, vector<8x8xf32>, vector<8x8xf32> -> vector<8x32xf32>
    %c2_199 = arith.constant 2 : index
    %c0_200 = arith.constant 0 : index
    %c0_201 = arith.constant 0 : index
    %502 = vector.load %arg6[%c2_199, %c0_200, %c0_201] : memref<3x32x32xf32, #tpu.memory_space<vmem>>, vector<1x32x32xf32>
    %503 = vector.shape_cast %502 : vector<1x32x32xf32> to vector<32x32xf32>
    %cst_202 = arith.constant dense<0.000000e+00> : vector<8x32xf32>
    %504 = tpu.matmul %501, %503, %cst_202 {dimension_numbers = #tpu.dot_dimension_numbers<[1], [0], [0], [1], [0, 0, 1, 1], [], []>} : vector<8x32xf32>, vector<32x32xf32>, vector<8x32xf32> -> vector<8x32xf32>
    %c2_203 = arith.constant 2 : index
    %c0_204 = arith.constant 0 : index
    %c0_205 = arith.constant 0 : index
    %505 = vector.load %arg7[%c2_203, %c0_204, %c0_205] : memref<3x1x32xf32, #tpu.memory_space<vmem>>, vector<1x1x32xf32>
    %506 = vector.shape_cast %505 : vector<1x1x32xf32> to vector<1x32xf32>
    %507 = vector.broadcast %506 : vector<1x32xf32> to vector<8x32xf32>
    %508 = arith.addf %504, %507 : vector<8x32xf32>
    %509 = arith.addf %394, %508 : vector<8x32xf32>
    %c2_206 = arith.constant 2 : index
    %c0_207 = arith.constant 0 : index
    %c0_208 = arith.constant 0 : index
    %510 = vector.load %arg8[%c2_206, %c0_207, %c0_208] : memref<3x1x32xf32, #tpu.memory_space<vmem>>, vector<1x1x32xf32>
    %511 = vector.shape_cast %510 : vector<1x1x32xf32> to vector<1x32xf32>
    %c2_209 = arith.constant 2 : index
    %c0_210 = arith.constant 0 : index
    %c0_211 = arith.constant 0 : index
    %512 = vector.load %arg9[%c2_209, %c0_210, %c0_211] : memref<3x1x32xf32, #tpu.memory_space<vmem>>, vector<1x1x32xf32>
    %513 = vector.shape_cast %512 : vector<1x1x32xf32> to vector<1x32xf32>
    %cst_212 = arith.constant dense<0.000000e+00> : vector<8xf32>
    %514 = vector.multi_reduction <add>, %509, %cst_212 [1] : vector<8x32xf32> to vector<8xf32>
    %515 = vector.shape_cast %514 : vector<8xf32> to vector<8x1xf32>
    %cst_213 = arith.constant 3.200000e+01 : f32
    %516 = vector.broadcast %cst_213 : f32 to vector<8x1xf32>
    %517 = arith.divf %515, %516 : vector<8x1xf32>
    %518 = vector.broadcast %517 : vector<8x1xf32> to vector<8x32xf32>
    %519 = arith.subf %509, %518 : vector<8x32xf32>
    %520 = arith.mulf %519, %519 : vector<8x32xf32>
    %cst_214 = arith.constant dense<0.000000e+00> : vector<8xf32>
    %521 = vector.multi_reduction <add>, %520, %cst_214 [1] : vector<8x32xf32> to vector<8xf32>
    %522 = vector.shape_cast %521 : vector<8xf32> to vector<8x1xf32>
    %cst_215 = arith.constant 3.200000e+01 : f32
    %523 = vector.broadcast %cst_215 : f32 to vector<8x1xf32>
    %524 = arith.divf %522, %523 : vector<8x1xf32>
    %525 = vector.broadcast %517 : vector<8x1xf32> to vector<8x32xf32>
    %526 = arith.subf %509, %525 : vector<8x32xf32>
    %cst_216 = arith.constant 9.99999997E-7 : f32
    %527 = vector.broadcast %cst_216 : f32 to vector<8x1xf32>
    %528 = arith.addf %524, %527 : vector<8x1xf32>
    %529 = math.rsqrt %528 : vector<8x1xf32>
    %530 = vector.broadcast %529 : vector<8x1xf32> to vector<8x32xf32>
    %531 = arith.mulf %526, %530 : vector<8x32xf32>
    %532 = vector.broadcast %511 : vector<1x32xf32> to vector<8x32xf32>
    %533 = arith.mulf %531, %532 : vector<8x32xf32>
    %534 = vector.broadcast %513 : vector<1x32xf32> to vector<8x32xf32>
    %535 = arith.addf %533, %534 : vector<8x32xf32>
    %c2_217 = arith.constant 2 : index
    %c0_218 = arith.constant 0 : index
    %c0_219 = arith.constant 0 : index
    %536 = vector.load %arg10[%c2_217, %c0_218, %c0_219] : memref<3x32x64xf32, #tpu.memory_space<vmem>>, vector<1x32x64xf32>
    %537 = vector.shape_cast %536 : vector<1x32x64xf32> to vector<32x64xf32>
    %cst_220 = arith.constant dense<0.000000e+00> : vector<8x64xf32>
    %538 = tpu.matmul %535, %537, %cst_220 {dimension_numbers = #tpu.dot_dimension_numbers<[1], [0], [0], [1], [0, 0, 1, 1], [], []>} : vector<8x32xf32>, vector<32x64xf32>, vector<8x64xf32> -> vector<8x64xf32>
    %c2_221 = arith.constant 2 : index
    %c0_222 = arith.constant 0 : index
    %c0_223 = arith.constant 0 : index
    %539 = vector.load %arg11[%c2_221, %c0_222, %c0_223] : memref<3x1x64xf32, #tpu.memory_space<vmem>>, vector<1x1x64xf32>
    %540 = vector.shape_cast %539 : vector<1x1x64xf32> to vector<1x64xf32>
    %541 = vector.broadcast %540 : vector<1x64xf32> to vector<8x64xf32>
    %542 = arith.addf %538, %541 : vector<8x64xf32>
    %cst_224 = arith.constant 0.707106769 : f32
    %543 = vector.broadcast %cst_224 : f32 to vector<8x64xf32>
    %544 = arith.mulf %542, %543 : vector<8x64xf32>
    %545 = math.absf %544 : vector<8x64xf32>
    %cst_225 = arith.constant 0.327591091 : f32
    %546 = vector.broadcast %cst_225 : f32 to vector<8x64xf32>
    %547 = arith.mulf %546, %545 : vector<8x64xf32>
    %cst_226 = arith.constant 1.000000e+00 : f32
    %548 = vector.broadcast %cst_226 : f32 to vector<8x64xf32>
    %549 = arith.addf %548, %547 : vector<8x64xf32>
    %cst_227 = arith.constant 1.000000e+00 : f32
    %550 = vector.broadcast %cst_227 : f32 to vector<8x64xf32>
    %551 = arith.divf %550, %549 : vector<8x64xf32>
    %cst_228 = arith.constant 1.06140542 : f32
    %552 = vector.broadcast %cst_228 : f32 to vector<8x64xf32>
    %553 = arith.mulf %551, %552 : vector<8x64xf32>
    %cst_229 = arith.constant -1.45315206 : f32
    %554 = vector.broadcast %cst_229 : f32 to vector<8x64xf32>
    %555 = arith.addf %554, %553 : vector<8x64xf32>
    %556 = arith.mulf %551, %555 : vector<8x64xf32>
    %cst_230 = arith.constant 1.42141378 : f32
    %557 = vector.broadcast %cst_230 : f32 to vector<8x64xf32>
    %558 = arith.addf %557, %556 : vector<8x64xf32>
    %559 = arith.mulf %551, %558 : vector<8x64xf32>
    %cst_231 = arith.constant -0.284496725 : f32
    %560 = vector.broadcast %cst_231 : f32 to vector<8x64xf32>
    %561 = arith.addf %560, %559 : vector<8x64xf32>
    %562 = arith.mulf %551, %561 : vector<8x64xf32>
    %cst_232 = arith.constant 0.254829586 : f32
    %563 = vector.broadcast %cst_232 : f32 to vector<8x64xf32>
    %564 = arith.addf %563, %562 : vector<8x64xf32>
    %565 = arith.mulf %551, %564 : vector<8x64xf32>
    %cst_233 = arith.constant 0.000000e+00 : f32
    %566 = vector.broadcast %cst_233 : f32 to vector<8x64xf32>
    %567 = arith.subf %566, %545 : vector<8x64xf32>
    %568 = arith.mulf %567, %545 : vector<8x64xf32>
    %569 = math.exp %568 : vector<8x64xf32>
    %570 = arith.mulf %565, %569 : vector<8x64xf32>
    %cst_234 = arith.constant 1.000000e+00 : f32
    %571 = vector.broadcast %cst_234 : f32 to vector<8x64xf32>
    %572 = arith.subf %571, %570 : vector<8x64xf32>
    %cst_235 = arith.constant 0.000000e+00 : f32
    %573 = vector.broadcast %cst_235 : f32 to vector<8x64xf32>
    %574 = arith.cmpf olt, %544, %573 : vector<8x64xf32>
    %cst_236 = arith.constant 0.000000e+00 : f32
    %575 = vector.broadcast %cst_236 : f32 to vector<8x64xf32>
    %576 = arith.subf %575, %572 : vector<8x64xf32>
    %577 = arith.select %574, %576, %572 : vector<8x64xi1>, vector<8x64xf32>
    %cst_237 = arith.constant 5.000000e-01 : f32
    %578 = vector.broadcast %cst_237 : f32 to vector<8x64xf32>
    %579 = arith.mulf %578, %542 : vector<8x64xf32>
    %cst_238 = arith.constant 1.000000e+00 : f32
    %580 = vector.broadcast %cst_238 : f32 to vector<8x64xf32>
    %581 = arith.addf %580, %577 : vector<8x64xf32>
    %582 = arith.mulf %579, %581 : vector<8x64xf32>
    %c2_239 = arith.constant 2 : index
    %c0_240 = arith.constant 0 : index
    %c0_241 = arith.constant 0 : index
    %583 = vector.load %arg12[%c2_239, %c0_240, %c0_241] : memref<3x64x32xf32, #tpu.memory_space<vmem>>, vector<1x64x32xf32>
    %584 = vector.shape_cast %583 : vector<1x64x32xf32> to vector<64x32xf32>
    %cst_242 = arith.constant dense<0.000000e+00> : vector<8x32xf32>
    %585 = tpu.matmul %582, %584, %cst_242 {dimension_numbers = #tpu.dot_dimension_numbers<[1], [0], [0], [1], [0, 0, 1, 1], [], []>} : vector<8x64xf32>, vector<64x32xf32>, vector<8x32xf32> -> vector<8x32xf32>
    %c2_243 = arith.constant 2 : index
    %c0_244 = arith.constant 0 : index
    %c0_245 = arith.constant 0 : index
    %586 = vector.load %arg13[%c2_243, %c0_244, %c0_245] : memref<3x1x32xf32, #tpu.memory_space<vmem>>, vector<1x1x32xf32>
    %587 = vector.shape_cast %586 : vector<1x1x32xf32> to vector<1x32xf32>
    %588 = vector.broadcast %587 : vector<1x32xf32> to vector<8x32xf32>
    %589 = arith.addf %585, %588 : vector<8x32xf32>
    %590 = arith.addf %509, %589 : vector<8x32xf32>
    %c0_246 = arith.constant 0 : index
    %c0_247 = arith.constant 0 : index
    %591 = vector.load %arg14[%c0_246, %c0_247] : memref<1x32xf32, #tpu.memory_space<vmem>>, vector<1x32xf32>
    %c0_248 = arith.constant 0 : index
    %c0_249 = arith.constant 0 : index
    %592 = vector.load %arg15[%c0_248, %c0_249] : memref<1x32xf32, #tpu.memory_space<vmem>>, vector<1x32xf32>
    %cst_250 = arith.constant dense<0.000000e+00> : vector<8xf32>
    %593 = vector.multi_reduction <add>, %590, %cst_250 [1] : vector<8x32xf32> to vector<8xf32>
    %594 = vector.shape_cast %593 : vector<8xf32> to vector<8x1xf32>
    %cst_251 = arith.constant 3.200000e+01 : f32
    %595 = vector.broadcast %cst_251 : f32 to vector<8x1xf32>
    %596 = arith.divf %594, %595 : vector<8x1xf32>
    %597 = vector.broadcast %596 : vector<8x1xf32> to vector<8x32xf32>
    %598 = arith.subf %590, %597 : vector<8x32xf32>
    %599 = arith.mulf %598, %598 : vector<8x32xf32>
    %cst_252 = arith.constant dense<0.000000e+00> : vector<8xf32>
    %600 = vector.multi_reduction <add>, %599, %cst_252 [1] : vector<8x32xf32> to vector<8xf32>
    %601 = vector.shape_cast %600 : vector<8xf32> to vector<8x1xf32>
    %cst_253 = arith.constant 3.200000e+01 : f32
    %602 = vector.broadcast %cst_253 : f32 to vector<8x1xf32>
    %603 = arith.divf %601, %602 : vector<8x1xf32>
    %604 = vector.broadcast %596 : vector<8x1xf32> to vector<8x32xf32>
    %605 = arith.subf %590, %604 : vector<8x32xf32>
    %cst_254 = arith.constant 9.99999997E-7 : f32
    %606 = vector.broadcast %cst_254 : f32 to vector<8x1xf32>
    %607 = arith.addf %603, %606 : vector<8x1xf32>
    %608 = math.rsqrt %607 : vector<8x1xf32>
    %609 = vector.broadcast %608 : vector<8x1xf32> to vector<8x32xf32>
    %610 = arith.mulf %605, %609 : vector<8x32xf32>
    %611 = vector.broadcast %591 : vector<1x32xf32> to vector<8x32xf32>
    %612 = arith.mulf %610, %611 : vector<8x32xf32>
    %613 = vector.broadcast %592 : vector<1x32xf32> to vector<8x32xf32>
    %614 = arith.addf %612, %613 : vector<8x32xf32>
    %615 = vector.shape_cast %614 : vector<8x32xf32> to vector<1x8x32xf32>
    %c0_255 = arith.constant 0 : index
    %c0_256 = arith.constant 0 : index
    %c0_257 = arith.constant 0 : index
    %616 = vector.load %arg16[%c0_255, %c0_256, %c0_257] : memref<1x8x32xf32, #tpu.memory_space<vmem>>, vector<1x8x32xf32>
    tpu.vector_store %arg16[%c0_255, %c0_256, %c0_257], %615 {strides = array<i32>} : memref<1x8x32xf32, #tpu.memory_space<vmem>>, vector<1x8x32xf32>,
    %cst_258 = arith.constant 0.0833333358 : f32
    %617 = vector.broadcast %cst_258 : f32 to vector<1x8xf32>
    %618 = arith.mulf %499, %617 : vector<1x8xf32>
    %c0_259 = arith.constant 0 : index
    %c0_260 = arith.constant 0 : index
    %c0_261 = arith.constant 0 : index
    %619 = vector.load %arg17[%c0_259, %c0_260, %c0_261] : memref<1x1x8xf32, #tpu.memory_space<vmem>>, vector<1x1x8xf32>
    %620 = vector.shape_cast %619 : vector<1x1x8xf32> to vector<1x8xf32>
    %621 = vector.shape_cast %618 : vector<1x8xf32> to vector<1x1x8xf32>
    tpu.vector_store %arg17[%c0_259, %c0_260, %c0_261], %621 {strides = array<i32>} : memref<1x1x8xf32, #tpu.memory_space<vmem>>, vector<1x1x8xf32>,
    return
  }
  func.func @transform_0(%arg0: i32) -> (i32, i32, i32) {
    %c0_i32 = arith.constant 0 : i32
    %c0_i32_0 = arith.constant 0 : i32
    %c0_i32_1 = arith.constant 0 : i32
    return %arg0, %c0_i32, %c0_i32_0 : i32, i32, i32
  }
  func.func @transform_1(%arg0: i32) -> (i32, i32, i32) {
    %c0_i32 = arith.constant 0 : i32
    %c0_i32_0 = arith.constant 0 : i32
    %c0_i32_1 = arith.constant 0 : i32
    %c0_i32_2 = arith.constant 0 : i32
    return %c0_i32, %c0_i32_0, %c0_i32_1 : i32, i32, i32
  }
  func.func @transform_2(%arg0: i32) -> (i32, i32, i32) {
    %c0_i32 = arith.constant 0 : i32
    %c0_i32_0 = arith.constant 0 : i32
    %c0_i32_1 = arith.constant 0 : i32
    %c0_i32_2 = arith.constant 0 : i32
    return %c0_i32, %c0_i32_0, %c0_i32_1 : i32, i32, i32
  }
  func.func @transform_3(%arg0: i32) -> (i32, i32, i32) {
    %c0_i32 = arith.constant 0 : i32
    %c0_i32_0 = arith.constant 0 : i32
    %c0_i32_1 = arith.constant 0 : i32
    %c0_i32_2 = arith.constant 0 : i32
    return %c0_i32, %c0_i32_0, %c0_i32_1 : i32, i32, i32
  }
  func.func @transform_4(%arg0: i32) -> (i32, i32, i32) {
    %c0_i32 = arith.constant 0 : i32
    %c0_i32_0 = arith.constant 0 : i32
    %c0_i32_1 = arith.constant 0 : i32
    %c0_i32_2 = arith.constant 0 : i32
    return %c0_i32, %c0_i32_0, %c0_i32_1 : i32, i32, i32
  }
  func.func @transform_5(%arg0: i32) -> (i32, i32, i32) {
    %c0_i32 = arith.constant 0 : i32
    %c0_i32_0 = arith.constant 0 : i32
    %c0_i32_1 = arith.constant 0 : i32
    %c0_i32_2 = arith.constant 0 : i32
    return %c0_i32, %c0_i32_0, %c0_i32_1 : i32, i32, i32
  }
  func.func @transform_6(%arg0: i32) -> (i32, i32, i32) {
    %c0_i32 = arith.constant 0 : i32
    %c0_i32_0 = arith.constant 0 : i32
    %c0_i32_1 = arith.constant 0 : i32
    %c0_i32_2 = arith.constant 0 : i32
    return %c0_i32, %c0_i32_0, %c0_i32_1 : i32, i32, i32
  }
  func.func @transform_7(%arg0: i32) -> (i32, i32, i32) {
    %c0_i32 = arith.constant 0 : i32
    %c0_i32_0 = arith.constant 0 : i32
    %c0_i32_1 = arith.constant 0 : i32
    %c0_i32_2 = arith.constant 0 : i32
    return %c0_i32, %c0_i32_0, %c0_i32_1 : i32, i32, i32
  }
  func.func @transform_8(%arg0: i32) -> (i32, i32, i32) {
    %c0_i32 = arith.constant 0 : i32
    %c0_i32_0 = arith.constant 0 : i32
    %c0_i32_1 = arith.constant 0 : i32
    %c0_i32_2 = arith.constant 0 : i32
    return %c0_i32, %c0_i32_0, %c0_i32_1 : i32, i32, i32
  }
  func.func @transform_9(%arg0: i32) -> (i32, i32, i32) {
    %c0_i32 = arith.constant 0 : i32
    %c0_i32_0 = arith.constant 0 : i32
    %c0_i32_1 = arith.constant 0 : i32
    %c0_i32_2 = arith.constant 0 : i32
    return %c0_i32, %c0_i32_0, %c0_i32_1 : i32, i32, i32
  }
  func.func @transform_10(%arg0: i32) -> (i32, i32, i32) {
    %c0_i32 = arith.constant 0 : i32
    %c0_i32_0 = arith.constant 0 : i32
    %c0_i32_1 = arith.constant 0 : i32
    %c0_i32_2 = arith.constant 0 : i32
    return %c0_i32, %c0_i32_0, %c0_i32_1 : i32, i32, i32
  }
  func.func @transform_11(%arg0: i32) -> (i32, i32, i32) {
    %c0_i32 = arith.constant 0 : i32
    %c0_i32_0 = arith.constant 0 : i32
    %c0_i32_1 = arith.constant 0 : i32
    %c0_i32_2 = arith.constant 0 : i32
    return %c0_i32, %c0_i32_0, %c0_i32_1 : i32, i32, i32
  }
  func.func @transform_12(%arg0: i32) -> (i32, i32, i32) {
    %c0_i32 = arith.constant 0 : i32
    %c0_i32_0 = arith.constant 0 : i32
    %c0_i32_1 = arith.constant 0 : i32
    %c0_i32_2 = arith.constant 0 : i32
    return %c0_i32, %c0_i32_0, %c0_i32_1 : i32, i32, i32
  }
  func.func @transform_13(%arg0: i32) -> (i32, i32) {
    %c0_i32 = arith.constant 0 : i32
    %c0_i32_0 = arith.constant 0 : i32
    %c0_i32_1 = arith.constant 0 : i32
    return %c0_i32, %c0_i32_0 : i32, i32
  }
  func.func @transform_14(%arg0: i32) -> (i32, i32) {
    %c0_i32 = arith.constant 0 : i32
    %c0_i32_0 = arith.constant 0 : i32
    %c0_i32_1 = arith.constant 0 : i32
    return %c0_i32, %c0_i32_0 : i32, i32
  }
  func.func @transform_15(%arg0: i32) -> (i32, i32, i32) {
    %c0_i32 = arith.constant 0 : i32
    %c0_i32_0 = arith.constant 0 : i32
    %c0_i32_1 = arith.constant 0 : i32
    return %arg0, %c0_i32, %c0_i32_0 : i32, i32, i32
  }
  func.func @transform_16(%arg0: i32) -> (i32, i32, i32) {
    %c0_i32 = arith.constant 0 : i32
    %c0_i32_0 = arith.constant 0 : i32
    %c0_i32_1 = arith.constant 0 : i32
    return %arg0, %c0_i32, %c0_i32_0 : i32, i32, i32
  }
}

</mosaic_0001>

<bundles_post_ra>
// kernel: tpu_custom_call.1
= control target key start
LH: loop header
LB: loop body
LE: loop exit
PB: predicated region body
PF: predicated region fallthrough
CT: control target
= control target key end

     0   :  { %s5852_s0 = inlined_call_operand.hbm [shape: f32[2,8,32], index: 0, kind: input, shape index: {}]   ;;  %s5853_s1 = inlined_call_operand.vmem [shape: f32[3,1,32], index: 1, kind: input, shape index: {}]   ;;  %s5854_s2 = inlined_call_operand.vmem [shape: f32[3,1,32], index: 2, kind: input, shape index: {}]   ;;  %s5855_s3 = inlined_call_operand.vmem [shape: f32[3,32,96], index: 3, kind: input, shape index: {}]   ;;  %s5856_s4 = inlined_call_operand.vmem [shape: f32[3,1,96], index: 4, kind: input, shape index: {}]   ;;  %s5857_s5 = inlined_call_operand.vmem [shape: f32[3,32,32], index: 5, kind: input, shape index: {}]   ;;  %s5858_s6 = inlined_call_operand.vmem [shape: f32[3,1,32], index: 6, kind: input, shape index: {}]   ;;  %s5859_s7 = inlined_call_operand.vmem [shape: f32[3,1,32], index: 7, kind: input, shape index: {}]   ;;  %s5860_s8 = inlined_call_operand.vmem [shape: f32[3,1,32], index: 8, kind: input, shape index: {}]   ;;  %s5861_s9 = inlined_call_operand.vmem [shape: f32[3,32,64], index: 9, kind: input, shape index: {}]   ;;  %s5862_s10 = inlined_call_operand.vmem [shape: f32[3,1,64], index: 10, kind: input, shape index: {}]   ;;  %s5863_s11 = inlined_call_operand.vmem [shape: f32[3,64,32], index: 11, kind: input, shape index: {}]   ;;  %s5864_s12 = inlined_call_operand.vmem [shape: f32[3,1,32], index: 12, kind: input, shape index: {}]   ;;  %s5865_s13 = inlined_call_operand.vmem [shape: f32[1,32], index: 13, kind: input, shape index: {}]   ;;  %s5866_s14 = inlined_call_operand.vmem [shape: f32[1,32], index: 14, kind: input, shape index: {}]   ;;  %s5867_s15 = inlined_call_operand.hbm [shape: f32[2,8,32], index: 15, kind: output, shape index: {0}]   ;;  %s5868_s16 = inlined_call_operand.hbm [shape: f32[2,1,8], index: 16, kind: output, shape index: {1}]  }
   0x1   :  { %5911 = sst [smem:[#allocation20_spill]] %s5852_s0 }
   0x2   :  { %5912 = sst [smem:[#allocation21_spill]] %s5858_s6 }
   0x3   :  { %5913 = sst [smem:[#allocation22_spill]] %s5865_s13 }
   0x4   :  { %5914 = sst [smem:[#allocation23_spill]] %s5866_s14 }
   0x5   :  { %5915 = sst [smem:[#allocation24_spill]] %s5867_s15 }
   0x6   :  { %5916 = sst [smem:[#allocation25_spill]] %s5868_s16 }
   0x7   :  { %22 = vsyncpa [#allocation3], 0 }
   0x8   :  { %24 = vsyncpa [#allocation3 + $0x1], 0 }
   0x9   :  { %25 = vsyncpa [#allocation4], 0 }
   0xa   :  { %27 = vsyncpa [#allocation4 + $0x1], 0 }
   0xb   :  { %28 = vsyncpa [#allocation7], 0 }
   0xc   :  { %30 = vsyncpa [#allocation7 + $0x1], 0  ;;  %s5067_s21 = smov 0   ;;  %s5069_s22 = smov 0  }
   0xd   :  { %s5071_s23 = smov 0   ;;  %s5073_s24 = smov 0  }
   0xe LB: > { %5917 = sst [smem:[#allocation11_spill]] %s4948_s21  ;;  %s5088_s25 = sadd.s32 4294967295, %s4960_s24   ;;  %s4960_s24 = sphi %s5073_s24, %s5964_s24   ;;  %s4956_s23 = sphi %s5071_s23, %s5967_s23   ;;  %s4952_s22 = sphi %s5069_s22, %s5966_s22   ;;  %s4948_s21 = sphi %s5067_s21, %s5965_s21  }
   0xf   : > { %5918 = sst [smem:[#allocation12_spill]] %s4952_s22  ;;  %s4061_s26 = sadd.s32 4294967294, %s4960_s24  }
  0x10   : > { %5919 = sst [smem:[#allocation13_spill]] %s4956_s23  ;;  %s5092_s27 = sadd.s32 1, %s4960_s24  }
  0x11   : > { %5920 = sst [smem:[#allocation14_spill]] %s4960_s24  ;;  %s43_s28 = sadd.s32 1, %s4956_s23 }
  0x12   : > { %5921 = sst [smem:[#allocation15_spill]] %s5088_s25  ;;  %s40_s29 = ssub.s32 %s4960_s24, %s5092_s27 }
  0x13   : > { %5922 = sst [smem:[#allocation16_spill]] %s5092_s27  ;;  %p50_p0 = scmp.ne.s32.totalorder %s4956_s23, %s4952_s22 }
  0x14   : > { %p41_p1 = scmp.eq.s32.totalorder %s40_s29, 0  ;;  %p51_p2 = scmp.eq.s32.totalorder %s4960_s24, 0 }
  0x15   : > { %p56_p3 = scmp.ne.s32.totalorder %s4952_s22, %s4948_s21  ;;  %p57_p4 = scmp.eq.s32.totalorder %s5088_s25, 0 }
  0x16   : > { %s5104_s30 = scalar_select %p41_p1, %s4956_s23, %s43_s28  }
  0x17   : > { %p5106_p5 = por %p51_p2, %p50_p0  ;;  %p5110_p6 = por %p57_p4, %p56_p3 }
  0x18   : > { %5923 = sst [smem:[#allocation17_spill]] %s5104_s30  ;;  %p374_p7 = scmp.eq.s32.totalorder %s5088_s25, 1 }
  0x19   : > { %p380_p8 = scmp.eq.s32.totalorder %s4061_s26, 1  ;;  %p4707_p10 = scmp.lt.s32.totalorder %s4960_s24, 2 }
  0x1a   : > { %p5117_p11 = por %p374_p7, %p50_p0  ;;  %s468_s20 = sand.u32 1, %s4956_s23  }
  0x1b   : > { %p5121_p12 = por %p380_p8, %p56_p3  ;;  %s4065_s28 = sshll.u32 %s4960_s24, 7 }
  0x1c   : > { %s5926_s18 = scalar_select %p5117_p11, 1, 0 }
  0x1d   : > { %s5928_s19 = scalar_select %p5121_p12, 1, 0 }
  0x1e   : > { %5927 = sst [smem:[#allocation18_spill]] %s5926_s18  ;;  %s4064_s29 = sshll.u32 %s468_s20, 3 }
  0x1f   : > { %5929 = sst [smem:[#allocation19_spill]] %s5928_s19  ;;  %s5930_s21 = sld [smem:[#allocation20_spill]] }
  0x20   : > { %s472_s26 = scalar_lea.vmem [#allocation2], %s4064_s29  ;;  %p5134_p13 = pnand %p4707_p10, %p5106_p5 }
  0x21   : > { %s479_s13 = sshll.u32 %s472_s26, 4  ;;  %s469_s27 = scalar_lea.sflag [#allocation3], %s468_s20  ;;  %s5138_s13 = int_to_ptr.vmem [resolvable:$true] %s479_s13 }
  0x22   : > { %p4834_p3 = pneg %p5134_p13 }
  0x25   : > { %s5931_s15 = smov %s5930_s21  ;;  %s5130_s14 = scalar_lea.hbm %s5930_s21, %s4065_s28 }
  0x26   : > { %s4832_s21 = scalar_lea.hbm %s5130_s14, 128  ;;  %s4837_s28 = scalar_lea.hbm %s5931_s15, 256 }
  0x27   : > { %p4833_p2 = scmp.ne.s32.totalorder %s5130_s14, %s4832_s21  ;;  %p4838_p5 = scmp.lt.u32.totalorder %s5130_s14, %s5931_s15 }
  0x28   : > { %p4839_p8 = scmp.lt.u32.totalorder %s4837_s28, %s4832_s21  ;;  %p4841_p9 = scmp.lt.u32.totalorder %s4832_s21, %s5130_s14 }
  0x29   : > { %p4835_p4 = pnand %p4834_p3, %p4833_p2 }
  0x2a   : > { %p4840_p10 = por %p4839_p8, %p4838_p5 }
  0x2b   : > { %p4836_p7 = pneg %p4835_p4 }
  0x2c   : > { %p4842_p0 = por %p4841_p9, %p4840_p10 }
  0x2e   : > { %p4843_p1 = pnand %p4842_p0, %p4836_p7 }
  0x30   : > { %4846 = shalt.err (!%p4843_p1)
}
  0x31   : > { %s4847_s20 = scalar_lea.vmem %s5138_s13, 128  ;;  %s4962_s30 = smov [#allocation2]  }
  0x32   : > { %p4848_p2 = scmp.ne.s32.totalorder %s5138_s13, %s4847_s20  ;;  %s4852_s0 = sshll.u32 %s4962_s30, 4  ;;  %s4853_s0 = int_to_ptr.vmem [resolvable:$false] %s4852_s0 }
  0x33   : > { %s4854_s29 = scalar_lea.vmem %s4853_s0, 256  ;;  %p4855_p11 = scmp.lt.s32.totalorder %s5138_s13, %s4853_s0 }
  0x34   : > { %p4850_p4 = pnand %p4848_p2, %p4834_p3  ;;  %p4856_p5 = scmp.lt.s32.totalorder %s4854_s29, %s4847_s20 }
  0x36   : > { %p4851_p12 = pneg %p4850_p4  ;;  %p4857_p8 = por %p4856_p5, %p4855_p11 }
  0x38   : > { %p4858_p9 = pnand %p4857_p8, %p4851_p12 }
  0x3a   : > { %4861 = shalt.err (!%p4858_p9)
}
  0x3b   : > { %4699 = dma.hbm_to_vmem [thread:$0]  (!%p5134_p13), %s5130_s14, 128, %s5138_s13, %s469_s27  }
  0x3c   : > { %p5933_p0 = scmp.lt.s32.totalorder %s4960_s24, 3  ;;  %p5934_p1 = scmp.ge.s32.totalorder %s4960_s24, 1 }
  0x3e   : > { %p485_p3 = pnand %p5934_p1, %p5933_p0 }
  0x3f   : > { %s5172_s21 = sand.u32 (!%p485_p3), 1, %s4952_s22  }
  0x40   : > { %488 = sbr.rel (%p485_p3) target bundleno = 7959 (0x1f17), region = 80  ;;  %s5876_s28 = sshll.u32 (!%p485_p3), %s5172_s21, 3 }
  0x41   : > { %s491_s26 = scalar_lea.sflag (!%p485_p3), [#allocation3], %s5172_s21  ;;  %s494_s16 = scalar_lea.vmem (!%p485_p3), [#allocation2], %s5876_s28 }
  0x47   : > { %4935 = dma.done.wait (%p5110_p6), %s491_s26, 128  }
  0x48   : > { %4937 = vsyncadd (%p5110_p6), %s491_s26, 4294967168  ;;  %vm550_vm0 = vcmask 261120   ;;  %v5182_v0 = vld [vmem:[%s494_s16] sm:$0xff]  ;;  %v581_v9 = vld [vmem:[%s5855_s3 + $0x10] sm:$0xff]  ;;  %v4963_v10 = vmov 0.0|0.0   ;;  %vm4964_vm1 = vmmov 0  }
  0x49   : > { %v551_v1 = vsel %vm550_vm0, %v5182_v0, 0.0  ;;  %v579_v7 = vld [vmem:[%s5855_s3] sm:$0xff]  ;;  %v580_v8 = vld [vmem:[%s5855_s3 + $0x8] sm:$0xff]  ;;  %4600 = vmatprep.subr.bf16.mxu1 %v4963_v10  ;;  %v582_v12 = vld [vmem:[%s5855_s3 + $0x18] sm:$0xff]  ;;  %v4965_v13 = vmov 0.0   ;;  %s5900_s20 = smov 96  }
  0x4a   : > { %552 = vadd.xlane.f32.xlu0 %v551_v1  ;;  %v4601_v11 = vpack.c.bf16 %v580_v8, %v579_v7  ;;  %4332 = vmatprep.mubr.msk.f32.mxu1 %vm4964_vm1, %v4965_v13  ;;  %v4604_v14 = vpack.c.bf16 %v582_v12, %v581_v9  ;;  %v4069_v19 = vld [vmem:[%s5853_s1] ss:$0 sm:$0xff]  ;;  %s5891_s30 = smov 120   ;;  %s5901_s0 = smov 88   ;;  %vm667_vm2 = vcmask 64512   ;;  %vm1342_vm3 = vcmask 130048  }
  0x4b   : > { %4345 = vmatprep.subr.mxu0 %v4965_v13  ;;  %4347 = vmatprep.mubr.msk.f32.mxu0 %vm4964_vm1, %v4965_v13  ;;  %v4070_v21 = vld [vmem:[%s5854_s2] ss:$0 sm:$0xff]  ;;  %s5899_s29 = smov 80   ;;  %s5889_s26 = smov 72   ;;  %vm1344_vm4 = vcmask 195584   ;;  %vm1586_vm6 = vcmask 523264  }
  0x4c   : > { %4602 = vmatpush3.bf16.msra.mxu1 %v4601_v11  ;;  %v4071_v24 = vld [vmem:[%s5856_s4] ss:$0 sm:$0xff]  ;;  %s5887_s16 = smov 112   ;;  %s5885_s13 = smov 104   ;;  %vm3930_vm8 = vcmask 57344  }
  0x4d   : > { %4603 = vmatprep.subr.bf16.mxu1 %v4963_v10  ;;  %s5883_s14 = smov 64   ;;  %s5881_s17 = smov 48  }
  0x4e   : > { %s5879_s27 = smov 40   ;;  %s5877_s28 = smov 56  }
  0x4f   : > { %s5935_s6 = sld [smem:[#allocation21_spill]]  ;;  %s5944_s15 = smov 8  }
  0x50   : > { %4605 = vmatpush3.bf16.msra.mxu1 %v4604_v14  ;;  %s5946_s22 = smov 24   ;;  %s5947_s23 = smov 88  }
  0x51   : > { %4335 = vmatprep.subr.mxu1 %v4965_v13  ;;  %s5948_s24 = smov 96   ;;  %s5949_s19 = smov 80  }
  0x52   : > { %s5950_s18 = sld [smem:[#allocation21_spill]] }
  0xd7   : > { %v553_v2 = vpop.xlane.xlu0 %552 }
  0xd8   : > { %v555_v3 = vmul.f32 0.03125, %v553_v2 }
  0xda   : > { %v556_v4 = vsub.f32 %v5182_v0, %v555_v3 }
  0xdc   : > { %v557_v5 = vmul.f32 %v556_v4, %v556_v4 }
  0xde   : > { %v558_v6 = vsel %vm550_vm0, %v557_v5, 0.0 }
  0xdf   : > { %559 = vadd.xlane.f32.xlu0 %v558_v6 }
 0x16c   : > { %v560_v15 = vpop.xlane.xlu0 %559 }
 0x16d   : > { %v561_v16 = vmul.f32 0.03125, %v560_v15 }
 0x16f   : > { %v562_v17 = vadd.f32 1e-06, %v561_v16 }
 0x171   : > { %4758 = vrsqrt.f32 %v562_v17 }
 0x17b   : > { %v4759_v18 = vpop.eup %4758 }
 0x17c   : > { %v564_v20 = vmul.f32 %v4759_v18, %v556_v4 }
 0x17e   : > { %v571_v22 = vmul.f32 %v4069_v19, %v564_v20 }
 0x180   : > { %v578_v23 = vadd.f32 %v4070_v21, %v571_v22 }
 0x182   : > { %4333 = vmatmul.mubr.msk.f32.vlgmr.msra.gmra.mrb[0].mxu1 %vm550_vm0, %v578_v23 }
 0x183   : > { %4337 = vmatprep.mubr.msk.f32.mxu1 %vm4964_vm1, %v4965_v13 }
 0x255   : > { %v659_v25 = vpop.f32.mrb[0].mxu1 }
 0x256   : > { %v5220_v26 = vadd.f32 %v4071_v24, %v659_v25  ;;  %v4334_v27 = vpop.f32.mrb[1].mxu1 }
 0x257   : > { %v1347_v27 = vld [vmem:[%s5857_s5 + $0x8] sm:$0xff] }
 0x258   : > { %665 = vrot.lane.b32.xlu1 %v5220_v26, %s5900_s20  ;;  %v663_v28 = vmul.f32 0.35355338, %v5220_v26 }
 0x25a   : > { %831 = vrot.lane.b32.xlu0 %v663_v28, %s5891_s30  ;;  %s5936_s30 = smov 120  }
 0x25c   : > { %833 = vrot.lane.b32.xlu1 %v5220_v26, %s5901_s0 }
 0x260   : > { %999 = vrot.lane.b32.xlu1 %v5220_v26, %s5899_s29 }
 0x264   : > { %1165 = vrot.lane.b32.xlu1 %v5220_v26, %s5889_s26  ;;  %s5937_s26 = smov 72  }
 0x268   : > { %997 = vrot.lane.b32.xlu1 %v663_v28, %s5887_s16  ;;  %s5893_s16 = smov 24  }
 0x26c   : > { %1163 = vrot.lane.b32.xlu1 %v663_v28, %s5885_s13  ;;  %s5938_s13 = smov 112  }
 0x2ca   : > { %v666_v29 = vpop.permute.xlu1 %665 }
 0x2cb   : > { %4336 = vmatpush3.xpose.msk.msra.mxu1 %vm667_vm2, %v666_v29 }
 0x2cc   : > { %4340 = vmatprep.subr.mxu1 %v4965_v13  ;;  %v832_v31 = vpop.permute.xlu0 %831 }
 0x2ce   : > { %v834_v30 = vpop.permute.xlu1 %833  ;;  %4338 = vmatmul.mubr.msk.f32.vlgmr.msra.gmra.mrb[2].mxu1 %vm667_vm2, %v663_v28 }
 0x2cf   : > { %4346 = vmatpush3.xpose.msk.msra.mxu0 %vm667_vm2, %v834_v30  ;;  %4342 = vmatprep.mubr.msk.f32.mxu1 %vm4964_vm1, %v4965_v13 }
 0x2d0   : > { %4355 = vmatprep.subr.mxu0 %v4965_v13 }
 0x2d2   : > { %v1000_v32 = vpop.permute.xlu1 %999  ;;  %4348 = vmatmul.mubr.msk.f32.vlgmr.msra.gmra.mrb[0].mxu0 %vm667_vm2, %v832_v31  ;;  %v1348_v31 = vld [vmem:[%s5857_s5 + $0x10] sm:$0xff] }
 0x2d3   : > { %4356 = vmatpush3.xpose.msk.msra.mxu0 %vm667_vm2, %v1000_v32  ;;  %4357 = vmatprep.mubr.msk.f32.mxu0 %vm4964_vm1, %v4965_v13  ;;  %v1349_v32 = vld [vmem:[%s5857_s5 + $0x18] sm:$0xff] }
 0x2d4   : > { %4365 = vmatprep.subr.mxu0 %v4965_v13 }
 0x2d6   : > { %v1166_v33 = vpop.permute.xlu1 %1165 }
 0x2da   : > { %v998_v34 = vpop.permute.xlu1 %997 }
 0x2db   : > { %4358 = vmatmul.mubr.msk.f32.vlgmr.msra.gmra.mrb[2].mxu0 %vm667_vm2, %v998_v34 }
 0x2dc   : > { %4366 = vmatpush3.xpose.msk.msra.mxu0 %vm667_vm2, %v1166_v33  ;;  %4367 = vmatprep.mubr.msk.f32.mxu0 %vm4964_vm1, %v4965_v13  ;;  %v4610_v33 = vpack.c.bf16 %v1349_v32, %v1348_v31 }
 0x2dd   : > { %4606 = vmatprep.subr.bf16.mxu0 %v4963_v10 }
 0x2de   : > { %v1164_v35 = vpop.permute.xlu1 %1163 }
 0x2df   : > { %4368 = vmatmul.mubr.msk.f32.vlgmr.msra.gmra.mrb[4].mxu0 %vm667_vm2, %v1164_v35 }
 0x2e0   : > { %4383 = vmatprep.mubr.msk.f32.mxu0 %vm4964_vm1, %v4965_v13 }
 0x3a1   : > { %v739_v36 = vpop.f32.mrb[2].mxu1 }
 0x3a2   : > { %v4339_v37 = vpop.f32.mrb[3].mxu1  ;;  %v743_v38 = vsel %vm667_vm2, %v739_v36, -inf }
 0x3a3   : > { %744 = vmax.xlane.f32.xlu1 %v743_v38 }
 0x3a5   : > { %v905_v39 = vpop.f32.mrb[0].mxu0 }
 0x3a6   : > { %v4349_v40 = vpop.f32.mrb[1].mxu0  ;;  %v909_v41 = vsel %vm667_vm2, %v905_v39, -inf }
 0x3a7   : > { %910 = vmax.xlane.f32.xlu0 %v909_v41 }
 0x3ae   : > { %v1071_v42 = vpop.f32.mrb[2].mxu0 }
 0x3af   : > { %v4359_v43 = vpop.f32.mrb[3].mxu0  ;;  %v1075_v44 = vsel %vm667_vm2, %v1071_v42, -inf }
 0x3b0   : > { %1076 = vmax.xlane.f32.xlu1 %v1075_v44 }
 0x3b2   : > { %v1237_v45 = vpop.f32.mrb[4].mxu0 }
 0x3b3   : > { %v4369_v46 = vpop.f32.mrb[5].mxu0  ;;  %v1241_v47 = vsel %vm667_vm2, %v1237_v45, -inf }
 0x3b4   : > { %1242 = vmax.xlane.f32.xlu0 %v1241_v47  ;;  %v4085_v46 = vld [vmem:[%s5935_s6] ss:$0 sm:$0xff] }
 0x3c1   : > { %755 = vrot.lane.b32.xlu1 %v5220_v26, %s5883_s14  ;;  %s5895_s14 = smov 16  }
 0x430   : > { %v745_v48 = vpop.xlane.xlu1 %744 }
 0x431   : > { %v746_v49 = vsub.f32 %v739_v36, %v745_v48 }
 0x433   : > { %v747_v50 = vmul.f32 1.442695, %v746_v49 }
 0x434   : > { %v911_v51 = vpop.xlane.xlu0 %910 }
 0x435   : > { %4760 = vpow2.f32 %v747_v50  ;;  %v912_v52 = vsub.f32 %v905_v39, %v911_v51 }
 0x437   : > { %v913_v53 = vmul.f32 1.442695, %v912_v52 }
 0x439   : > { %4762 = vpow2.f32 %v913_v53 }
 0x43d   : > { %v1077_v54 = vpop.xlane.xlu1 %1076 }
 0x43e   : > { %v1078_v55 = vsub.f32 %v1071_v42, %v1077_v54 }
 0x43f   : > { %v4761_v56 = vpop.eup %4760 }
 0x440   : > { %v1079_v57 = vmul.f32 1.442695, %v1078_v55  ;;  %v749_v58 = vsel %vm667_vm2, %v4761_v56, 0.0 }
 0x441   : > { %v1243_v59 = vpop.xlane.xlu0 %1242  ;;  %750 = vadd.xlane.f32.xlu1 %v749_v58  ;;  %v756_v60 = vpop.permute.xlu1 %755 }
 0x442   : > { %4764 = vpow2.f32 %v1079_v57  ;;  %v1244_v61 = vsub.f32 %v1237_v45, %v1243_v59  ;;  %4341 = vmatpush3.msra.mxu1 %v756_v60  ;;  %v1460_v57 = vld [vmem:[%s5861_s9] sm:$0xff]  ;;  %v1462_v59 = vld [vmem:[%s5861_s9 + $0x10] sm:$0xff]  ;;  %v1463_v60 = vld [vmem:[%s5861_s9 + $0x18] sm:$0xff] }
 0x443   : > { %v4763_v62 = vpop.eup %4762  ;;  %4350 = vmatprep.subr.mxu1 %v4965_v13 }
 0x444   : > { %v1245_v63 = vmul.f32 1.442695, %v1244_v61  ;;  %v915_v1 = vsel %vm667_vm2, %v4763_v62, 0.0  ;;  %v4616_v61 = vpack.c.bf16 %v1463_v60, %v1462_v59 }
 0x445   : > { %916 = vadd.xlane.f32.xlu0 %v915_v1 }
 0x446   : > { %4766 = vpow2.f32 %v1245_v63 }
 0x44c   : > { %v4765_v2 = vpop.eup %4764 }
 0x44d   : > { %v1081_v3 = vsel %vm667_vm2, %v4765_v2, 0.0 }
 0x44e   : > { %1082 = vadd.xlane.f32.xlu1 %v1081_v3  ;;  %v4087_v3 = vld [vmem:[%s5859_s7] ss:$0 sm:$0xff] }
 0x450   : > { %v4767_v4 = vpop.eup %4766 }
 0x451   : > { %v1247_v5 = vsel %vm667_vm2, %v4767_v4, 0.0 }
 0x452   : > { %1248 = vadd.xlane.f32.xlu0 %v1247_v5  ;;  %v4088_v5 = vld [vmem:[%s5860_s8] ss:$0 sm:$0xff] }
 0x45f   : > { %1087 = vrot.lane.b32.xlu1 %v5220_v26, %s5881_s17  ;;  %s5939_s17 = smov 104  }
 0x463   : > { %1253 = vrot.lane.b32.xlu1 %v5220_v26, %s5879_s27  ;;  %s5941_s27 = smov 48  }
 0x468   : > { %921 = vrot.lane.b32.xlu0 %v5220_v26, %s5877_s28  ;;  %v1346_v26 = vld [vmem:[%s5857_s5] sm:$0xff]  ;;  %s5897_s28 = smov 8  }
 0x469   : > { %v4607_v28 = vpack.c.bf16 %v1347_v27, %v1346_v26 }
 0x46b   : > { %4608 = vmatpush3.bf16.msra.mxu0 %v4607_v28 }
 0x46c   : > { %4609 = vmatprep.subr.bf16.mxu0 %v4963_v10 }
 0x46f   : > { %4611 = vmatpush3.bf16.msra.mxu0 %v4610_v33 }
 0x470   : > { %4618 = vmatprep.subr.bf16.mxu0 %v4963_v10 }
 0x4ce   : > { %v751_v6 = vpop.xlane.xlu1 %750 }
 0x4cf   : > { %4768 = vrcp.f32 %v751_v6 }
 0x4d2   : > { %v917_v7 = vpop.xlane.xlu0 %916 }
 0x4d3   : > { %4770 = vrcp.f32 %v917_v7 }
 0x4d9   : > { %v4769_v8 = vpop.eup %4768 }
 0x4da   : > { %v753_v9 = vmul.f32 %v4769_v8, %v4761_v56  ;;  %v1571_v8 = vld [vmem:[%s5863_s11] sm:$0xff] }
 0x4db   : > { %v1083_v11 = vpop.xlane.xlu1 %1082 }
 0x4dc   : > { %4772 = vrcp.f32 %v1083_v11  ;;  %4343 = vmatmul.mubr.msk.f32.vlgmr.msra.gmra.mrb[4].mxu1 %vm667_vm2, %v753_v9 }
 0x4dd   : > { %v4771_v12 = vpop.eup %4770  ;;  %4352 = vmatprep.mubr.msk.f32.mxu1 %vm4964_vm1, %v4965_v13 }
 0x4de   : > { %v919_v14 = vmul.f32 %v4771_v12, %v4763_v62  ;;  %v1573_v12 = vld [vmem:[%s5863_s11 + $0x10] sm:$0xff] }
 0x4df   : > { %v1249_v15 = vpop.xlane.xlu0 %1248  ;;  %v1088_v17 = vpop.permute.xlu1 %1087 }
 0x4e0   : > { %v920_v16 = vadd.f32 %v919_v14, %v753_v9  ;;  %4774 = vrcp.f32 %v1249_v15  ;;  %v1572_v9 = vld [vmem:[%s5863_s11 + $0x8] sm:$0xff] }
 0x4e1   : > { %v4619_v11 = vpack.c.bf16 %v1572_v9, %v1571_v8  ;;  %v4095_v9 = vld [vmem:[%s5853_s1 + $0x1] ss:$0 sm:$0xff] }
 0x4e3   : > { %v922_v18 = vpop.permute.xlu0 %921  ;;  %v1254_v22 = vpop.permute.xlu1 %1253 }
 0x4e4   : > { %4351 = vmatpush3.msra.mxu1 %v922_v18 }
 0x4e5   : > { %4353 = vmatmul.mubr.msk.f32.vlgmr.msra.gmra.mrb[6].mxu1 %vm667_vm2, %v919_v14  ;;  %4360 = vmatprep.subr.mxu1 %v4965_v13  ;;  %v1574_v14 = vld [vmem:[%s5863_s11 + $0x18] sm:$0xff] }
 0x4e6   : > { %v4773_v19 = vpop.eup %4772  ;;  %4361 = vmatpush3.msra.mxu1 %v1088_v17  ;;  %4362 = vmatprep.mubr.msk.f32.mxu1 %vm4964_vm1, %v4965_v13  ;;  %v4622_v15 = vpack.c.bf16 %v1574_v14, %v1573_v12  ;;  %v1576_v17 = vld [vmem:[%s5863_s11 + $0x28] sm:$0xff]  ;;  %v4096_v12 = vld [vmem:[%s5854_s2 + $0x1] ss:$0 sm:$0xff] }
 0x4e7   : > { %v1085_v20 = vmul.f32 %v4773_v19, %v4765_v2  ;;  %4370 = vmatprep.subr.mxu1 %v4965_v13  ;;  %v1577_v19 = vld [vmem:[%s5863_s11 + $0x30] sm:$0xff] }
 0x4e9   : > { %v1086_v21 = vadd.f32 %v1085_v20, %v920_v16  ;;  %4363 = vmatmul.mubr.msk.f32.vlgmr.msra.gmra.mrb[8].mxu1 %vm667_vm2, %v1085_v20  ;;  %v1575_v16 = vld [vmem:[%s5863_s11 + $0x20] sm:$0xff]  ;;  %v1578_v20 = vld [vmem:[%s5863_s11 + $0x38] sm:$0xff] }
 0x4ea   : > { %v4775_v23 = vpop.eup %4774  ;;  %4371 = vmatpush3.msra.mxu1 %v1254_v22  ;;  %4372 = vmatprep.mubr.msk.f32.mxu1 %vm4964_vm1, %v4965_v13  ;;  %v4625_v18 = vpack.c.bf16 %v1576_v17, %v1575_v16  ;;  %v4089_v22 = vld [vmem:[%s5862_s10] ss:$0 sm:$0xff]  ;;  %v4102_v16 = vld [vmem:[%s5856_s4 + $0x1] ss:$0 sm:$0xff] }
 0x4eb   : > { %v1251_v24 = vmul.f32 %v4775_v23, %v4767_v4  ;;  %4612 = vmatprep.subr.bf16.mxu1 %v4963_v10 }
 0x4ed   : > { %v5283_v25 = vadd.f32 %v1251_v24, %v1086_v21  ;;  %4373 = vmatmul.mubr.msk.f32.vlgmr.msra.gmra.mrb[10].mxu1 %vm667_vm2, %v1251_v24  ;;  %v4628_v21 = vpack.c.bf16 %v1578_v20, %v1577_v19 }
 0x4ee   : > { %4394 = vmatprep.mubr.msk.f32.mxu1 %vm4964_vm1, %v4965_v13 }
 0x5af   : > { %v827_v29 = vpop.f32.mrb[4].mxu1 }
 0x5b0   : > { %v4344_v30 = vpop.f32.mrb[5].mxu1 }
 0x5b8   : > { %v993_v34 = vpop.f32.mrb[6].mxu1 }
 0x5b9   : > { %1330 = vrot.lane.b32.xlu0 %v993_v34, %s5897_s28  ;;  %v4354_v35 = vpop.f32.mrb[7].mxu1  ;;  %s5942_s28 = smov 40  }
 0x5bc   : > { %v1159_v36 = vpop.f32.mrb[8].mxu1 }
 0x5bd   : > { %1334 = vrot.lane.b32.xlu1 %v1159_v36, %s5895_s14  ;;  %v4364_v37 = vpop.f32.mrb[9].mxu1  ;;  %s5943_s14 = smov 56  }
 0x5c0   : > { %v1325_v38 = vpop.f32.mrb[10].mxu1 }
 0x5c1   : > { %1338 = vrot.lane.b32.xlu0 %v1325_v38, %s5893_s16  ;;  %v4374_v39 = vpop.f32.mrb[11].mxu1  ;;  %s5940_s16 = smov 64  }
 0x62b   : > { %v1331_v40 = vpop.permute.xlu0 %1330 }
 0x62c   : > { %v1341_v42 = vsel %vm667_vm2, %v827_v29, %v1331_v40 }
 0x62f   : > { %v1335_v41 = vpop.permute.xlu1 %1334 }
 0x630   : > { %v1343_v43 = vsel %vm1342_vm3, %v1341_v42, %v1335_v41 }
 0x633   : > { %v1339_v44 = vpop.permute.xlu0 %1338 }
 0x634   : > { %v1345_v45 = vsel %vm1344_vm4, %v1343_v43, %v1339_v44 }
 0x635   : > { %4384 = vmatmul.mubr.msk.f32.vlgmr.msra.gmra.mrb[6].mxu0 %vm550_vm0, %v1345_v45 }
 0x636   : > { %4413 = vmatprep.mubr.msk.f32.mxu0 %vm4964_vm1, %v4965_v13  ;;  %4620 = vmatpush3.bf16.msra.mxu0 %v4619_v11 }
 0x637   : > { %4621 = vmatprep.subr.bf16.mxu0 %v4963_v10 }
 0x63a   : > { %4623 = vmatpush3.bf16.msra.mxu0 %v4622_v15 }
 0x63b   : > { %4624 = vmatprep.subr.bf16.mxu0 %v4963_v10 }
 0x63e   : > { %4626 = vmatpush3.bf16.msra.mxu0 %v4625_v18 }
 0x63f   : > { %4627 = vmatprep.subr.bf16.mxu0 %v4963_v10 }
 0x642   : > { %4629 = vmatpush3.bf16.msra.mxu0 %v4628_v21 }
 0x643   : > { %4437 = vmatprep.subr.mxu0 %v4965_v13 }
 0x708   : > { %v1426_v47 = vpop.f32.mrb[6].mxu0 }
 0x709   : > { %v1427_v48 = vadd.f32 %v4085_v46, %v1426_v47  ;;  %v4385_v49 = vpop.f32.mrb[7].mxu0 }
 0x70b   : > { %v5315_v50 = vadd.f32 %v1427_v48, %v5182_v0  ;;  %v1461_v0 = vld [vmem:[%s5861_s9 + $0x8] sm:$0xff] }
 0x70c   : > { %v4613_v58 = vpack.c.bf16 %v1461_v0, %v1460_v57 }
 0x70d   : > { %v1433_v51 = vsel %vm550_vm0, %v5315_v50, 0.0 }
 0x70e   : > { %1434 = vadd.xlane.f32.xlu1 %v1433_v51  ;;  %4614 = vmatpush3.bf16.msra.mxu1 %v4613_v58 }
 0x70f   : > { %4615 = vmatprep.subr.bf16.mxu1 %v4963_v10 }
 0x712   : > { %4617 = vmatpush3.bf16.msra.mxu1 %v4616_v61 }
 0x713   : > { %4630 = vmatprep.subr.bf16.mxu1 %v4963_v10 }
 0x79b   : > { %v1435_v52 = vpop.xlane.xlu1 %1434 }
 0x79c   : > { %v1436_v53 = vmul.f32 0.03125, %v1435_v52 }
 0x79e   : > { %v1437_v54 = vsub.f32 %v5315_v50, %v1436_v53  ;;  %v4091_v53 = vld [vmem:[%s5864_s12] ss:$0 sm:$0xff] }
 0x7a0   : > { %v1438_v55 = vmul.f32 %v1437_v54, %v1437_v54 }
 0x7a2   : > { %v1439_v56 = vsel %vm550_vm0, %v1438_v55, 0.0 }
 0x7a3   : > { %1440 = vadd.xlane.f32.xlu0 %v1439_v56 }
 0x830   : > { %v1441_v62 = vpop.xlane.xlu0 %1440 }
 0x831   : > { %v1442_v63 = vmul.f32 0.03125, %v1441_v62 }
 0x833   : > { %v1443_v1 = vadd.f32 1e-06, %v1442_v63  ;;  %v4097_v63 = vld [vmem:[%s5855_s3 + $0x20] sm:$0xff] }
 0x835   : > { %4776 = vrsqrt.f32 %v1443_v1 }
 0x83f   : > { %v4777_v2 = vpop.eup %4776 }
 0x840   : > { %v1445_v4 = vmul.f32 %v4777_v2, %v1437_v54  ;;  %v4099_v2 = vld [vmem:[%s5855_s3 + $0x30] sm:$0xff] }
 0x842   : > { %v1452_v6 = vmul.f32 %v4087_v3, %v1445_v4  ;;  %v4100_v3 = vld [vmem:[%s5855_s3 + $0x38] sm:$0xff] }
 0x843   : > { %v4634_v4 = vpack.c.bf16 %v4100_v3, %v4099_v2 }
 0x844   : > { %v1459_v7 = vadd.f32 %v4088_v5, %v1452_v6 }
 0x846   : > { %4395 = vmatmul.mubr.msk.f32.vlgmr.msra.gmra.mrb[12].mxu1 %vm550_vm0, %v1459_v7 }
 0x847   : > { %4424 = vmatprep.mubr.msk.f32.mxu1 %vm4964_vm1, %v4965_v13 }
 0x919   : > { %v1540_v23 = vpop.f32.mrb[12].mxu1 }
 0x91a   : > { %v1541_v24 = vadd.f32 %v4089_v22, %v1540_v23  ;;  %v4396_v26 = vpop.f32.mrb[13].mxu1 }
 0x91c   : > { %v1544_v27 = vmul.f32 0.70710677, %v1541_v24  ;;  %v1568_v49 = vmul.f32 0.5, %v1541_v24 }
 0x91e   : > { %v1545_v28 = vand.u32 2147483647, %v1544_v27  ;;  %vm1565_vm5 = vcmp.lt.f32.partialorder %v1544_v27, 0.0 }
 0x920   : > { %v1546_v29 = vmul.f32 0.3275911, %v1545_v28  ;;  %v1559_v31 = vsub.f32 0.0, %v1545_v28 }
 0x922   : > { %v1547_v30 = vadd.f32 1.0, %v1546_v29  ;;  %v1560_v33 = vmul.f32 %v1559_v31, %v1545_v28 }
 0x924   : > { %4778 = vrcp.f32 %v1547_v30  ;;  %v1561_v36 = vmul.f32 1.442695, %v1560_v33 }
 0x926   : > { %4780 = vpow2.f32 %v1561_v36 }
 0x92e   : > { %v4779_v32 = vpop.eup %4778 }
 0x92f   : > { %v1550_v34 = vmul.f32 1.0614054, %v4779_v32 }
 0x930   : > { %v4781_v44 = vpop.eup %4780 }
 0x931   : > { %v1551_v35 = vadd.f32 -1.4531521, %v1550_v34 }
 0x933   : > { %v1552_v37 = vmul.f32 %v4779_v32, %v1551_v35 }
 0x935   : > { %v1553_v38 = vadd.f32 1.4214138, %v1552_v37 }
 0x937   : > { %v1554_v39 = vmul.f32 %v4779_v32, %v1553_v38 }
 0x939   : > { %v1555_v40 = vadd.f32 -0.28449672, %v1554_v39 }
 0x93b   : > { %v1556_v41 = vmul.f32 %v4779_v32, %v1555_v40 }
 0x93d   : > { %v1557_v42 = vadd.f32 0.2548296, %v1556_v41 }
 0x93f   : > { %v1558_v43 = vmul.f32 %v4779_v32, %v1557_v42 }
 0x941   : > { %v1563_v45 = vmul.f32 %v4781_v44, %v1558_v43 }
 0x943   : > { %v1564_v46 = vsub.f32 1.0, %v1563_v45 }
 0x945   : > { %v1566_v47 = vsub.f32 0.0, %v1564_v46 }
 0x947   : > { %v1567_v48 = vsel %vm1565_vm5, %v1566_v47, %v1564_v46 }
 0x948   : > { %v1569_v51 = vadd.f32 1.0, %v1567_v48 }
 0x94a   : > { %v1570_v52 = vmul.f32 %v1569_v51, %v1568_v49 }
 0x94c   : > { %4414 = vmatmul.mubr.msk.f32.vlgmr.msra.gmra.mrb[8].mxu0 %vm1586_vm6, %v1570_v52 }
 0x94d   : > { %4439 = vmatprep.mubr.msk.f32.mxu0 %vm4964_vm1, %v4965_v13 }
 0xa1f   : > { %v1656_v54 = vpop.f32.mrb[8].mxu0 }
 0xa20   : > { %v1657_v55 = vadd.f32 %v4091_v53, %v1656_v54  ;;  %v4415_v56 = vpop.f32.mrb[9].mxu0 }
 0xa22   : > { %v5382_v57 = vadd.f32 %v1657_v55, %v5315_v50  ;;  %v4098_v50 = vld [vmem:[%s5855_s3 + $0x28] sm:$0xff] }
 0xa23   : > { %v4631_v1 = vpack.c.bf16 %v4098_v50, %v4097_v63 }
 0xa24   : > { %v1665_v0 = vsel %vm550_vm0, %v5382_v57, 0.0 }
 0xa25   : > { %1666 = vadd.xlane.f32.xlu0 %v1665_v0  ;;  %4632 = vmatpush3.bf16.msra.mxu1 %v4631_v1 }
 0xa26   : > { %4633 = vmatprep.subr.bf16.mxu1 %v4963_v10 }
 0xa29   : > { %4635 = vmatpush3.bf16.msra.mxu1 %v4634_v4 }
 0xa2a   : > { %4427 = vmatprep.subr.mxu1 %v4965_v13 }
 0xab2   : > { %v1667_v58 = vpop.xlane.xlu0 %1666 }
 0xab3   : > { %v1668_v59 = vmul.f32 0.03125, %v1667_v58 }
 0xab5   : > { %v1669_v60 = vsub.f32 %v5382_v57, %v1668_v59 }
 0xab7   : > { %v1670_v61 = vmul.f32 %v1669_v60, %v1669_v60 }
 0xab9   : > { %v1671_v62 = vsel %vm550_vm0, %v1670_v61, 0.0 }
 0xaba   : > { %1672 = vadd.xlane.f32.xlu1 %v1671_v62 }
 0xb47   : > { %v1673_v5 = vpop.xlane.xlu1 %1672 }
 0xb48   : > { %v1674_v6 = vmul.f32 0.03125, %v1673_v5 }
 0xb4a   : > { %v1675_v7 = vadd.f32 1e-06, %v1674_v6 }
 0xb4c   : > { %4782 = vrsqrt.f32 %v1675_v7 }
 0xb56   : > { %v4783_v8 = vpop.eup %4782 }
 0xb57   : > { %v1677_v11 = vmul.f32 %v4783_v8, %v1669_v60 }
 0xb59   : > { %v1684_v14 = vmul.f32 %v4095_v9, %v1677_v11 }
 0xb5b   : > { %v1691_v15 = vadd.f32 %v4096_v12, %v1684_v14 }
 0xb5d   : > { %4425 = vmatmul.mubr.msk.f32.vlgmr.msra.gmra.mrb[14].mxu1 %vm550_vm0, %v1691_v15 }
 0xb5e   : > { %4429 = vmatprep.mubr.msk.f32.mxu1 %vm4964_vm1, %v4965_v13 }
 0xc30   : > { %v1774_v17 = vpop.f32.mrb[14].mxu1 }
 0xc31   : > { %v5414_v18 = vadd.f32 %v4102_v16, %v1774_v17  ;;  %v4426_v19 = vpop.f32.mrb[15].mxu1 }
 0xc32   : > { %v4116_v19 = vld [vmem:[%s5857_s5 + $0x20] sm:$0xff] }
 0xc33   : > { %1947 = vrot.lane.b32.xlu1 %v5414_v18, %s5901_s0  ;;  %1780 = vrot.lane.b32.xlu0 %v5414_v18, %s5900_s20  ;;  %v1778_v20 = vmul.f32 0.35355338, %v5414_v18  ;;  %s5945_s20 = smov 16  }
 0xc37   : > { %2113 = vrot.lane.b32.xlu0 %v5414_v18, %s5899_s29  ;;  %1945 = vrot.lane.b32.xlu1 %v1778_v20, %s5936_s30 }
 0xc3b   : > { %2279 = vrot.lane.b32.xlu0 %v5414_v18, %s5937_s26  ;;  %2111 = vrot.lane.b32.xlu1 %v1778_v20, %s5938_s13 }
 0xc3f   : > { %2277 = vrot.lane.b32.xlu1 %v1778_v20, %s5939_s17 }
 0xca5   : > { %v1948_v21 = vpop.permute.xlu1 %1947  ;;  %v1781_v22 = vpop.permute.xlu0 %1780 }
 0xca6   : > { %4428 = vmatpush3.xpose.msk.msra.mxu1 %vm667_vm2, %v1781_v22  ;;  %4438 = vmatpush3.xpose.msk.msra.mxu0 %vm667_vm2, %v1948_v21  ;;  %v4118_v22 = vld [vmem:[%s5857_s5 + $0x30] sm:$0xff] }
 0xca7   : > { %4447 = vmatprep.subr.mxu0 %v4965_v13  ;;  %4432 = vmatprep.subr.mxu1 %v4965_v13 }
 0xca9   : > { %v2114_v23 = vpop.permute.xlu0 %2113  ;;  %v1946_v24 = vpop.permute.xlu1 %1945  ;;  %4430 = vmatmul.mubr.msk.f32.vlgmr.msra.gmra.mrb[16].mxu1 %vm667_vm2, %v1778_v20  ;;  %v4117_v20 = vld [vmem:[%s5857_s5 + $0x28] sm:$0xff] }
 0xcaa   : > { %4440 = vmatmul.mubr.msk.f32.vlgmr.msra.gmra.mrb[10].mxu0 %vm667_vm2, %v1946_v24  ;;  %4434 = vmatprep.mubr.msk.f32.mxu1 %vm4964_vm1, %v4965_v13  ;;  %v4637_v21 = vpack.c.bf16 %v4117_v20, %v4116_v19 }
 0xcab   : > { %4448 = vmatpush3.xpose.msk.msra.mxu0 %vm667_vm2, %v2114_v23  ;;  %4449 = vmatprep.mubr.msk.f32.mxu0 %vm4964_vm1, %v4965_v13  ;;  %v4119_v23 = vld [vmem:[%s5857_s5 + $0x38] sm:$0xff] }
 0xcac   : > { %4457 = vmatprep.subr.mxu0 %v4965_v13  ;;  %v4640_v24 = vpack.c.bf16 %v4119_v23, %v4118_v22 }
 0xcad   : > { %v2280_v26 = vpop.permute.xlu0 %2279  ;;  %v2112_v27 = vpop.permute.xlu1 %2111 }
 0xcae   : > { %4450 = vmatmul.mubr.msk.f32.vlgmr.msra.gmra.mrb[12].mxu0 %vm667_vm2, %v2112_v27 }
 0xcaf   : > { %4458 = vmatpush3.xpose.msk.msra.mxu0 %vm667_vm2, %v2280_v26  ;;  %4459 = vmatprep.mubr.msk.f32.mxu0 %vm4964_vm1, %v4965_v13 }
 0xcb0   : > { %4636 = vmatprep.subr.bf16.mxu0 %v4963_v10 }
 0xcb1   : > { %v2278_v28 = vpop.permute.xlu1 %2277 }
 0xcb2   : > { %4460 = vmatmul.mubr.msk.f32.vlgmr.msra.gmra.mrb[14].mxu0 %vm667_vm2, %v2278_v28 }
 0xcb3   : > { %4475 = vmatprep.mubr.msk.f32.mxu0 %vm4964_vm1, %v4965_v13  ;;  %4638 = vmatpush3.bf16.msra.mxu0 %v4637_v21 }
 0xcb4   : > { %4639 = vmatprep.subr.bf16.mxu0 %v4963_v10 }
 0xcb7   : > { %4641 = vmatpush3.bf16.msra.mxu0 %v4640_v24 }
 0xcb8   : > { %4648 = vmatprep.subr.bf16.mxu0 %v4963_v10 }
 0xd7c   : > { %v1853_v29 = vpop.f32.mrb[16].mxu1 }
 0xd7d   : > { %v4431_v30 = vpop.f32.mrb[17].mxu1  ;;  %v2019_v31 = vpop.f32.mrb[10].mxu0  ;;  %v1857_v32 = vsel %vm667_vm2, %v1853_v29, -inf }
 0xd7e   : > { %v4441_v33 = vpop.f32.mrb[11].mxu0  ;;  %1858 = vmax.xlane.f32.xlu0 %v1857_v32  ;;  %v2023_v34 = vsel %vm667_vm2, %v2019_v31, -inf }
 0xd7f   : > { %2024 = vmax.xlane.f32.xlu1 %v2023_v34 }
 0xd81   : > { %v2185_v35 = vpop.f32.mrb[12].mxu0 }
 0xd82   : > { %v4451_v36 = vpop.f32.mrb[13].mxu0  ;;  %v2189_v37 = vsel %vm667_vm2, %v2185_v35, -inf }
 0xd83   : > { %2190 = vmax.xlane.f32.xlu0 %v2189_v37 }
 0xd85   : > { %v2351_v38 = vpop.f32.mrb[14].mxu0 }
 0xd86   : > { %v4461_v39 = vpop.f32.mrb[15].mxu0  ;;  %v2355_v40 = vsel %vm667_vm2, %v2351_v38, -inf }
 0xd87   : > { %2356 = vmax.xlane.f32.xlu0 %v2355_v40  ;;  %v4121_v40 = vld [vmem:[%s5935_s6 + $0x1] ss:$0 sm:$0xff]  ;;  %s5953_s6 = sld [smem:[#allocation25_spill]] }
 0xd90   : > { %1869 = vrot.lane.b32.xlu1 %v5414_v18, %s5940_s16 }
 0xe0b   : > { %v1859_v41 = vpop.xlane.xlu0 %1858 }
 0xe0c   : > { %v1860_v42 = vsub.f32 %v1853_v29, %v1859_v41  ;;  %v2025_v43 = vpop.xlane.xlu1 %2024 }
 0xe0d   : > { %v2026_v44 = vsub.f32 %v2019_v31, %v2025_v43 }
 0xe0e   : > { %v1861_v45 = vmul.f32 1.442695, %v1860_v42 }
 0xe0f   : > { %v2027_v46 = vmul.f32 1.442695, %v2026_v44 }
 0xe10   : > { %4784 = vpow2.f32 %v1861_v45  ;;  %v1870_v47 = vpop.permute.xlu1 %1869  ;;  %v2191_v48 = vpop.xlane.xlu0 %2190 }
 0xe11   : > { %4786 = vpow2.f32 %v2027_v46  ;;  %v2192_v49 = vsub.f32 %v2185_v35, %v2191_v48  ;;  %4433 = vmatpush3.msra.mxu1 %v1870_v47 }
 0xe12   : > { %4442 = vmatprep.subr.mxu1 %v4965_v13 }
 0xe13   : > { %v2193_v51 = vmul.f32 1.442695, %v2192_v49 }
 0xe14   : > { %v2357_v52 = vpop.xlane.xlu0 %2356 }
 0xe15   : > { %4788 = vpow2.f32 %v2193_v51  ;;  %v2358_v53 = vsub.f32 %v2351_v38, %v2357_v52  ;;  %v4127_v52 = vld [vmem:[%s5861_s9 + $0x20] sm:$0xff] }
 0xe17   : > { %v2359_v54 = vmul.f32 1.442695, %v2358_v53 }
 0xe19   : > { %4790 = vpow2.f32 %v2359_v54  ;;  %v4129_v54 = vld [vmem:[%s5861_s9 + $0x30] sm:$0xff] }
 0xe1a   : > { %v4785_v55 = vpop.eup %4784 }
 0xe1b   : > { %v4787_v56 = vpop.eup %4786  ;;  %v1863_v0 = vsel %vm667_vm2, %v4785_v55, 0.0 }
 0xe1c   : > { %1864 = vadd.xlane.f32.xlu1 %v1863_v0  ;;  %v2029_v58 = vsel %vm667_vm2, %v4787_v56, 0.0 }
 0xe1d   : > { %2030 = vadd.xlane.f32.xlu0 %v2029_v58 }
 0xe1f   : > { %v4789_v59 = vpop.eup %4788 }
 0xe20   : > { %v2195_v60 = vsel %vm667_vm2, %v4789_v59, 0.0 }
 0xe21   : > { %2196 = vadd.xlane.f32.xlu1 %v2195_v60 }
 0xe23   : > { %v4791_v61 = vpop.eup %4790 }
 0xe24   : > { %v2361_v62 = vsel %vm667_vm2, %v4791_v61, 0.0 }
 0xe25   : > { %2362 = vadd.xlane.f32.xlu0 %v2361_v62 }
 0xe32   : > { %2201 = vrot.lane.b32.xlu1 %v5414_v18, %s5941_s27 }
 0xe36   : > { %2367 = vrot.lane.b32.xlu1 %v5414_v18, %s5942_s28 }
 0xe3b   : > { %2035 = vrot.lane.b32.xlu0 %v5414_v18, %s5943_s14 }
 0xea9   : > { %v1865_v63 = vpop.xlane.xlu1 %1864 }
 0xeaa   : > { %4792 = vrcp.f32 %v1865_v63  ;;  %v2031_v50 = vpop.xlane.xlu0 %2030  ;;  %v4126_v63 = vld [vmem:[%s5860_s8 + $0x1] ss:$0 sm:$0xff] }
 0xeab   : > { %4794 = vrcp.f32 %v2031_v50 }
 0xeae   : > { %v2197_v1 = vpop.xlane.xlu1 %2196 }
 0xeaf   : > { %4796 = vrcp.f32 %v2197_v1 }
 0xeb2   : > { %v2363_v2 = vpop.xlane.xlu0 %2362  ;;  %v2202_v12 = vpop.permute.xlu1 %2201 }
 0xeb3   : > { %4798 = vrcp.f32 %v2363_v2  ;;  %v4134_v2 = vld [vmem:[%s5863_s11 + $0x40] sm:$0xff] }
 0xeb4   : > { %v4793_v3 = vpop.eup %4792 }
 0xeb5   : > { %v4795_v4 = vpop.eup %4794  ;;  %v1867_v5 = vmul.f32 %v4793_v3, %v4785_v55  ;;  %v4130_v55 = vld [vmem:[%s5861_s9 + $0x38] sm:$0xff]  ;;  %v4135_v3 = vld [vmem:[%s5863_s11 + $0x48] sm:$0xff] }
 0xeb6   : > { %v2033_v6 = vmul.f32 %v4795_v4, %v4787_v56  ;;  %v2036_v7 = vpop.permute.xlu0 %2035  ;;  %v2368_v17 = vpop.permute.xlu1 %2367  ;;  %v4646_v56 = vpack.c.bf16 %v4130_v55, %v4129_v54  ;;  %v4649_v4 = vpack.c.bf16 %v4135_v3, %v4134_v2  ;;  %v4147_v3 = vld [vmem:[%s5853_s1 + $0x2] ss:$0 sm:$0xff] }
 0xeb7   : > { %v1868_v8 = vadd.f32 %v1867_v5, %v5283_v25  ;;  %4435 = vmatmul.mubr.msk.f32.vlgmr.msra.gmra.mrb[18].mxu1 %vm667_vm2, %v1867_v5  ;;  %v4136_v5 = vld [vmem:[%s5863_s11 + $0x50] sm:$0xff] }
 0xeb8   : > { %4443 = vmatpush3.msra.mxu1 %v2036_v7  ;;  %4444 = vmatprep.mubr.msk.f32.mxu1 %vm4964_vm1, %v4965_v13 }
 0xeb9   : > { %v4797_v9 = vpop.eup %4796  ;;  %v2034_v11 = vadd.f32 %v2033_v6, %v1868_v8  ;;  %4452 = vmatprep.subr.mxu1 %v4965_v13  ;;  %v4138_v8 = vld [vmem:[%s5863_s11 + $0x60] sm:$0xff] }
 0xeba   : > { %v2199_v14 = vmul.f32 %v4797_v9, %v4789_v59  ;;  %v4139_v9 = vld [vmem:[%s5863_s11 + $0x68] sm:$0xff] }
 0xebb   : > { %4445 = vmatmul.mubr.msk.f32.vlgmr.msra.gmra.mrb[20].mxu1 %vm667_vm2, %v2033_v6  ;;  %v4137_v6 = vld [vmem:[%s5863_s11 + $0x58] sm:$0xff] }
 0xebc   : > { %v2200_v15 = vadd.f32 %v2199_v14, %v2034_v11  ;;  %4453 = vmatpush3.msra.mxu1 %v2202_v12  ;;  %4454 = vmatprep.mubr.msk.f32.mxu1 %vm4964_vm1, %v4965_v13  ;;  %v4652_v7 = vpack.c.bf16 %v4137_v6, %v4136_v5  ;;  %v4655_v11 = vpack.c.bf16 %v4139_v9, %v4138_v8  ;;  %v4140_v12 = vld [vmem:[%s5863_s11 + $0x70] sm:$0xff]  ;;  %v4148_v5 = vld [vmem:[%s5854_s2 + $0x2] ss:$0 sm:$0xff] }
 0xebd   : > { %v4799_v25 = vpop.eup %4798  ;;  %4462 = vmatprep.subr.mxu1 %v4965_v13  ;;  %v4154_v8 = vld [vmem:[%s5856_s4 + $0x2] ss:$0 sm:$0xff] }
 0xebe   : > { %v2365_v16 = vmul.f32 %v4799_v25, %v4791_v61  ;;  %v4125_v61 = vld [vmem:[%s5859_s7 + $0x1] ss:$0 sm:$0xff] }
 0xebf   : > { %4455 = vmatmul.mubr.msk.f32.vlgmr.msra.gmra.mrb[22].mxu1 %vm667_vm2, %v2199_v14  ;;  %v4141_v14 = vld [vmem:[%s5863_s11 + $0x78] sm:$0xff]  ;;  %v4132_v25 = vld [vmem:[%s5862_s10 + $0x1] ss:$0 sm:$0xff] }
 0xec0   : > { %v5475_v18 = vadd.f32 %v2365_v16, %v2200_v15  ;;  %4463 = vmatpush3.msra.mxu1 %v2368_v17  ;;  %4464 = vmatprep.mubr.msk.f32.mxu1 %vm4964_vm1, %v4965_v13  ;;  %v4658_v15 = vpack.c.bf16 %v4141_v14, %v4140_v12 }
 0xec1   : > { %4642 = vmatprep.subr.bf16.mxu1 %v4963_v10 }
 0xec3   : > { %4465 = vmatmul.mubr.msk.f32.vlgmr.msra.gmra.mrb[24].mxu1 %vm667_vm2, %v2365_v16 }
 0xec4   : > { %4486 = vmatprep.mubr.msk.f32.mxu1 %vm4964_vm1, %v4965_v13 }
 0xf8a   : > { %v1941_v26 = vpop.f32.mrb[18].mxu1 }
 0xf8b   : > { %v4436_v27 = vpop.f32.mrb[19].mxu1 }
 0xf8e   : > { %v2107_v28 = vpop.f32.mrb[20].mxu1 }
 0xf8f   : > { %2444 = vrot.lane.b32.xlu0 %v2107_v28, %s5944_s15  ;;  %v4446_v29 = vpop.f32.mrb[21].mxu1 }
 0xf92   : > { %v2273_v30 = vpop.f32.mrb[22].mxu1 }
 0xf93   : > { %2448 = vrot.lane.b32.xlu1 %v2273_v30, %s5945_s20  ;;  %v4456_v31 = vpop.f32.mrb[23].mxu1 }
 0xf96   : > { %v2439_v32 = vpop.f32.mrb[24].mxu1 }
 0xf97   : > { %2452 = vrot.lane.b32.xlu0 %v2439_v32, %s5946_s22  ;;  %v4466_v33 = vpop.f32.mrb[25].mxu1 }
0x1001   : > { %v2445_v34 = vpop.permute.xlu0 %2444 }
0x1002   : > { %v2455_v36 = vsel %vm667_vm2, %v1941_v26, %v2445_v34 }
0x1005   : > { %v2449_v35 = vpop.permute.xlu1 %2448 }
0x1006   : > { %v2456_v37 = vsel %vm1342_vm3, %v2455_v36, %v2449_v35 }
0x1009   : > { %v2453_v38 = vpop.permute.xlu0 %2452 }
0x100a   : > { %v2457_v39 = vsel %vm1344_vm4, %v2456_v37, %v2453_v38 }
0x100b   : > { %4476 = vmatmul.mubr.msk.f32.vlgmr.msra.gmra.mrb[16].mxu0 %vm550_vm0, %v2457_v39 }
0x100c   : > { %4505 = vmatprep.mubr.msk.f32.mxu0 %vm4964_vm1, %v4965_v13  ;;  %4650 = vmatpush3.bf16.msra.mxu0 %v4649_v4 }
0x100d   : > { %4651 = vmatprep.subr.bf16.mxu0 %v4963_v10 }
0x1010   : > { %4653 = vmatpush3.bf16.msra.mxu0 %v4652_v7 }
0x1011   : > { %4654 = vmatprep.subr.bf16.mxu0 %v4963_v10 }
0x1014   : > { %4656 = vmatpush3.bf16.msra.mxu0 %v4655_v11 }
0x1015   : > { %4657 = vmatprep.subr.bf16.mxu0 %v4963_v10 }
0x1018   : > { %4659 = vmatpush3.bf16.msra.mxu0 %v4658_v15 }
0x1019   : > { %4529 = vmatprep.subr.mxu0 %v4965_v13 }
0x10de   : > { %v2540_v41 = vpop.f32.mrb[16].mxu0 }
0x10df   : > { %v2541_v42 = vadd.f32 %v4121_v40, %v2540_v41  ;;  %v4477_v43 = vpop.f32.mrb[17].mxu0 }
0x10e1   : > { %v5510_v44 = vadd.f32 %v2541_v42, %v5382_v57  ;;  %v4128_v57 = vld [vmem:[%s5861_s9 + $0x28] sm:$0xff] }
0x10e2   : > { %v4643_v53 = vpack.c.bf16 %v4128_v57, %v4127_v52 }
0x10e3   : > { %v2549_v45 = vsel %vm550_vm0, %v5510_v44, 0.0 }
0x10e4   : > { %2550 = vadd.xlane.f32.xlu1 %v2549_v45  ;;  %4644 = vmatpush3.bf16.msra.mxu1 %v4643_v53 }
0x10e5   : > { %4645 = vmatprep.subr.bf16.mxu1 %v4963_v10 }
0x10e8   : > { %4647 = vmatpush3.bf16.msra.mxu1 %v4646_v56 }
0x10e9   : > { %4660 = vmatprep.subr.bf16.mxu1 %v4963_v10 }
0x1171   : > { %v2551_v46 = vpop.xlane.xlu1 %2550 }
0x1172   : > { %v2552_v47 = vmul.f32 0.03125, %v2551_v46 }
0x1174   : > { %v2553_v48 = vsub.f32 %v5510_v44, %v2552_v47  ;;  %v4143_v47 = vld [vmem:[%s5864_s12 + $0x1] ss:$0 sm:$0xff] }
0x1176   : > { %v2554_v49 = vmul.f32 %v2553_v48, %v2553_v48 }
0x1178   : > { %v2555_v51 = vsel %vm550_vm0, %v2554_v49, 0.0 }
0x1179   : > { %2556 = vadd.xlane.f32.xlu0 %v2555_v51 }
0x1206   : > { %v2557_v0 = vpop.xlane.xlu0 %2556 }
0x1207   : > { %v2558_v58 = vmul.f32 0.03125, %v2557_v0 }
0x1209   : > { %v2559_v59 = vadd.f32 1e-06, %v2558_v58  ;;  %v4149_v58 = vld [vmem:[%s5855_s3 + $0x40] sm:$0xff] }
0x120b   : > { %4800 = vrsqrt.f32 %v2559_v59 }
0x1215   : > { %v4801_v60 = vpop.eup %4800 }
0x1216   : > { %v2561_v62 = vmul.f32 %v4801_v60, %v2553_v48  ;;  %v4151_v60 = vld [vmem:[%s5855_s3 + $0x50] sm:$0xff] }
0x1218   : > { %v2568_v50 = vmul.f32 %v4125_v61, %v2561_v62  ;;  %v4152_v61 = vld [vmem:[%s5855_s3 + $0x58] sm:$0xff] }
0x1219   : > { %v4664_v62 = vpack.c.bf16 %v4152_v61, %v4151_v60 }
0x121a   : > { %v2575_v1 = vadd.f32 %v4126_v63, %v2568_v50 }
0x121c   : > { %4487 = vmatmul.mubr.msk.f32.vlgmr.msra.gmra.mrb[26].mxu1 %vm550_vm0, %v2575_v1 }
0x121d   : > { %4516 = vmatprep.mubr.msk.f32.mxu1 %vm4964_vm1, %v4965_v13 }
0x12ef   : > { %v2658_v16 = vpop.f32.mrb[26].mxu1 }
0x12f0   : > { %v2659_v17 = vadd.f32 %v4132_v25, %v2658_v16  ;;  %v4488_v19 = vpop.f32.mrb[27].mxu1 }
0x12f2   : > { %v2662_v20 = vmul.f32 0.70710677, %v2659_v17  ;;  %v2686_v43 = vmul.f32 0.5, %v2659_v17 }
0x12f4   : > { %v2663_v21 = vand.u32 2147483647, %v2662_v20  ;;  %vm2683_vm7 = vcmp.lt.f32.partialorder %v2662_v20, 0.0 }
0x12f6   : > { %v2664_v22 = vmul.f32 0.3275911, %v2663_v21  ;;  %v2677_v24 = vsub.f32 0.0, %v2663_v21 }
0x12f8   : > { %v2665_v23 = vadd.f32 1.0, %v2664_v22  ;;  %v2678_v27 = vmul.f32 %v2677_v24, %v2663_v21 }
0x12fa   : > { %4802 = vrcp.f32 %v2665_v23  ;;  %v2679_v30 = vmul.f32 1.442695, %v2678_v27 }
0x12fc   : > { %4804 = vpow2.f32 %v2679_v30 }
0x1304   : > { %v4803_v26 = vpop.eup %4802 }
0x1305   : > { %v2668_v28 = vmul.f32 1.0614054, %v4803_v26 }
0x1306   : > { %v4805_v38 = vpop.eup %4804 }
0x1307   : > { %v2669_v29 = vadd.f32 -1.4531521, %v2668_v28 }
0x1309   : > { %v2670_v31 = vmul.f32 %v4803_v26, %v2669_v29 }
0x130b   : > { %v2671_v32 = vadd.f32 1.4214138, %v2670_v31 }
0x130d   : > { %v2672_v33 = vmul.f32 %v4803_v26, %v2671_v32 }
0x130f   : > { %v2673_v34 = vadd.f32 -0.28449672, %v2672_v33 }
0x1311   : > { %v2674_v35 = vmul.f32 %v4803_v26, %v2673_v34 }
0x1313   : > { %v2675_v36 = vadd.f32 0.2548296, %v2674_v35 }
0x1315   : > { %v2676_v37 = vmul.f32 %v4803_v26, %v2675_v36 }
0x1317   : > { %v2681_v39 = vmul.f32 %v4805_v38, %v2676_v37 }
0x1319   : > { %v2682_v40 = vsub.f32 1.0, %v2681_v39 }
0x131b   : > { %v2684_v41 = vsub.f32 0.0, %v2682_v40 }
0x131d   : > { %v2685_v42 = vsel %vm2683_vm7, %v2684_v41, %v2682_v40 }
0x131e   : > { %v2687_v45 = vadd.f32 1.0, %v2685_v42 }
0x1320   : > { %v2688_v46 = vmul.f32 %v2687_v45, %v2686_v43 }
0x1322   : > { %4506 = vmatmul.mubr.msk.f32.vlgmr.msra.gmra.mrb[18].mxu0 %vm1586_vm6, %v2688_v46 }
0x1323   : > { %4531 = vmatprep.mubr.msk.f32.mxu0 %vm4964_vm1, %v4965_v13 }
0x13f5   : > { %v2775_v48 = vpop.f32.mrb[18].mxu0 }
0x13f6   : > { %v2776_v49 = vadd.f32 %v4143_v47, %v2775_v48  ;;  %v4507_v51 = vpop.f32.mrb[19].mxu0 }
0x13f8   : > { %v5577_v52 = vadd.f32 %v2776_v49, %v5510_v44  ;;  %v4150_v44 = vld [vmem:[%s5855_s3 + $0x48] sm:$0xff] }
0x13f9   : > { %v4661_v59 = vpack.c.bf16 %v4150_v44, %v4149_v58 }
0x13fa   : > { %v2784_v57 = vsel %vm550_vm0, %v5577_v52, 0.0 }
0x13fb   : > { %2785 = vadd.xlane.f32.xlu0 %v2784_v57  ;;  %4662 = vmatpush3.bf16.msra.mxu1 %v4661_v59 }
0x13fc   : > { %4663 = vmatprep.subr.bf16.mxu1 %v4963_v10 }
0x13ff   : > { %4665 = vmatpush3.bf16.msra.mxu1 %v4664_v62 }
0x1400   : > { %4519 = vmatprep.subr.mxu1 %v4965_v13 }
0x1488   : > { %v2786_v53 = vpop.xlane.xlu0 %2785 }
0x1489   : > { %v2787_v54 = vmul.f32 0.03125, %v2786_v53 }
0x148b   : > { %v2788_v55 = vsub.f32 %v5577_v52, %v2787_v54 }
0x148d   : > { %v2789_v56 = vmul.f32 %v2788_v55, %v2788_v55 }
0x148f   : > { %v2790_v0 = vsel %vm550_vm0, %v2789_v56, 0.0 }
0x1490   : > { %2791 = vadd.xlane.f32.xlu1 %v2790_v0 }
0x151d   : > { %v2792_v63 = vpop.xlane.xlu1 %2791 }
0x151e   : > { %v2793_v50 = vmul.f32 0.03125, %v2792_v63 }
0x1520   : > { %v2794_v1 = vadd.f32 1e-06, %v2793_v50 }
0x1522   : > { %4806 = vrsqrt.f32 %v2794_v1 }
0x152c   : > { %v4807_v2 = vpop.eup %4806 }
0x152d   : > { %v2796_v4 = vmul.f32 %v4807_v2, %v2788_v55 }
0x152f   : > { %v2803_v6 = vmul.f32 %v4147_v3, %v2796_v4 }
0x1531   : > { %v2810_v7 = vadd.f32 %v4148_v5, %v2803_v6 }
0x1533   : > { %4517 = vmatmul.mubr.msk.f32.vlgmr.msra.gmra.mrb[28].mxu1 %vm550_vm0, %v2810_v7 }
0x1534   : > { %4521 = vmatprep.mubr.msk.f32.mxu1 %vm4964_vm1, %v4965_v13 }
0x1606   : > { %v2893_v9 = vpop.f32.mrb[28].mxu1 }
0x1607   : > { %v5609_v11 = vadd.f32 %v4154_v8, %v2893_v9  ;;  %v4518_v12 = vpop.f32.mrb[29].mxu1 }
0x1609   : > { %3066 = vrot.lane.b32.xlu1 %v5609_v11, %s5947_s23  ;;  %2899 = vrot.lane.b32.xlu0 %v5609_v11, %s5948_s24  ;;  %v2897_v14 = vmul.f32 0.35355338, %v5609_v11  ;;  %s3938_s23 = scalar_lea.sflag [#allocation7], %s5172_s21 }
0x160d   : > { %3232 = vrot.lane.b32.xlu0 %v5609_v11, %s5949_s19  ;;  %3064 = vrot.lane.b32.xlu1 %v2897_v14, %s5936_s30  ;;  %s546_s30 = scalar_lea.vmem [#allocation6], %s5172_s21  ;;  %s4980_s19 = smov [#allocation6]  }
0x1611   : > { %3398 = vrot.lane.b32.xlu0 %v5609_v11, %s5937_s26  ;;  %3230 = vrot.lane.b32.xlu1 %v2897_v14, %s5938_s13  ;;  %s4866_s26 = sshll.u32 %s4980_s19, 4  ;;  %s4867_s26 = int_to_ptr.vmem [resolvable:$false] %s4866_s26 }
0x1612   : > { %s4868_s13 = scalar_lea.vmem %s4867_s26, 32 }
0x1615   : > { %3396 = vrot.lane.b32.xlu1 %v2897_v14, %s5939_s17 }
0x167b   : > { %v3067_v15 = vpop.permute.xlu1 %3066  ;;  %v2900_v25 = vpop.permute.xlu0 %2899 }
0x167c   : > { %4520 = vmatpush3.xpose.msk.msra.mxu1 %vm667_vm2, %v2900_v25  ;;  %4530 = vmatpush3.xpose.msk.msra.mxu0 %vm667_vm2, %v3067_v15  ;;  %v4169_v15 = vld [vmem:[%s5857_s5 + $0x48] sm:$0xff] }
0x167d   : > { %4539 = vmatprep.subr.mxu0 %v4965_v13  ;;  %4524 = vmatprep.subr.mxu1 %v4965_v13 }
0x167f   : > { %v3233_v16 = vpop.permute.xlu0 %3232  ;;  %v3065_v17 = vpop.permute.xlu1 %3064  ;;  %4522 = vmatmul.mubr.msk.f32.vlgmr.msra.gmra.mrb[30].mxu1 %vm667_vm2, %v2897_v14  ;;  %v4168_v14 = vld [vmem:[%s5857_s5 + $0x40] sm:$0xff] }
0x1680   : > { %4532 = vmatmul.mubr.msk.f32.vlgmr.msra.gmra.mrb[20].mxu0 %vm667_vm2, %v3065_v17  ;;  %4526 = vmatprep.mubr.msk.f32.mxu1 %vm4964_vm1, %v4965_v13  ;;  %v4667_v25 = vpack.c.bf16 %v4169_v15, %v4168_v14  ;;  %v4171_v17 = vld [vmem:[%s5857_s5 + $0x58] sm:$0xff] }
0x1681   : > { %4540 = vmatpush3.xpose.msk.msra.mxu0 %vm667_vm2, %v3233_v16  ;;  %4541 = vmatprep.mubr.msk.f32.mxu0 %vm4964_vm1, %v4965_v13  ;;  %v4170_v16 = vld [vmem:[%s5857_s5 + $0x50] sm:$0xff] }
0x1682   : > { %4549 = vmatprep.subr.mxu0 %v4965_v13 }
0x1683   : > { %v3399_v19 = vpop.permute.xlu0 %3398  ;;  %v3231_v20 = vpop.permute.xlu1 %3230 }
0x1684   : > { %4542 = vmatmul.mubr.msk.f32.vlgmr.msra.gmra.mrb[22].mxu0 %vm667_vm2, %v3231_v20 }
0x1685   : > { %4550 = vmatpush3.xpose.msk.msra.mxu0 %vm667_vm2, %v3399_v19  ;;  %4551 = vmatprep.mubr.msk.f32.mxu0 %vm4964_vm1, %v4965_v13  ;;  %v4670_v19 = vpack.c.bf16 %v4171_v17, %v4170_v16 }
0x1686   : > { %4666 = vmatprep.subr.bf16.mxu0 %v4963_v10 }
0x1687   : > { %v3397_v21 = vpop.permute.xlu1 %3396 }
0x1688   : > { %4552 = vmatmul.mubr.msk.f32.vlgmr.msra.gmra.mrb[24].mxu0 %vm667_vm2, %v3397_v21 }
0x1689   : > { %4567 = vmatprep.mubr.msk.f32.mxu0 %vm4964_vm1, %v4965_v13  ;;  %4668 = vmatpush3.bf16.msra.mxu0 %v4667_v25 }
0x168a   : > { %4669 = vmatprep.subr.bf16.mxu0 %v4963_v10 }
0x168d   : > { %4671 = vmatpush3.bf16.msra.mxu0 %v4670_v19 }
0x168e   : > { %4678 = vmatprep.subr.bf16.mxu0 %v4963_v10 }
0x1752   : > { %v2972_v22 = vpop.f32.mrb[30].mxu1 }
0x1753   : > { %v4523_v23 = vpop.f32.mrb[31].mxu1  ;;  %v3138_v24 = vpop.f32.mrb[20].mxu0  ;;  %v2976_v26 = vsel %vm667_vm2, %v2972_v22, -inf }
0x1754   : > { %v4533_v27 = vpop.f32.mrb[21].mxu0  ;;  %2977 = vmax.xlane.f32.xlu0 %v2976_v26  ;;  %v3142_v28 = vsel %vm667_vm2, %v3138_v24, -inf }
0x1755   : > { %3143 = vmax.xlane.f32.xlu1 %v3142_v28 }
0x1757   : > { %v3304_v29 = vpop.f32.mrb[22].mxu0 }
0x1758   : > { %v4543_v30 = vpop.f32.mrb[23].mxu0  ;;  %v3308_v31 = vsel %vm667_vm2, %v3304_v29, -inf }
0x1759   : > { %3309 = vmax.xlane.f32.xlu0 %v3308_v31 }
0x175b   : > { %v3470_v32 = vpop.f32.mrb[24].mxu0 }
0x175c   : > { %v4553_v33 = vpop.f32.mrb[25].mxu0  ;;  %v3474_v34 = vsel %vm667_vm2, %v3470_v32, -inf }
0x175d   : > { %3475 = vmax.xlane.f32.xlu0 %v3474_v34 }
0x1766   : > { %2988 = vrot.lane.b32.xlu1 %v5609_v11, %s5940_s16 }
0x17e1   : > { %v2978_v35 = vpop.xlane.xlu0 %2977 }
0x17e2   : > { %v2979_v36 = vsub.f32 %v2972_v22, %v2978_v35  ;;  %v3144_v37 = vpop.xlane.xlu1 %3143  ;;  %v4173_v35 = vld [vmem:[%s5950_s18 + $0x2] ss:$0 sm:$0xff]  ;;  %s3963_s18 = sshll.u32 %s546_s30, 4  ;;  %s3964_s18 = int_to_ptr.vmem [resolvable:$true] %s3963_s18 }
0x17e3   : > { %v3145_v38 = vsub.f32 %v3138_v24, %v3144_v37  ;;  %s4862_s24 = scalar_lea.vmem %s3964_s18, 16  ;;  %p4869_p7 = scmp.lt.s32.totalorder %s3964_s18, %s4867_s26 }
0x17e4   : > { %v2980_v39 = vmul.f32 1.442695, %v2979_v36  ;;  %p4863_p6 = scmp.ne.s32.totalorder %s3964_s18, %s4862_s24  ;;  %p4870_p10 = scmp.lt.s32.totalorder %s4868_s13, %s4862_s24 }
0x17e5   : > { %v3146_v40 = vmul.f32 1.442695, %v3145_v38 }
0x17e6   : > { %4808 = vpow2.f32 %v2980_v39  ;;  %v2989_v41 = vpop.permute.xlu1 %2988  ;;  %v3310_v42 = vpop.xlane.xlu0 %3309  ;;  %p4871_p2 = por %p4870_p10, %p4869_p7 }
0x17e7   : > { %4810 = vpow2.f32 %v3146_v40  ;;  %v3311_v43 = vsub.f32 %v3304_v29, %v3310_v42  ;;  %4525 = vmatpush3.msra.mxu1 %v2989_v41 }
0x17e8   : > { %4534 = vmatprep.subr.mxu1 %v4965_v13 }
0x17e9   : > { %v3312_v45 = vmul.f32 1.442695, %v3311_v43 }
0x17ea   : > { %v3476_v46 = vpop.xlane.xlu0 %3475 }
0x17eb   : > { %4812 = vpow2.f32 %v3312_v45  ;;  %v3477_v47 = vsub.f32 %v3470_v32, %v3476_v46  ;;  %v4179_v46 = vld [vmem:[%s5861_s9 + $0x40] sm:$0xff] }
0x17ed   : > { %v3478_v48 = vmul.f32 1.442695, %v3477_v47 }
0x17ef   : > { %4814 = vpow2.f32 %v3478_v48  ;;  %v4181_v48 = vld [vmem:[%s5861_s9 + $0x50] sm:$0xff] }
0x17f0   : > { %v4809_v49 = vpop.eup %4808 }
0x17f1   : > { %v4811_v51 = vpop.eup %4810  ;;  %v2982_v57 = vsel %vm667_vm2, %v4809_v49, 0.0 }
0x17f2   : > { %2983 = vadd.xlane.f32.xlu1 %v2982_v57  ;;  %v3148_v53 = vsel %vm667_vm2, %v4811_v51, 0.0 }
0x17f3   : > { %3149 = vadd.xlane.f32.xlu0 %v3148_v53 }
0x17f5   : > { %v4813_v54 = vpop.eup %4812 }
0x17f6   : > { %v3314_v55 = vsel %vm667_vm2, %v4813_v54, 0.0 }
0x17f7   : > { %3315 = vadd.xlane.f32.xlu1 %v3314_v55 }
0x17f9   : > { %v4815_v56 = vpop.eup %4814 }
0x17fa   : > { %v3480_v0 = vsel %vm667_vm2, %v4815_v56, 0.0 }
0x17fb   : > { %3481 = vadd.xlane.f32.xlu0 %v3480_v0 }
0x1808   : > { %3320 = vrot.lane.b32.xlu1 %v5609_v11, %s5941_s27 }
0x180c   : > { %3486 = vrot.lane.b32.xlu1 %v5609_v11, %s5942_s28  ;;  %s5951_s28 = sld [smem:[#allocation15_spill]] }
0x1811   : > { %3154 = vrot.lane.b32.xlu0 %v5609_v11, %s5943_s14 }
0x187f   : > { %v2984_v58 = vpop.xlane.xlu1 %2983 }
0x1880   : > { %4816 = vrcp.f32 %v2984_v58  ;;  %v3150_v44 = vpop.xlane.xlu0 %3149  ;;  %v4178_v58 = vld [vmem:[%s5860_s8 + $0x2] ss:$0 sm:$0xff] }
0x1881   : > { %4818 = vrcp.f32 %v3150_v44 }
0x1884   : > { %v3316_v59 = vpop.xlane.xlu1 %3315 }
0x1885   : > { %4820 = vrcp.f32 %v3316_v59 }
0x1888   : > { %v3482_v60 = vpop.xlane.xlu0 %3481  ;;  %v3321_v4 = vpop.permute.xlu1 %3320 }
0x1889   : > { %4822 = vrcp.f32 %v3482_v60  ;;  %v4186_v60 = vld [vmem:[%s5863_s11 + $0x80] sm:$0xff] }
0x188a   : > { %v4817_v61 = vpop.eup %4816 }
0x188b   : > { %v4819_v62 = vpop.eup %4818  ;;  %v2986_v63 = vmul.f32 %v4817_v61, %v4809_v49  ;;  %v4182_v49 = vld [vmem:[%s5861_s9 + $0x58] sm:$0xff]  ;;  %v4187_v61 = vld [vmem:[%s5863_s11 + $0x88] sm:$0xff] }
0x188c   : > { %v3152_v50 = vmul.f32 %v4819_v62, %v4811_v51  ;;  %v3155_v1 = vpop.permute.xlu0 %3154  ;;  %v3487_v9 = vpop.permute.xlu1 %3486  ;;  %v4676_v51 = vpack.c.bf16 %v4182_v49, %v4181_v48  ;;  %v4679_v62 = vpack.c.bf16 %v4187_v61, %v4186_v60 }
0x188d   : > { %v2987_v2 = vadd.f32 %v2986_v63, %v5475_v18  ;;  %4527 = vmatmul.mubr.msk.f32.vlgmr.msra.gmra.mrb[32].mxu1 %vm667_vm2, %v2986_v63  ;;  %v4188_v63 = vld [vmem:[%s5863_s11 + $0x90] sm:$0xff] }
0x188e   : > { %4535 = vmatpush3.msra.mxu1 %v3155_v1  ;;  %4536 = vmatprep.mubr.msk.f32.mxu1 %vm4964_vm1, %v4965_v13 }
0x188f   : > { %v4821_v3 = vpop.eup %4820  ;;  %4544 = vmatprep.subr.mxu1 %v4965_v13  ;;  %v3153_v5 = vadd.f32 %v3152_v50, %v2987_v2  ;;  %v4190_v2 = vld [vmem:[%s5863_s11 + $0xa0] sm:$0xff] }
0x1890   : > { %v3318_v6 = vmul.f32 %v4821_v3, %v4813_v54  ;;  %v4191_v3 = vld [vmem:[%s5863_s11 + $0xa8] sm:$0xff] }
0x1891   : > { %4537 = vmatmul.mubr.msk.f32.vlgmr.msra.gmra.mrb[34].mxu1 %vm667_vm2, %v3152_v50  ;;  %v4189_v50 = vld [vmem:[%s5863_s11 + $0x98] sm:$0xff] }
0x1892   : > { %4545 = vmatpush3.msra.mxu1 %v3321_v4  ;;  %4546 = vmatprep.mubr.msk.f32.mxu1 %vm4964_vm1, %v4965_v13  ;;  %v3319_v7 = vadd.f32 %v3318_v6, %v3153_v5  ;;  %v4682_v1 = vpack.c.bf16 %v4189_v50, %v4188_v63  ;;  %v4685_v4 = vpack.c.bf16 %v4191_v3, %v4190_v2  ;;  %v4192_v5 = vld [vmem:[%s5863_s11 + $0xb0] sm:$0xff] }
0x1893   : > { %v4823_v18 = vpop.eup %4822  ;;  %4554 = vmatprep.subr.mxu1 %v4965_v13 }
0x1894   : > { %v3484_v8 = vmul.f32 %v4823_v18, %v4815_v56  ;;  %v4177_v56 = vld [vmem:[%s5859_s7 + $0x2] ss:$0 sm:$0xff] }
0x1895   : > { %4547 = vmatmul.mubr.msk.f32.vlgmr.msra.gmra.mrb[36].mxu1 %vm667_vm2, %v3318_v6  ;;  %v4193_v6 = vld [vmem:[%s5863_s11 + $0xb8] sm:$0xff] }
0x1896   : > { %v3485_v11 = vadd.f32 %v3484_v8, %v3319_v7  ;;  %4555 = vmatpush3.msra.mxu1 %v3487_v9  ;;  %4556 = vmatprep.mubr.msk.f32.mxu1 %vm4964_vm1, %v4965_v13  ;;  %v4688_v18 = vpack.c.bf16 %v4193_v6, %v4192_v5  ;;  %v4184_v7 = vld [vmem:[%s5862_s10 + $0x2] ss:$0 sm:$0xff] }
0x1897   : > { %4672 = vmatprep.subr.bf16.mxu1 %v4963_v10 }
0x1898   : > { %v3929_v12 = vmul.f32 0.083333336, %v3485_v11 }
0x1899   : > { %4557 = vmatmul.mubr.msk.f32.vlgmr.msra.gmra.mrb[38].mxu1 %vm667_vm2, %v3484_v8 }
0x189a   : > { %4578 = vmatprep.mubr.msk.f32.mxu1 %vm4964_vm1, %v4965_v13  ;;  %3931 = vst.msk [vmem:[%s546_s30] sm:$0x1] %vm3930_vm8, %v3929_v12 }
0x1960   : > { %v3060_v20 = vpop.f32.mrb[32].mxu1 }
0x1961   : > { %v4528_v21 = vpop.f32.mrb[33].mxu1 }
0x1964   : > { %v3226_v22 = vpop.f32.mrb[34].mxu1 }
0x1965   : > { %3563 = vrot.lane.b32.xlu0 %v3226_v22, %s5944_s15  ;;  %v4538_v23 = vpop.f32.mrb[35].mxu1  ;;  %s5952_s15 = sld [smem:[#allocation18_spill]] }
0x1968   : > { %v3392_v24 = vpop.f32.mrb[36].mxu1 }
0x1969   : > { %3567 = vrot.lane.b32.xlu1 %v3392_v24, %s5945_s20  ;;  %v4548_v26 = vpop.f32.mrb[37].mxu1  ;;  %s4201_s20 = sshll.u32 %s5951_s28, 4 }
0x196a   : > { %s5775_s25 = scalar_lea.hbm %s5953_s6, %s4201_s20 }
0x196b   : > { %p5954_p11 = scmp.ne.s32.totalorder %s5952_s15, 0 }
0x196c   : > { %v3558_v27 = vpop.f32.mrb[38].mxu1 }
0x196d   : > { %3571 = vrot.lane.b32.xlu0 %v3558_v27, %s5946_s22  ;;  %v4558_v28 = vpop.f32.mrb[39].mxu1  ;;  %p4864_p12 = pnand %p4863_p6, %p5954_p11 }
0x196f   : > { %p4865_p13 = pneg %p4864_p12 }
0x1971   : > { %p4872_p4 = pnand %p4871_p2, %p4865_p13 }
0x19d7   : > { %v3564_v29 = vpop.permute.xlu0 %3563 }
0x19d8   : > { %v3574_v31 = vsel %vm667_vm2, %v3060_v20, %v3564_v29 }
0x19db   : > { %v3568_v30 = vpop.permute.xlu1 %3567 }
0x19dc   : > { %v3575_v32 = vsel %vm1342_vm3, %v3574_v31, %v3568_v30 }
0x19df   : > { %v3572_v33 = vpop.permute.xlu0 %3571 }
0x19e0   : > { %v3576_v34 = vsel %vm1344_vm4, %v3575_v32, %v3572_v33 }
0x19e1   : > { %4568 = vmatmul.mubr.msk.f32.vlgmr.msra.gmra.mrb[26].mxu0 %vm550_vm0, %v3576_v34 }
0x19e2   : > { %4597 = vmatprep.mubr.msk.f32.mxu0 %vm4964_vm1, %v4965_v13  ;;  %4680 = vmatpush3.bf16.msra.mxu0 %v4679_v62 }
0x19e3   : > { %4681 = vmatprep.subr.bf16.mxu0 %v4963_v10 }
0x19e6   : > { %4683 = vmatpush3.bf16.msra.mxu0 %v4682_v1 }
0x19e7   : > { %4684 = vmatprep.subr.bf16.mxu0 %v4963_v10 }
0x19ea   : > { %4686 = vmatpush3.bf16.msra.mxu0 %v4685_v4 }
0x19eb   : > { %4687 = vmatprep.subr.bf16.mxu0 %v4963_v10 }
0x19ee   : > { %4689 = vmatpush3.bf16.msra.mxu0 %v4688_v18 }
0x1ab4   : > { %v3659_v36 = vpop.f32.mrb[26].mxu0 }
0x1ab5   : > { %v3660_v37 = vadd.f32 %v4173_v35, %v3659_v36  ;;  %v4569_v38 = vpop.f32.mrb[27].mxu0 }
0x1ab6   : > { %v4195_v38 = vld [vmem:[%s5864_s12 + $0x2] ss:$0 sm:$0xff] }
0x1ab7   : > { %v5706_v39 = vadd.f32 %v3660_v37, %v5577_v52  ;;  %v4180_v52 = vld [vmem:[%s5861_s9 + $0x48] sm:$0xff] }
0x1ab8   : > { %v4673_v47 = vpack.c.bf16 %v4180_v52, %v4179_v46 }
0x1ab9   : > { %v3668_v40 = vsel %vm550_vm0, %v5706_v39, 0.0 }
0x1aba   : > { %3669 = vadd.xlane.f32.xlu1 %v3668_v40  ;;  %4674 = vmatpush3.bf16.msra.mxu1 %v4673_v47 }
0x1abb   : > { %4675 = vmatprep.subr.bf16.mxu1 %v4963_v10 }
0x1abe   : > { %4677 = vmatpush3.bf16.msra.mxu1 %v4676_v51 }
0x1b47   : > { %v3670_v41 = vpop.xlane.xlu1 %3669 }
0x1b48   : > { %v3671_v42 = vmul.f32 0.03125, %v3670_v41 }
0x1b4a   : > { %v3672_v43 = vsub.f32 %v5706_v39, %v3671_v42 }
0x1b4c   : > { %v3673_v45 = vmul.f32 %v3672_v43, %v3672_v43 }
0x1b4e   : > { %v3674_v13 = vsel %vm550_vm0, %v3673_v45, 0.0 }
0x1b4f   : > { %3675 = vadd.xlane.f32.xlu0 %v3674_v13 }
0x1bdc   : > { %v3676_v57 = vpop.xlane.xlu0 %3675 }
0x1bdd   : > { %v3677_v53 = vmul.f32 0.03125, %v3676_v57 }
0x1bdf   : > { %v3678_v54 = vadd.f32 1e-06, %v3677_v53 }
0x1be1   : > { %4824 = vrsqrt.f32 %v3678_v54 }
0x1beb   : > { %v4825_v55 = vpop.eup %4824 }
0x1bec   : > { %v3680_v0 = vmul.f32 %v4825_v55, %v3672_v43 }
0x1bee   : > { %v3687_v44 = vmul.f32 %v4177_v56, %v3680_v0 }
0x1bf0   : > { %v3694_v59 = vadd.f32 %v4178_v58, %v3687_v44 }
0x1bf2   : > { %4579 = vmatmul.mubr.msk.f32.vlgmr.msra.gmra.mrb[40].mxu1 %vm550_vm0, %v3694_v59 }
0x1cc5   : > { %v3777_v8 = vpop.f32.mrb[40].mxu1 }
0x1cc6   : > { %v3778_v9 = vadd.f32 %v4184_v7, %v3777_v8  ;;  %v4580_v11 = vpop.f32.mrb[41].mxu1 }
0x1cc8   : > { %v3781_v12 = vmul.f32 0.70710677, %v3778_v9  ;;  %v3805_v35 = vmul.f32 0.5, %v3778_v9 }
0x1cca   : > { %v3782_v14 = vand.u32 2147483647, %v3781_v12  ;;  %vm3802_vm9 = vcmp.lt.f32.partialorder %v3781_v12, 0.0 }
0x1ccc   : > { %v3783_v10 = vmul.f32 0.3275911, %v3782_v14  ;;  %v3796_v25 = vsub.f32 0.0, %v3782_v14 }
0x1cce   : > { %v3784_v15 = vadd.f32 1.0, %v3783_v10  ;;  %v3797_v17 = vmul.f32 %v3796_v25, %v3782_v14 }
0x1cd0   : > { %4826 = vrcp.f32 %v3784_v15  ;;  %v3798_v21 = vmul.f32 1.442695, %v3797_v17 }
0x1cd2   : > { %4828 = vpow2.f32 %v3798_v21 }
0x1cda   : > { %v4827_v16 = vpop.eup %4826 }
0x1cdb   : > { %v3787_v19 = vmul.f32 1.0614054, %v4827_v16 }
0x1cdc   : > { %v4829_v30 = vpop.eup %4828 }
0x1cdd   : > { %v3788_v20 = vadd.f32 -1.4531521, %v3787_v19 }
0x1cdf   : > { %v3789_v22 = vmul.f32 %v4827_v16, %v3788_v20 }
0x1ce1   : > { %v3790_v23 = vadd.f32 1.4214138, %v3789_v22 }
0x1ce3   : > { %v3791_v24 = vmul.f32 %v4827_v16, %v3790_v23 }
0x1ce5   : > { %v3792_v26 = vadd.f32 -0.28449672, %v3791_v24 }
0x1ce7   : > { %v3793_v27 = vmul.f32 %v4827_v16, %v3792_v26 }
0x1ce9   : > { %v3794_v28 = vadd.f32 0.2548296, %v3793_v27 }
0x1ceb   : > { %v3795_v29 = vmul.f32 %v4827_v16, %v3794_v28 }
0x1ced   : > { %v3800_v31 = vmul.f32 %v4829_v30, %v3795_v29 }
0x1cef   : > { %v3801_v32 = vsub.f32 1.0, %v3800_v31 }
0x1cf1   : > { %v3803_v33 = vsub.f32 0.0, %v3801_v32 }
0x1cf3   : > { %v3804_v34 = vsel %vm3802_vm9, %v3803_v33, %v3801_v32 }
0x1cf4   : > { %v3806_v36 = vadd.f32 1.0, %v3804_v34 }
0x1cf6   : > { %v3807_v37 = vmul.f32 %v3806_v36, %v3805_v35 }
0x1cf8   : > { %4598 = vmatmul.mubr.msk.f32.vlgmr.msra.gmra.mrb[28].mxu0 %vm1586_vm6, %v3807_v37 }
0x1dcb   : > { %v3894_v40 = vpop.f32.mrb[28].mxu0 }
0x1dcc   : > { %v3895_v41 = vadd.f32 %v4195_v38, %v3894_v40  ;;  %v4599_v42 = vpop.f32.mrb[29].mxu0 }
0x1dce   : > { %v3898_v43 = vadd.f32 %v3895_v41, %v5706_v39 }
0x1dd0   : > { %v3901_v45 = vsel %vm550_vm0, %v3898_v43, 0.0 }
0x1dd1   : > { %3902 = vadd.xlane.f32.xlu0 %v3901_v45 }
0x1e5e   : > { %v3903_v13 = vpop.xlane.xlu0 %3902 }
0x1e5f   : > { %v3904_v46 = vmul.f32 0.03125, %v3903_v13 }
0x1e61   : > { %v3905_v52 = vsub.f32 %v3898_v43, %v3904_v46 }
0x1e63   : > { %v3906_v47 = vmul.f32 %v3905_v52, %v3905_v52 }
0x1e65   : > { %v3907_v48 = vsel %vm550_vm0, %v3906_v47, 0.0 }
0x1e66   : > { %3908 = vadd.xlane.f32.xlu1 %v3907_v48 }
0x1e67   : > { %4875 = shalt.err (!%p4872_p4)
}
0x1e68   : > { %s4876_s30 = scalar_lea.hbm %s5775_s25, 16  ;;  %s4880_s27 = scalar_lea.hbm %s5953_s6, 32 }
0x1e69   : > { %p4877_p5 = scmp.ne.s32.totalorder %s5775_s25, %s4876_s30  ;;  %p4881_p0 = scmp.lt.u32.totalorder %s5775_s25, %s5953_s6 }
0x1e6a   : > { %p4882_p1 = scmp.lt.u32.totalorder %s4880_s27, %s4876_s30  ;;  %p4884_p6 = scmp.lt.u32.totalorder %s4876_s30, %s5775_s25 }
0x1e6b   : > { %p4878_p8 = pnand %p4877_p5, %p5954_p11 }
0x1e6c   : > { %p4883_p3 = por %p4882_p1, %p4881_p0 }
0x1e6d   : > { %p4879_p9 = pneg %p4878_p8 }
0x1e6e   : > { %p4885_p12 = por %p4884_p6, %p4883_p3 }
0x1e70   : > { %p4886_p13 = pnand %p4885_p12, %p4879_p9 }
0x1e72   : > { %4889 = shalt.err (!%p4886_p13)
}
0x1e73   : > { %4693 = dma.vmem_to_hbm [thread:$0]  (%p5954_p11), %s3964_s18, 16, %s5775_s25, %s3938_s23  }
0x1e74   : > { %s5955_s29 = sld [smem:[#allocation22_spill]]  ;;  %s5956_s26 = sld [smem:[#allocation23_spill]] }
0x1e75   : > { %s4200_s13 = sshll.u32 %s5951_s28, 7  ;;  %s5957_s30 = sshll.u32 %s5172_s21, 3 }
0x1e76   : > { %s540_s17 = scalar_lea.vmem [#allocation5], %s5957_s30  ;;  %s5958_s16 = sld [smem:[#allocation24_spill]] }
0x1e77   : > { %s3950_s18 = sshll.u32 %s540_s17, 4  ;;  %s3933_s14 = scalar_lea.sflag [#allocation4], %s5172_s21  ;;  %s5809_s18 = int_to_ptr.vmem [resolvable:$true] %s3950_s18 }
0x1e78   : > { %s4890_s0 = scalar_lea.vmem %s5809_s18, 128  ;;  %s4981_s28 = smov [#allocation5]  }
0x1e79   : > { %p4891_p7 = scmp.ne.s32.totalorder %s5809_s18, %s4890_s0  ;;  %s4894_s20 = sshll.u32 %s4981_s28, 4  ;;  %s4895_s20 = int_to_ptr.vmem [resolvable:$false] %s4894_s20 }
0x1e7a   : > { %v4197_v53 = vld [vmem:[%s5955_s29] ss:$0 sm:$0xff]  ;;  %s4896_s22 = scalar_lea.vmem %s4895_s20, 256  ;;  %p4897_p4 = scmp.lt.s32.totalorder %s5809_s18, %s4895_s20 }
0x1e7b   : > { %v4198_v55 = vld [vmem:[%s5956_s26] ss:$0 sm:$0xff]  ;;  %p4892_p10 = pnand %p4891_p7, %p5954_p11  ;;  %p4898_p5 = scmp.lt.s32.totalorder %s4896_s22, %s4890_s0 }
0x1e7c   : > { %s5807_s27 = scalar_lea.hbm %s5958_s16, %s4200_s13 }
0x1e7d   : > { %p4893_p2 = pneg %p4892_p10  ;;  %p4899_p8 = por %p4898_p5, %p4897_p4 }
0x1e7f   : > { %p4900_p9 = pnand %p4899_p8, %p4893_p2 }
0x1ef3   : > { %v3909_v39 = vpop.xlane.xlu1 %3908 }
0x1ef4   : > { %v3910_v49 = vmul.f32 0.03125, %v3909_v39 }
0x1ef6   : > { %v3911_v51 = vadd.f32 1e-06, %v3910_v49 }
0x1ef8   : > { %4830 = vrsqrt.f32 %v3911_v51 }
0x1f02   : > { %v4831_v57 = vpop.eup %4830 }
0x1f03   : > { %v3913_v54 = vmul.f32 %v4831_v57, %v3905_v52 }
0x1f05   : > { %v3920_v56 = vmul.f32 %v4197_v53, %v3913_v54 }
0x1f07   : > { %v3927_v0 = vadd.f32 %v4198_v55, %v3920_v56 }
0x1f09   : > { %3928 = vst.msk [vmem:[%s540_s17] sm:$0xff] %vm550_vm0, %v3927_v0 }
0x1f0a   : > { %4903 = shalt.err (!%p4900_p9)
}
0x1f0b   : > { %s4904_s21 = scalar_lea.hbm %s5807_s27, 128  ;;  %s4908_s19 = scalar_lea.hbm %s5958_s16, 256 }
0x1f0c   : > { %p4905_p0 = scmp.ne.s32.totalorder %s5807_s27, %s4904_s21  ;;  %p4909_p6 = scmp.lt.u32.totalorder %s5807_s27, %s5958_s16 }
0x1f0d   : > { %p4910_p12 = scmp.lt.u32.totalorder %s4908_s19, %s4904_s21  ;;  %p4912_p7 = scmp.lt.u32.totalorder %s4904_s21, %s5807_s27 }
0x1f0e   : > { %p4906_p1 = pnand %p4905_p0, %p5954_p11 }
0x1f0f   : > { %p4911_p13 = por %p4910_p12, %p4909_p6 }
0x1f10   : > { %p4907_p3 = pneg %p4906_p1 }
0x1f11   : > { %p4913_p10 = por %p4912_p7, %p4911_p13 }
0x1f13   : > { %p4914_p2 = pnand %p4913_p10, %p4907_p3 }
0x1f15   : > { %4917 = shalt.err (!%p4914_p2)
}
0x1f16   : > { %4692 = dma.vmem_to_hbm [thread:$0]  (%p5954_p11), %s5809_s18, 128, %s5807_s27, %s3933_s14  }
0x1f17 PF: > { %s5959_s30 = sld [smem:[#allocation11_spill]]  ;;  %s5960_s17 = sld [smem:[#allocation19_spill]] }
0x1f18   : > { %s5961_s25 = sld [smem:[#allocation14_spill]] }
0x1f1d   : > { %s3975_s23 = sand.u32 1, %s5959_s30   ;;  %p5962_p4 = scmp.ne.s32.totalorder %s5960_s17, 0 }
0x1f1e   : > { %p5963_p5 = scmp.ge.s32.totalorder %s5961_s25, 2  ;;  %s3976_s0 = scalar_lea.sflag [#allocation4], %s3975_s23 }
0x1f20   : > { %p4701_p8 = pnand %p5963_p5, %p5962_p4 }
0x1f22   : > { %4939 = dma.done.wait (!%p4701_p8), %s3976_s0, 128  }
0x1f23   : > { %4941 = vsyncadd (!%p4701_p8), %s3976_s0, 4294967168  ;;  %s3985_s28 = scalar_lea.sflag [#allocation7], %s3975_s23 }
0x1f24   : > { %4943 = dma.done.wait (!%p4701_p8), %s3985_s28, 16  }
0x1f25   : > { %4945 = vsyncadd (!%p4701_p8), %s3985_s28, 4294967280  ;;  %s5964_s24 = sld [smem:[#allocation16_spill]]  ;;  %s5965_s21 = sld [smem:[#allocation12_spill]] }
0x1f26   : > { %s5966_s22 = sld [smem:[#allocation13_spill]]  ;;  %s5967_s23 = sld [smem:[#allocation17_spill]] }
0x1f2b   : > { %p33_p11 = scmp.ge.s32.totalorder %s5964_s24, 4  }
0x1f2d   :  { %35 = sbr.rel (!%p33_p11) target bundleno = 14 (0xe), region = 166 }
0x1f34   :  { %3989 = vsyncpa [#allocation3], 1 }
0x1f35   :  { %3991 = vsyncpa [#allocation3 + $0x1], 1 }
0x1f36   :  { %3992 = vsyncpa [#allocation4], 1 }
0x1f37   :  { %3994 = vsyncpa [#allocation4 + $0x1], 1 }
0x1f38   :  { %3995 = vsyncpa [#allocation7], 1 }
0x1f39   :  { %3997 = vsyncpa [#allocation7 + $0x1], 1 }

</bundles_post_ra>
